<compile_context>
chip_gen: v7x
topology: tpu7x:2x2x1
jax: 0.10.0
libtpu: 0.0.40
codegen_flags: <defaults>
</compile_context>

<pallas_src>
import functools

import jax
import jax.numpy as jnp
from jax import lax
from jax.experimental import pallas as pl
from jax.experimental.pallas import tpu as pltpu


# ----------------------------------------------------------------------------
# Kernel
# ----------------------------------------------------------------------------

def _lenet_kernel(tb, x5_ref, w1_ref, b1_ref, w2_ref, b2_ref,
                  fc1w_ref, fc1b_ref, fc2w_ref, fc2b_ref, out_ref):
    f32, bf16 = jnp.float32, jnp.bfloat16

    x5 = x5_ref[...].reshape(24 * tb, 140)    # bf16, rows ordered (s, a, b)
    w1 = w1_ref[...]                          # (140, 480) bf16  (5 taps along K)
    b1 = b1_ref[...]                          # (1, 480)   f32
    w2 = w2_ref[...]                          # (5, 240, 400) bf16
    b2 = b2_ref[...]                          # (1, 400)   f32
    fc1w = fc1w_ref[...]                      # (4, 200, 500) bf16
    fc1b = fc1b_ref[...]                      # (1, 500)   f32
    fc2w = fc2w_ref[...]                      # (500, 10)  f32
    fc2b = fc2b_ref[...]                      # (1, 10)    f32

    # ---- conv1 (5x5 VALID) + ReLU + 2x2 max-pool ----------------------------
    # One bf16 MXU matmul per height-parity pair (all 5 height taps fused along
    # K = 140).  Height pool = max of the two parity row blocks; width pool =
    # max of the two lane halves.  Cast to bf16 once (hoisted).
    def conv1_pool(lhs):                              # lhs: (12*tb, 140) bf16
        y = jnp.dot(lhs, w1, preferred_element_type=f32)          # (12*tb, 480)
        y = jnp.maximum(y + b1, 0.0)
        hmax = jnp.maximum(y[:6 * tb], y[6 * tb:])                # height pool
        return jnp.maximum(hmax[:, :240], hmax[:, 240:]).astype(bf16)

    p1e = conv1_pool(x5[:12 * tb])    # pooled rows hq = 2a   -> (6*tb, 240) bf16
    p1o = conv1_pool(x5[12 * tb:])    # pooled rows hq = 2a+1 -> (6*tb, 240) bf16

    # ---- conv2 (5x5 over 20 ch) + ReLU + 2x2 max-pool ------------------------
    # 5 bf16 MXU matmuls (one per height tap), both output-row parities stacked
    # along M: (8*tb, 240) x (240, 400), f32 accumulation.
    acc2 = jnp.zeros((8 * tb, 400), f32)
    for i in range(5):
        top = p1e if i % 2 == 0 else p1o              # output rows h2 = 2q
        bot = p1o if i % 2 == 0 else p1e              # output rows h2 = 2q + 1
        ot, ob = i // 2, (i + 1) // 2
        lhs = jnp.concatenate([top[ot * tb:(ot + 4) * tb],
                               bot[ob * tb:(ob + 4) * tb]], axis=0)
        acc2 = acc2 + jnp.dot(lhs, w2[i], preferred_element_type=f32)
    zh = jnp.maximum(acc2[:4 * tb], acc2[4 * tb:])    # height pool (commutes w/ ReLU)
    zh = jnp.maximum(zh + b2, 0.0)                    # bias + ReLU
    p2 = jnp.maximum(zh[:, :200], zh[:, 200:]).astype(bf16)       # (4*tb, 200)

    # ---- fc1 + ReLU (sum over the 4 pooled rows) ----------------------------
    acc = jnp.zeros((tb, 500), f32)
    for q in range(4):
        acc = acc + jnp.dot(p2[q * tb:(q + 1) * tb], fc1w[q],
                            preferred_element_type=f32)
    h = jnp.maximum(acc + fc1b, 0.0)                  # (tb, 500) f32

    # ---- fc2 + log_softmax ---------------------------------------------------
    logits = jnp.dot(h, fc2w, preferred_element_type=f32) + fc2b  # (tb, 10)
    m = jnp.max(logits, axis=-1, keepdims=True)
    lse = jnp.log(jnp.sum(jnp.exp(logits - m), axis=-1, keepdims=True))
    out_ref[...] = logits - m - lse


# ----------------------------------------------------------------------------
# One-time weight re-layout (call ONCE, reuse across forward calls)
# ----------------------------------------------------------------------------

def prepare_params(params):
    f32, bf16 = jnp.float32, jnp.bfloat16

    # conv1 (20,1,5,5) -> width-banded ("Toeplitz") matrix with all 5 height
    # taps concatenated along K:
    #   w1cat[28*i + p, wp*240 + wq*20 + c] = conv1_w[c, 0, i, p - (2*wq + wp)]
    # (zero when the tap offset falls outside [0, 5)).
    w1 = params["conv1_w"][:, 0].astype(f32)                  # (c, i, j)
    p = jnp.arange(28)[:, None]
    w = jnp.arange(24)[None, :]
    jj = p - w
    m1 = ((jj >= 0) & (jj < 5)).astype(f32)                   # (28, 24)
    t1 = jnp.transpose(w1, (1, 2, 0))[:, jnp.clip(jj, 0, 4), :]    # (5, 28, 24, 20)
    t1 = t1 * m1[None, :, :, None]
    w1t = t1.reshape(5, 28, 12, 2, 20).transpose(0, 1, 3, 2, 4).reshape(5, 28, 480)
    w1cat = w1t.reshape(140, 480).astype(bf16)
    b1t = jnp.tile(params["conv1_b"].astype(f32), 24).reshape(1, 480)

    # conv2 (50,20,5,5):
    #   w2t[i][wq*20 + c, w2p*200 + w2q*50 + c2] = conv2_w[c2, c, i, wq - (2*w2q + w2p)]
    w2 = params["conv2_w"].astype(f32)                        # (c2, c, i, j)
    wq = jnp.arange(12)[:, None]
    w2o = jnp.arange(8)[None, :]
    jj2 = wq - w2o
    m2 = ((jj2 >= 0) & (jj2 < 5)).astype(f32)                 # (12, 8)
    t2 = jnp.transpose(w2, (2, 1, 3, 0))[:, :, jnp.clip(jj2, 0, 4), :]  # (5,20,12,8,50)
    t2 = jnp.transpose(t2, (0, 2, 1, 3, 4)) * m2[None, :, None, :, None]
    w2t = t2.reshape(5, 240, 4, 2, 50).transpose(0, 1, 3, 2, 4).reshape(5, 240, 400)
    b2t = jnp.tile(params["conv2_b"].astype(f32), 8).reshape(1, 400)

    # fc1 (500,800): fold torch's NCHW flatten (f = c2*16 + h*4 + w) into the
    # weight, pre-transposed and split by pooled row index h.
    fc1w = params["fc1_w"].astype(f32).reshape(500, 50, 4, 4)       # (n, c2, h, w)
    fc1w = jnp.transpose(fc1w, (2, 3, 1, 0)).reshape(4, 200, 500)   # (h, (w,c2), n)
    fc2w = params["fc2_w"].astype(f32).T                             # (500, 10)

    return {
        "w1cat": w1cat, "b1": b1t,
        "w2": w2t.astype(bf16), "b2": b2t,
        "fc1w": fc1w.astype(bf16),
        "fc1b": params["fc1_b"].astype(f32).reshape(1, 500),
        "fc2w": fc2w,
        "fc2b": params["fc2_b"].astype(f32).reshape(1, 10),
    }


# ----------------------------------------------------------------------------
# Public forward
# ----------------------------------------------------------------------------

def _pick_tb(batch):
    # Batch tile: up to 128 (MXU M-fill; fits the v7x 64 MiB VMEM budget),
    # >= 2 grid steps whenever the batch allows it (both v7x TensorCores),
    # and a multiple of 16 so every bf16 row slice is packed-sublane aligned.
    if batch >= 256:
        return 128
    half = -(-batch // 2)                      # ceil(batch / 2)
    return max(16, min(128, ((half + 15) // 16) * 16))


@jax.jit
def net_forward(prepared, x_nchw):
    B = x_nchw.shape[0]
    tb = _pick_tb(B)
    bp = ((B + tb - 1) // tb) * tb

    x = x_nchw.reshape(B, 28, 28).astype(jnp.float32)
    if bp != B:
        x = jnp.pad(x, ((0, bp - B), (0, 0), (0, 0)))
    xf = x.reshape(bp, 28 * 28)
    # Height-only im2col in bf16: row (s*6 + a) of x5 holds image rows
    # 4a+s .. 4a+s+4 flattened into 140 lanes, so conv1 collapses to one MXU
    # matmul per height-parity pair and the input DMA is half the f32 bytes.
    x5 = jnp.stack([xf[:, 28 * (4 * a + s):28 * (4 * a + s) + 140]
                    for s in range(4) for a in range(6)],
                   axis=0).astype(jnp.bfloat16)                # (24, bp, 140)

    p = prepared
    out = pl.pallas_call(
        functools.partial(_lenet_kernel, tb),
        out_shape=jax.ShapeDtypeStruct((bp, 10), jnp.float32),
        grid_spec=pltpu.PrefetchScalarGridSpec(
            num_scalar_prefetch=0,
            grid=(bp // tb,),
            in_specs=[
                pl.BlockSpec((24, tb, 140), lambda i: (0, i, 0)),
                pl.BlockSpec((140, 480), lambda i: (0, 0)),
                pl.BlockSpec((1, 480), lambda i: (0, 0)),
                pl.BlockSpec((5, 240, 400), lambda i: (0, 0, 0)),
                pl.BlockSpec((1, 400), lambda i: (0, 0)),
                pl.BlockSpec((4, 200, 500), lambda i: (0, 0, 0)),
                pl.BlockSpec((1, 500), lambda i: (0, 0)),
                pl.BlockSpec((500, 10), lambda i: (0, 0)),
                pl.BlockSpec((1, 10), lambda i: (0, 0)),
            ],
            out_specs=pl.BlockSpec((tb, 10), lambda i: (i, 0)),
        ),
        compiler_params=pltpu.CompilerParams(
            dimension_semantics=("parallel",),
            vmem_limit_bytes=48 * 1024 * 1024,
        ),
    )(x5, p["w1cat"], p["b1"], p["w2"], p["b2"],
      p["fc1w"], p["fc1b"], p["fc2w"], p["fc2b"])
    return out[:B]


# ----------------------------------------------------------------------------
# Params, reference, demo
# ----------------------------------------------------------------------------

def init_params(key):
    ks = jax.random.split(key, 8)

    def w(k, shape, scale):
        return (scale * jax.random.normal(k, shape)).astype(jnp.float32)

    return {
        "conv1_w": w(ks[0], (20, 1, 5, 5), 0.10),   # nn.Conv2d(1, 20, 5, 1)
        "conv1_b": w(ks[1], (20,), 0.10),
        "conv2_w": w(ks[2], (50, 20, 5, 5), 0.05),  # nn.Conv2d(20, 50, 5, 1)
        "conv2_b": w(ks[3], (50,), 0.05),
        "fc1_w": w(ks[4], (500, 800), 0.03),        # nn.Linear(800, 500)
        "fc1_b": w(ks[5], (500,), 0.03),
        "fc2_w": w(ks[6], (10, 500), 0.05),         # nn.Linear(500, 10)
        "fc2_b": w(ks[7], (10,), 0.05),
    }


def _reference_forward(params, x_nchw):
    dn = ("NCHW", "OIHW", "NCHW")
    x = lax.conv_general_dilated(x_nchw.astype(jnp.float32), params["conv1_w"],
                                 (1, 1), "VALID", dimension_numbers=dn)
    x = jax.nn.relu(x + params["conv1_b"][None, :, None, None])
    B, C, H, W = x.shape
    x = x.reshape(B, C, H // 2, 2, W // 2, 2).max(axis=(3, 5))
    x = lax.conv_general_dilated(x, params["conv2_w"], (1, 1), "VALID",
                                 dimension_numbers=dn)
    x = jax.nn.relu(x + params["conv2_b"][None, :, None, None])
    B, C, H, W = x.shape
    x = x.reshape(B, C, H // 2, 2, W // 2, 2).max(axis=(3, 5))
    x = x.reshape(B, -1)
    x = jax.nn.relu(x @ params["fc1_w"].T + params["fc1_b"])
    x = x @ params["fc2_w"].T + params["fc2_b"]
    return jax.nn.log_softmax(x, axis=-1)


if __name__ == "__main__":
    key = jax.random.PRNGKey(0)
    kp, kx = jax.random.split(key)
    params = init_params(kp)
    # Weight re-layout hoisted out of the per-call path: computed once here.
    prepared = prepare_params(params)
    # fc1 expects 4*4*50 features, which requires a 28x28 single-channel input.
    x = jax.random.normal(kx, (2, 1, 28, 28), dtype=jnp.float32)

    out = jax.block_until_ready(net_forward(prepared, x))
    ref = jax.block_until_ready(jax.jit(_reference_forward)(params, x))

    assert out.shape == (2, 10)
    assert bool(jnp.all(jnp.isfinite(out)))
    assert bool(jnp.allclose(jnp.sum(jnp.exp(out), axis=1), 1.0, atol=1e-4))
    # Whole conv/fc MXU path now runs in bf16 (f32 accumulation) -> loose tol.
    assert float(jnp.max(jnp.abs(out - ref))) < 1e-1
    print("KERNEL_OK")
</pallas_src>

<mosaic_0001>
module attributes {stable_mosaic.version = 11 : i64} {
  func.func @_lenet_kernel(%arg0: i32, %arg1: memref<24x16x140xbf16, #tpu.memory_space<vmem>>, %arg2: memref<140x480xbf16, #tpu.memory_space<vmem>>, %arg3: memref<1x480xf32, #tpu.memory_space<vmem>>, %arg4: memref<5x240x400xbf16, #tpu.memory_space<vmem>>, %arg5: memref<1x400xf32, #tpu.memory_space<vmem>>, %arg6: memref<4x200x500xbf16, #tpu.memory_space<vmem>>, %arg7: memref<1x500xf32, #tpu.memory_space<vmem>>, %arg8: memref<500x10xf32, #tpu.memory_space<vmem>>, %arg9: memref<1x10xf32, #tpu.memory_space<vmem>>, %arg10: memref<16x10xf32, #tpu.memory_space<vmem>>) attributes {dimension_semantics = [#tpu.dimension_semantics<parallel>], iteration_bounds = array<i64: 1>, scalar_prefetch = 0 : i64, scratch_operands = 0 : i64, tpu.core_type = #tpu.core_type<tc>, window_params = [{transform_indices = @transform_0, window_bounds = array<i64: 24, 16, 140>}, {pipeline_mode = #tpu.pipeline_mode<synchronous>, transform_indices = @transform_1, window_bounds = array<i64: 140, 480>}, {pipeline_mode = #tpu.pipeline_mode<synchronous>, transform_indices = @transform_2, window_bounds = array<i64: 1, 480>}, {pipeline_mode = #tpu.pipeline_mode<synchronous>, transform_indices = @transform_3, window_bounds = array<i64: 5, 240, 400>}, {pipeline_mode = #tpu.pipeline_mode<synchronous>, transform_indices = @transform_4, window_bounds = array<i64: 1, 400>}, {pipeline_mode = #tpu.pipeline_mode<synchronous>, transform_indices = @transform_5, window_bounds = array<i64: 4, 200, 500>}, {pipeline_mode = #tpu.pipeline_mode<synchronous>, transform_indices = @transform_6, window_bounds = array<i64: 1, 500>}, {pipeline_mode = #tpu.pipeline_mode<synchronous>, transform_indices = @transform_7, window_bounds = array<i64: 500, 10>}, {pipeline_mode = #tpu.pipeline_mode<synchronous>, transform_indices = @transform_8, window_bounds = array<i64: 1, 10>}, {transform_indices = @transform_9, window_bounds = array<i64: 16, 10>}]} {
    %c0 = arith.constant 0 : index
    %c0_0 = arith.constant 0 : index
    %c0_1 = arith.constant 0 : index
    %0 = vector.load %arg1[%c0, %c0_0, %c0_1] : memref<24x16x140xbf16, #tpu.memory_space<vmem>>, vector<24x16x140xbf16>
    %1 = vector.shape_cast %0 : vector<24x16x140xbf16> to vector<384x140xbf16>
    %c0_2 = arith.constant 0 : index
    %c0_3 = arith.constant 0 : index
    %2 = vector.load %arg2[%c0_2, %c0_3] : memref<140x480xbf16, #tpu.memory_space<vmem>>, vector<140x480xbf16>
    %c0_4 = arith.constant 0 : index
    %c0_5 = arith.constant 0 : index
    %3 = vector.load %arg3[%c0_4, %c0_5] : memref<1x480xf32, #tpu.memory_space<vmem>>, vector<1x480xf32>
    %c0_6 = arith.constant 0 : index
    %c0_7 = arith.constant 0 : index
    %c0_8 = arith.constant 0 : index
    %4 = vector.load %arg4[%c0_6, %c0_7, %c0_8] : memref<5x240x400xbf16, #tpu.memory_space<vmem>>, vector<5x240x400xbf16>
    %c0_9 = arith.constant 0 : index
    %c0_10 = arith.constant 0 : index
    %5 = vector.load %arg5[%c0_9, %c0_10] : memref<1x400xf32, #tpu.memory_space<vmem>>, vector<1x400xf32>
    %c0_11 = arith.constant 0 : index
    %c0_12 = arith.constant 0 : index
    %c0_13 = arith.constant 0 : index
    %6 = vector.load %arg6[%c0_11, %c0_12, %c0_13] : memref<4x200x500xbf16, #tpu.memory_space<vmem>>, vector<4x200x500xbf16>
    %c0_14 = arith.constant 0 : index
    %c0_15 = arith.constant 0 : index
    %7 = vector.load %arg7[%c0_14, %c0_15] : memref<1x500xf32, #tpu.memory_space<vmem>>, vector<1x500xf32>
    %c0_16 = arith.constant 0 : index
    %c0_17 = arith.constant 0 : index
    %8 = vector.load %arg8[%c0_16, %c0_17] : memref<500x10xf32, #tpu.memory_space<vmem>>, vector<500x10xf32>
    %c0_18 = arith.constant 0 : index
    %c0_19 = arith.constant 0 : index
    %9 = vector.load %arg9[%c0_18, %c0_19] : memref<1x10xf32, #tpu.memory_space<vmem>>, vector<1x10xf32>
    %10 = vector.extract_strided_slice %1 {offsets = [0, 0], sizes = [192, 140], strides = [1, 1]} : vector<384x140xbf16> to vector<192x140xbf16>
    %cst = arith.constant dense<0.000000e+00> : vector<192x480xf32>
    %11 = tpu.matmul %10, %2, %cst {dimension_numbers = #tpu.dot_dimension_numbers<[1], [0], [0], [1], [0, 0, 1, 1], [], []>} : vector<192x140xbf16>, vector<140x480xbf16>, vector<192x480xf32> -> vector<192x480xf32>
    %12 = vector.broadcast %3 : vector<1x480xf32> to vector<192x480xf32>
    %13 = arith.addf %11, %12 : vector<192x480xf32>
    %cst_20 = arith.constant 0.000000e+00 : f32
    %14 = vector.broadcast %cst_20 : f32 to vector<192x480xf32>
    %15 = arith.maximumf %13, %14 : vector<192x480xf32>
    %16 = vector.extract_strided_slice %15 {offsets = [0, 0], sizes = [96, 480], strides = [1, 1]} : vector<192x480xf32> to vector<96x480xf32>
    %17 = vector.extract_strided_slice %15 {offsets = [96, 0], sizes = [96, 480], strides = [1, 1]} : vector<192x480xf32> to vector<96x480xf32>
    %18 = arith.maximumf %16, %17 : vector<96x480xf32>
    %19 = vector.extract_strided_slice %18 {offsets = [0, 0], sizes = [96, 240], strides = [1, 1]} : vector<96x480xf32> to vector<96x240xf32>
    %20 = vector.extract_strided_slice %18 {offsets = [0, 240], sizes = [96, 240], strides = [1, 1]} : vector<96x480xf32> to vector<96x240xf32>
    %21 = arith.maximumf %19, %20 : vector<96x240xf32>
    %22 = arith.truncf %21 : vector<96x240xf32> to vector<96x240xbf16>
    %23 = vector.extract_strided_slice %1 {offsets = [192, 0], sizes = [192, 140], strides = [1, 1]} : vector<384x140xbf16> to vector<192x140xbf16>
    %cst_21 = arith.constant dense<0.000000e+00> : vector<192x480xf32>
    %24 = tpu.matmul %23, %2, %cst_21 {dimension_numbers = #tpu.dot_dimension_numbers<[1], [0], [0], [1], [0, 0, 1, 1], [], []>} : vector<192x140xbf16>, vector<140x480xbf16>, vector<192x480xf32> -> vector<192x480xf32>
    %25 = vector.broadcast %3 : vector<1x480xf32> to vector<192x480xf32>
    %26 = arith.addf %24, %25 : vector<192x480xf32>
    %cst_22 = arith.constant 0.000000e+00 : f32
    %27 = vector.broadcast %cst_22 : f32 to vector<192x480xf32>
    %28 = arith.maximumf %26, %27 : vector<192x480xf32>
    %29 = vector.extract_strided_slice %28 {offsets = [0, 0], sizes = [96, 480], strides = [1, 1]} : vector<192x480xf32> to vector<96x480xf32>
    %30 = vector.extract_strided_slice %28 {offsets = [96, 0], sizes = [96, 480], strides = [1, 1]} : vector<192x480xf32> to vector<96x480xf32>
    %31 = arith.maximumf %29, %30 : vector<96x480xf32>
    %32 = vector.extract_strided_slice %31 {offsets = [0, 0], sizes = [96, 240], strides = [1, 1]} : vector<96x480xf32> to vector<96x240xf32>
    %33 = vector.extract_strided_slice %31 {offsets = [0, 240], sizes = [96, 240], strides = [1, 1]} : vector<96x480xf32> to vector<96x240xf32>
    %34 = arith.maximumf %32, %33 : vector<96x240xf32>
    %35 = arith.truncf %34 : vector<96x240xf32> to vector<96x240xbf16>
    %cst_23 = arith.constant 0.000000e+00 : f32
    %36 = vector.broadcast %cst_23 : f32 to vector<128x400xf32>
    %37 = vector.extract_strided_slice %22 {offsets = [0, 0], sizes = [64, 240], strides = [1, 1]} : vector<96x240xbf16> to vector<64x240xbf16>
    %38 = vector.extract_strided_slice %35 {offsets = [0, 0], sizes = [64, 240], strides = [1, 1]} : vector<96x240xbf16> to vector<64x240xbf16>
    %39 = tpu.concatenate %37, %38 in 0 : vector<64x240xbf16>, vector<64x240xbf16> -> vector<128x240xbf16>
    %40 = vector.extract_strided_slice %4 {offsets = [0, 0, 0], sizes = [1, 240, 400], strides = [1, 1, 1]} : vector<5x240x400xbf16> to vector<1x240x400xbf16>
    %41 = vector.shape_cast %40 : vector<1x240x400xbf16> to vector<240x400xbf16>
    %cst_24 = arith.constant dense<0.000000e+00> : vector<128x400xf32>
    %42 = tpu.matmul %39, %41, %cst_24 {dimension_numbers = #tpu.dot_dimension_numbers<[1], [0], [0], [1], [0, 0, 1, 1], [], []>} : vector<128x240xbf16>, vector<240x400xbf16>, vector<128x400xf32> -> vector<128x400xf32>
    %43 = arith.addf %36, %42 : vector<128x400xf32>
    %44 = vector.extract_strided_slice %35 {offsets = [0, 0], sizes = [64, 240], strides = [1, 1]} : vector<96x240xbf16> to vector<64x240xbf16>
    %45 = vector.extract_strided_slice %22 {offsets = [16, 0], sizes = [64, 240], strides = [1, 1]} : vector<96x240xbf16> to vector<64x240xbf16>
    %46 = tpu.concatenate %44, %45 in 0 : vector<64x240xbf16>, vector<64x240xbf16> -> vector<128x240xbf16>
    %47 = vector.extract_strided_slice %4 {offsets = [1, 0, 0], sizes = [1, 240, 400], strides = [1, 1, 1]} : vector<5x240x400xbf16> to vector<1x240x400xbf16>
    %48 = vector.shape_cast %47 : vector<1x240x400xbf16> to vector<240x400xbf16>
    %cst_25 = arith.constant dense<0.000000e+00> : vector<128x400xf32>
    %49 = tpu.matmul %46, %48, %cst_25 {dimension_numbers = #tpu.dot_dimension_numbers<[1], [0], [0], [1], [0, 0, 1, 1], [], []>} : vector<128x240xbf16>, vector<240x400xbf16>, vector<128x400xf32> -> vector<128x400xf32>
    %50 = arith.addf %43, %49 : vector<128x400xf32>
    %51 = vector.extract_strided_slice %22 {offsets = [16, 0], sizes = [64, 240], strides = [1, 1]} : vector<96x240xbf16> to vector<64x240xbf16>
    %52 = vector.extract_strided_slice %35 {offsets = [16, 0], sizes = [64, 240], strides = [1, 1]} : vector<96x240xbf16> to vector<64x240xbf16>
    %53 = tpu.concatenate %51, %52 in 0 : vector<64x240xbf16>, vector<64x240xbf16> -> vector<128x240xbf16>
    %54 = vector.extract_strided_slice %4 {offsets = [2, 0, 0], sizes = [1, 240, 400], strides = [1, 1, 1]} : vector<5x240x400xbf16> to vector<1x240x400xbf16>
    %55 = vector.shape_cast %54 : vector<1x240x400xbf16> to vector<240x400xbf16>
    %cst_26 = arith.constant dense<0.000000e+00> : vector<128x400xf32>
    %56 = tpu.matmul %53, %55, %cst_26 {dimension_numbers = #tpu.dot_dimension_numbers<[1], [0], [0], [1], [0, 0, 1, 1], [], []>} : vector<128x240xbf16>, vector<240x400xbf16>, vector<128x400xf32> -> vector<128x400xf32>
    %57 = arith.addf %50, %56 : vector<128x400xf32>
    %58 = vector.extract_strided_slice %35 {offsets = [16, 0], sizes = [64, 240], strides = [1, 1]} : vector<96x240xbf16> to vector<64x240xbf16>
    %59 = vector.extract_strided_slice %22 {offsets = [32, 0], sizes = [64, 240], strides = [1, 1]} : vector<96x240xbf16> to vector<64x240xbf16>
    %60 = tpu.concatenate %58, %59 in 0 : vector<64x240xbf16>, vector<64x240xbf16> -> vector<128x240xbf16>
    %61 = vector.extract_strided_slice %4 {offsets = [3, 0, 0], sizes = [1, 240, 400], strides = [1, 1, 1]} : vector<5x240x400xbf16> to vector<1x240x400xbf16>
    %62 = vector.shape_cast %61 : vector<1x240x400xbf16> to vector<240x400xbf16>
    %cst_27 = arith.constant dense<0.000000e+00> : vector<128x400xf32>
    %63 = tpu.matmul %60, %62, %cst_27 {dimension_numbers = #tpu.dot_dimension_numbers<[1], [0], [0], [1], [0, 0, 1, 1], [], []>} : vector<128x240xbf16>, vector<240x400xbf16>, vector<128x400xf32> -> vector<128x400xf32>
    %64 = arith.addf %57, %63 : vector<128x400xf32>
    %65 = vector.extract_strided_slice %22 {offsets = [32, 0], sizes = [64, 240], strides = [1, 1]} : vector<96x240xbf16> to vector<64x240xbf16>
    %66 = vector.extract_strided_slice %35 {offsets = [32, 0], sizes = [64, 240], strides = [1, 1]} : vector<96x240xbf16> to vector<64x240xbf16>
    %67 = tpu.concatenate %65, %66 in 0 : vector<64x240xbf16>, vector<64x240xbf16> -> vector<128x240xbf16>
    %68 = vector.extract_strided_slice %4 {offsets = [4, 0, 0], sizes = [1, 240, 400], strides = [1, 1, 1]} : vector<5x240x400xbf16> to vector<1x240x400xbf16>
    %69 = vector.shape_cast %68 : vector<1x240x400xbf16> to vector<240x400xbf16>
    %cst_28 = arith.constant dense<0.000000e+00> : vector<128x400xf32>
    %70 = tpu.matmul %67, %69, %cst_28 {dimension_numbers = #tpu.dot_dimension_numbers<[1], [0], [0], [1], [0, 0, 1, 1], [], []>} : vector<128x240xbf16>, vector<240x400xbf16>, vector<128x400xf32> -> vector<128x400xf32>
    %71 = arith.addf %64, %70 : vector<128x400xf32>
    %72 = vector.extract_strided_slice %71 {offsets = [0, 0], sizes = [64, 400], strides = [1, 1]} : vector<128x400xf32> to vector<64x400xf32>
    %73 = vector.extract_strided_slice %71 {offsets = [64, 0], sizes = [64, 400], strides = [1, 1]} : vector<128x400xf32> to vector<64x400xf32>
    %74 = arith.maximumf %72, %73 : vector<64x400xf32>
    %75 = vector.broadcast %5 : vector<1x400xf32> to vector<64x400xf32>
    %76 = arith.addf %74, %75 : vector<64x400xf32>
    %cst_29 = arith.constant 0.000000e+00 : f32
    %77 = vector.broadcast %cst_29 : f32 to vector<64x400xf32>
    %78 = arith.maximumf %76, %77 : vector<64x400xf32>
    %79 = vector.extract_strided_slice %78 {offsets = [0, 0], sizes = [64, 200], strides = [1, 1]} : vector<64x400xf32> to vector<64x200xf32>
    %80 = vector.extract_strided_slice %78 {offsets = [0, 200], sizes = [64, 200], strides = [1, 1]} : vector<64x400xf32> to vector<64x200xf32>
    %81 = arith.maximumf %79, %80 : vector<64x200xf32>
    %82 = arith.truncf %81 : vector<64x200xf32> to vector<64x200xbf16>
    %cst_30 = arith.constant 0.000000e+00 : f32
    %83 = vector.broadcast %cst_30 : f32 to vector<16x500xf32>
    %84 = vector.extract_strided_slice %82 {offsets = [0, 0], sizes = [16, 200], strides = [1, 1]} : vector<64x200xbf16> to vector<16x200xbf16>
    %85 = vector.extract_strided_slice %6 {offsets = [0, 0, 0], sizes = [1, 200, 500], strides = [1, 1, 1]} : vector<4x200x500xbf16> to vector<1x200x500xbf16>
    %86 = vector.shape_cast %85 : vector<1x200x500xbf16> to vector<200x500xbf16>
    %cst_31 = arith.constant dense<0.000000e+00> : vector<16x500xf32>
    %87 = tpu.matmul %84, %86, %cst_31 {dimension_numbers = #tpu.dot_dimension_numbers<[1], [0], [0], [1], [0, 0, 1, 1], [], []>} : vector<16x200xbf16>, vector<200x500xbf16>, vector<16x500xf32> -> vector<16x500xf32>
    %88 = arith.addf %83, %87 : vector<16x500xf32>
    %89 = vector.extract_strided_slice %82 {offsets = [16, 0], sizes = [16, 200], strides = [1, 1]} : vector<64x200xbf16> to vector<16x200xbf16>
    %90 = vector.extract_strided_slice %6 {offsets = [1, 0, 0], sizes = [1, 200, 500], strides = [1, 1, 1]} : vector<4x200x500xbf16> to vector<1x200x500xbf16>
    %91 = vector.shape_cast %90 : vector<1x200x500xbf16> to vector<200x500xbf16>
    %cst_32 = arith.constant dense<0.000000e+00> : vector<16x500xf32>
    %92 = tpu.matmul %89, %91, %cst_32 {dimension_numbers = #tpu.dot_dimension_numbers<[1], [0], [0], [1], [0, 0, 1, 1], [], []>} : vector<16x200xbf16>, vector<200x500xbf16>, vector<16x500xf32> -> vector<16x500xf32>
    %93 = arith.addf %88, %92 : vector<16x500xf32>
    %94 = vector.extract_strided_slice %82 {offsets = [32, 0], sizes = [16, 200], strides = [1, 1]} : vector<64x200xbf16> to vector<16x200xbf16>
    %95 = vector.extract_strided_slice %6 {offsets = [2, 0, 0], sizes = [1, 200, 500], strides = [1, 1, 1]} : vector<4x200x500xbf16> to vector<1x200x500xbf16>
    %96 = vector.shape_cast %95 : vector<1x200x500xbf16> to vector<200x500xbf16>
    %cst_33 = arith.constant dense<0.000000e+00> : vector<16x500xf32>
    %97 = tpu.matmul %94, %96, %cst_33 {dimension_numbers = #tpu.dot_dimension_numbers<[1], [0], [0], [1], [0, 0, 1, 1], [], []>} : vector<16x200xbf16>, vector<200x500xbf16>, vector<16x500xf32> -> vector<16x500xf32>
    %98 = arith.addf %93, %97 : vector<16x500xf32>
    %99 = vector.extract_strided_slice %82 {offsets = [48, 0], sizes = [16, 200], strides = [1, 1]} : vector<64x200xbf16> to vector<16x200xbf16>
    %100 = vector.extract_strided_slice %6 {offsets = [3, 0, 0], sizes = [1, 200, 500], strides = [1, 1, 1]} : vector<4x200x500xbf16> to vector<1x200x500xbf16>
    %101 = vector.shape_cast %100 : vector<1x200x500xbf16> to vector<200x500xbf16>
    %cst_34 = arith.constant dense<0.000000e+00> : vector<16x500xf32>
    %102 = tpu.matmul %99, %101, %cst_34 {dimension_numbers = #tpu.dot_dimension_numbers<[1], [0], [0], [1], [0, 0, 1, 1], [], []>} : vector<16x200xbf16>, vector<200x500xbf16>, vector<16x500xf32> -> vector<16x500xf32>
    %103 = arith.addf %98, %102 : vector<16x500xf32>
    %104 = vector.broadcast %7 : vector<1x500xf32> to vector<16x500xf32>
    %105 = arith.addf %103, %104 : vector<16x500xf32>
    %cst_35 = arith.constant 0.000000e+00 : f32
    %106 = vector.broadcast %cst_35 : f32 to vector<16x500xf32>
    %107 = arith.maximumf %105, %106 : vector<16x500xf32>
    %cst_36 = arith.constant dense<0.000000e+00> : vector<16x10xf32>
    %108 = tpu.matmul %107, %8, %cst_36 {dimension_numbers = #tpu.dot_dimension_numbers<[1], [0], [0], [1], [0, 0, 1, 1], [], []>} : vector<16x500xf32>, vector<500x10xf32>, vector<16x10xf32> -> vector<16x10xf32>
    %109 = vector.broadcast %9 : vector<1x10xf32> to vector<16x10xf32>
    %110 = arith.addf %108, %109 : vector<16x10xf32>
    %cst_37 = arith.constant dense<0xFF800000> : vector<16xf32>
    %111 = vector.multi_reduction <maximumf>, %110, %cst_37 [1] : vector<16x10xf32> to vector<16xf32>
    %112 = vector.shape_cast %111 : vector<16xf32> to vector<16x1xf32>
    %113 = vector.broadcast %112 : vector<16x1xf32> to vector<16x10xf32>
    %114 = arith.subf %110, %113 : vector<16x10xf32>
    %115 = math.exp %114 : vector<16x10xf32>
    %cst_38 = arith.constant dense<0.000000e+00> : vector<16xf32>
    %116 = vector.multi_reduction <add>, %115, %cst_38 [1] : vector<16x10xf32> to vector<16xf32>
    %117 = vector.shape_cast %116 : vector<16xf32> to vector<16x1xf32>
    %118 = math.log %117 : vector<16x1xf32>
    %119 = vector.broadcast %112 : vector<16x1xf32> to vector<16x10xf32>
    %120 = arith.subf %110, %119 : vector<16x10xf32>
    %121 = vector.broadcast %118 : vector<16x1xf32> to vector<16x10xf32>
    %122 = arith.subf %120, %121 : vector<16x10xf32>
    %c0_39 = arith.constant 0 : index
    %c0_40 = arith.constant 0 : index
    %123 = vector.load %arg10[%c0_39, %c0_40] : memref<16x10xf32, #tpu.memory_space<vmem>>, vector<16x10xf32>
    tpu.vector_store %arg10[%c0_39, %c0_40], %122 {strides = array<i32>} : memref<16x10xf32, #tpu.memory_space<vmem>>, vector<16x10xf32>,
    return
  }
  func.func @transform_0(%arg0: i32) -> (i32, i32, i32) {
    %c0_i32 = arith.constant 0 : i32
    %c0_i32_0 = arith.constant 0 : i32
    %c0_i32_1 = arith.constant 0 : i32
    return %c0_i32, %arg0, %c0_i32_0 : i32, i32, i32
  }
  func.func @transform_1(%arg0: i32) -> (i32, i32) {
    %c0_i32 = arith.constant 0 : i32
    %c0_i32_0 = arith.constant 0 : i32
    %c0_i32_1 = arith.constant 0 : i32
    return %c0_i32, %c0_i32_0 : i32, i32
  }
  func.func @transform_2(%arg0: i32) -> (i32, i32) {
    %c0_i32 = arith.constant 0 : i32
    %c0_i32_0 = arith.constant 0 : i32
    %c0_i32_1 = arith.constant 0 : i32
    return %c0_i32, %c0_i32_0 : i32, i32
  }
  func.func @transform_3(%arg0: i32) -> (i32, i32, i32) {
    %c0_i32 = arith.constant 0 : i32
    %c0_i32_0 = arith.constant 0 : i32
    %c0_i32_1 = arith.constant 0 : i32
    %c0_i32_2 = arith.constant 0 : i32
    return %c0_i32, %c0_i32_0, %c0_i32_1 : i32, i32, i32
  }
  func.func @transform_4(%arg0: i32) -> (i32, i32) {
    %c0_i32 = arith.constant 0 : i32
    %c0_i32_0 = arith.constant 0 : i32
    %c0_i32_1 = arith.constant 0 : i32
    return %c0_i32, %c0_i32_0 : i32, i32
  }
  func.func @transform_5(%arg0: i32) -> (i32, i32, i32) {
    %c0_i32 = arith.constant 0 : i32
    %c0_i32_0 = arith.constant 0 : i32
    %c0_i32_1 = arith.constant 0 : i32
    %c0_i32_2 = arith.constant 0 : i32
    return %c0_i32, %c0_i32_0, %c0_i32_1 : i32, i32, i32
  }
  func.func @transform_6(%arg0: i32) -> (i32, i32) {
    %c0_i32 = arith.constant 0 : i32
    %c0_i32_0 = arith.constant 0 : i32
    %c0_i32_1 = arith.constant 0 : i32
    return %c0_i32, %c0_i32_0 : i32, i32
  }
  func.func @transform_7(%arg0: i32) -> (i32, i32) {
    %c0_i32 = arith.constant 0 : i32
    %c0_i32_0 = arith.constant 0 : i32
    %c0_i32_1 = arith.constant 0 : i32
    return %c0_i32, %c0_i32_0 : i32, i32
  }
  func.func @transform_8(%arg0: i32) -> (i32, i32) {
    %c0_i32 = arith.constant 0 : i32
    %c0_i32_0 = arith.constant 0 : i32
    %c0_i32_1 = arith.constant 0 : i32
    return %c0_i32, %c0_i32_0 : i32, i32
  }
  func.func @transform_9(%arg0: i32) -> (i32, i32) {
    %c0_i32 = arith.constant 0 : i32
    %c0_i32_0 = arith.constant 0 : i32
    return %arg0, %c0_i32 : i32, i32
  }
}

</mosaic_0001>

<bundles_post_ra>
// kernel: net_forward.1
= control target key start
LH: loop header
LB: loop body
LE: loop exit
PB: predicated region body
PF: predicated region fallthrough
CT: control target
= control target key end

     0   :  { %vm989_vm0 = vcmask 97280   ;;  %vm1026_vm1 = vcmask 1045504   ;;  %vm1597_vm2 = vcmask 130048   ;;  %vm2768_vm3 = vcmask 916480   ;;  %s9501_s28 = smov 56   ;;  %s13647_s1 = inlined_call_operand.vmem [shape: bf16[140,480], index: 1, kind: input, shape index: {}]   ;;  %s13648_s0 = inlined_call_operand.vmem [shape: bf16[24,16,140], index: 0, kind: input, shape index: {}]   ;;  %s13649_s2 = inlined_call_operand.vmem [shape: f32[1,480], index: 2, kind: input, shape index: {}]   ;;  %s13650_s3 = inlined_call_operand.vmem [shape: bf16[5,240,400], index: 3, kind: input, shape index: {}]   ;;  %s13651_s5 = inlined_call_operand.vmem [shape: bf16[4,200,500], index: 5, kind: input, shape index: {}]   ;;  %s13652_s4 = inlined_call_operand.vmem [shape: f32[1,400], index: 4, kind: input, shape index: {}]   ;;  %s13653_s7 = inlined_call_operand.vmem [shape: f32[500,10], index: 7, kind: input, shape index: {}]   ;;  %s13654_s6 = inlined_call_operand.vmem [shape: f32[1,500], index: 6, kind: input, shape index: {}]   ;;  %s13655_s8 = inlined_call_operand.vmem [shape: f32[1,10], index: 8, kind: input, shape index: {}]   ;;  %s13656_s9 = inlined_call_operand.vmem [shape: f32[16,10], index: 9, kind: output, shape index: {}]  }
   0x1   :  { %v9557_v0 = vld [vmem:[%s13647_s1 + $0x4] ss:$16 sps:$4 sm:$0xff]   ;;  %v9562_v1 = vld [vmem:[%s13647_s1 + $0xc] ss:$16 sps:$4 sm:$0xff]   ;;  %v9568_v2 = vld [vmem:[%s13647_s1] ss:$16 sps:$4 sm:$0xff]  }
   0x2   :  { %1039 = vmatprep.subr.bf16.mxu0 %v9557_v0  ;;  %v9573_v3 = vld [vmem:[%s13647_s1 + $0x8] ss:$16 sps:$4 sm:$0xff]   ;;  %1192 = vmatprep.subr.bf16.mxu1 %v9562_v1  ;;  %v9579_v4 = vld [vmem:[%s13647_s1 + $0x24] ss:$16 sps:$4 sm:$0xff]   ;;  %v9586_v5 = vld [vmem:[%s13647_s1 + $0x2c] ss:$16 sps:$4 sm:$0xff]  }
   0x3   :  { %1040 = vmatpush1.bf16.msra.mxu0 %v9568_v2  ;;  %1193 = vmatpush1.bf16.msra.mxu1 %v9573_v3  ;;  %v9591_v6 = vld [vmem:[%s13647_s1 + $0x20] ss:$16 sps:$4 sm:$0xff]   ;;  %v9597_v7 = vld [vmem:[%s13647_s1 + $0x28] ss:$16 sps:$4 sm:$0xff]   ;;  %v9603_v8 = vld [vmem:[%s13647_s1 + $0x44] ss:$16 sps:$4 sm:$0xff]  }
   0x4   :  { %1041 = vmatprep.subr.bf16.mxu0 %v9579_v4  ;;  %1194 = vmatprep.subr.bf16.mxu1 %v9586_v5  ;;  %v9608_v9 = vld [vmem:[%s13647_s1 + $0x4c] ss:$16 sps:$4 sm:$0xff]   ;;  %v9613_v10 = vld [vmem:[%s13647_s1 + $0x40] ss:$16 sps:$4 sm:$0xff]   ;;  %v9618_v11 = vld [vmem:[%s13647_s1 + $0x48] ss:$16 sps:$4 sm:$0xff]  }
   0x5   :  { %v9625_v12 = vld [vmem:[%s13647_s1 + $0x64] ss:$16 sps:$4 sm:$0xff]   ;;  %v9632_v13 = vld [vmem:[%s13647_s1 + $0x6c] ss:$16 sps:$4 sm:$0xff]   ;;  %v9637_v14 = vld [vmem:[%s13647_s1 + $0x60] ss:$16 sps:$4 sm:$0xff]  }
   0x6   :  { %v9644_v15 = vld [vmem:[%s13647_s1 + $0x68] ss:$16 sps:$4 sm:$0xff]   ;;  %v9649_v16 = vld [vmem:[%s13647_s1 + $0x84] ss:$16 sps:$4 sm:$0xff]   ;;  %v9656_v17 = vld [vmem:[%s13647_s1 + $0x8c] ss:$16 sps:$4 sm:$0xff]  }
   0x7   :  { %1042 = vmatpush1.bf16.msra.mxu0 %v9591_v6  ;;  %1195 = vmatpush1.bf16.msra.mxu1 %v9597_v7  ;;  %v9661_v18 = vld [vmem:[%s13647_s1 + $0x80] ss:$16 sps:$4 sm:$0xff]   ;;  %v9666_v19 = vld [vmem:[%s13647_s1 + $0x88] ss:$16 sps:$4 sm:$0xff]   ;;  %v9673_v20 = vld [vmem:[%s13647_s1 + $0xa4] ss:$16 sps:$4 sm:$0xff]  }
   0x8   :  { %1043 = vmatprep.subr.bf16.mxu0 %v9603_v8  ;;  %1196 = vmatprep.subr.bf16.mxu1 %v9608_v9  ;;  %v9680_v21 = vld [vmem:[%s13647_s1 + $0xac] ss:$16 sps:$4 sm:$0xff]   ;;  %v9685_v22 = vld [vmem:[%s13647_s1 + $0xa0] ss:$16 sps:$4 sm:$0xff]   ;;  %v9692_v23 = vld [vmem:[%s13647_s1 + $0xa8] ss:$16 sps:$4 sm:$0xff]  }
   0x9   :  { %v9697_v24 = vld [vmem:[%s13647_s1 + $0xc4] ss:$16 sps:$4 sm:$0xff]   ;;  %v9704_v25 = vld [vmem:[%s13647_s1 + $0xcc] ss:$16 sps:$4 sm:$0xff]   ;;  %v9709_v26 = vld [vmem:[%s13647_s1 + $0xc0] ss:$16 sps:$4 sm:$0xff]  }
   0xa   :  { %v9714_v27 = vld [vmem:[%s13647_s1 + $0xc8] ss:$16 sps:$4 sm:$0xff]   ;;  %v9721_v28 = vld [vmem:[%s13647_s1 + $0xe4] ss:$16 sps:$4 sm:$0xff]   ;;  %v9728_v29 = vld [vmem:[%s13647_s1 + $0xec] ss:$16 sps:$4 sm:$0xff]  }
   0xb   :  { %1044 = vmatpush1.bf16.msra.mxu0 %v9613_v10  ;;  %1197 = vmatpush1.bf16.msra.mxu1 %v9618_v11  ;;  %v8668_v30 = vld [vmem:[%s13648_s0 + $0x4] ss:$8 sps:$4 sm:$0xff]   ;;  %v9736_v31 = vld [vmem:[%s13647_s1 + $0xe0] ss:$16 sps:$4 sm:$0xff]   ;;  %v9741_v32 = vld [vmem:[%s13647_s1 + $0xe8] ss:$16 sps:$4 sm:$0xff]  }
   0xc   :  { %1045 = vmatprep.subr.bf16.mxu0 %v9625_v12  ;;  %1198 = vmatprep.subr.bf16.mxu1 %v9632_v13  ;;  %v9746_v33 = vld [vmem:[%s13647_s1 + $0x104] ss:$16 sps:$4 sm:$0x3f]   ;;  %v9751_v34 = vld [vmem:[%s13647_s1 + $0x10c] ss:$16 sps:$4 sm:$0x3f]  }
   0xd   :  { %7290 = vmatprep.mubr.msk.bf16.mxu0 %vm989_vm0, %v8668_v30  ;;  %7303 = vmatprep.mubr.msk.bf16.mxu1 %vm989_vm0, %v8668_v30  ;;  %v8664_v35 = vld [vmem:[%s13647_s1 + $0x100] ss:$16 sps:$4 sm:$0x3f]   ;;  %v8665_v36 = vld [vmem:[%s13647_s1 + $0x108] ss:$16 sps:$4 sm:$0x3f]  }
   0xe   :  { %v9772_v37 = vsel %vm1026_vm1, %v8664_v35, 0  ;;  %v9775_v38 = vsel %vm1026_vm1, %v8665_v36, 0  ;;  %v8666_v39 = vld [vmem:[%s13648_s0] ss:$8 sps:$4 sm:$0xff]   ;;  %v8669_v40 = vld [vmem:[%s13648_s0 + $0x14] ss:$8 sps:$4 sm:$0xff]  }
   0xf   :  { %1046 = vmatpush1.bf16.msra.mxu0 %v9637_v14  ;;  %1199 = vmatpush1.bf16.msra.mxu1 %v9644_v15  ;;  %v8671_v41 = vld [vmem:[%s13648_s0 + $0x10] ss:$8 sps:$4 sm:$0xff]   ;;  %v8672_v42 = vld [vmem:[%s13648_s0 + $0x24] ss:$8 sps:$4 sm:$0xff]   ;;  %v8674_v43 = vld [vmem:[%s13648_s0 + $0x20] ss:$8 sps:$4 sm:$0xff]  }
  0x10   :  { %1047 = vmatprep.subr.bf16.mxu0 %v9649_v16  ;;  %1200 = vmatprep.subr.bf16.mxu1 %v9656_v17  ;;  %v8675_v44 = vld [vmem:[%s13648_s0 + $0x34] ss:$8 sps:$4 sm:$0xff]   ;;  %v8677_v45 = vld [vmem:[%s13648_s0 + $0x30] ss:$8 sps:$4 sm:$0xff]   ;;  %v8678_v46 = vld [vmem:[%s13648_s0 + $0x44] ss:$8 sps:$4 sm:$0xff]  }
  0x11   :  { %v8680_v47 = vld [vmem:[%s13648_s0 + $0x40] ss:$8 sps:$4 sm:$0xff]   ;;  %v8681_v48 = vld [vmem:[%s13648_s0 + $0x54] ss:$8 sps:$4 sm:$0xff]   ;;  %v8683_v49 = vld [vmem:[%s13648_s0 + $0x50] ss:$8 sps:$4 sm:$0xff]  }
  0x12   :  { %v8684_v50 = vld [vmem:[%s13648_s0 + $0x64] ss:$8 sps:$4 sm:$0xff]   ;;  %v8686_v51 = vld [vmem:[%s13648_s0 + $0x60] ss:$8 sps:$4 sm:$0xff]   ;;  %v8687_v52 = vld [vmem:[%s13648_s0 + $0x74] ss:$8 sps:$4 sm:$0xff]  }
  0x13   :  { %1048 = vmatpush1.bf16.msra.mxu0 %v9661_v18  ;;  %1201 = vmatpush1.bf16.msra.mxu1 %v9666_v19  ;;  %v8689_v53 = vld [vmem:[%s13648_s0 + $0x70] ss:$8 sps:$4 sm:$0xff]   ;;  %v8690_v54 = vld [vmem:[%s13648_s0 + $0x84] ss:$8 sps:$4 sm:$0xff]   ;;  %v8692_v55 = vld [vmem:[%s13648_s0 + $0x80] ss:$8 sps:$4 sm:$0xff]  }
  0x14   :  { %1049 = vmatprep.subr.bf16.mxu0 %v9673_v20  ;;  %1202 = vmatprep.subr.bf16.mxu1 %v9680_v21  ;;  %v8693_v56 = vld [vmem:[%s13648_s0 + $0x94] ss:$8 sps:$4 sm:$0xff]   ;;  %v8695_v57 = vld [vmem:[%s13648_s0 + $0x90] ss:$8 sps:$4 sm:$0xff]   ;;  %v8696_v58 = vld [vmem:[%s13648_s0 + $0xa4] ss:$8 sps:$4 sm:$0xff]  }
  0x15   :  { %v8698_v59 = vld [vmem:[%s13648_s0 + $0xa0] ss:$8 sps:$4 sm:$0xff]   ;;  %v8699_v60 = vld [vmem:[%s13648_s0 + $0xb4] ss:$8 sps:$4 sm:$0xff]   ;;  %v8701_v61 = vld [vmem:[%s13648_s0 + $0xb0] ss:$8 sps:$4 sm:$0xff]  }
  0x16   :  { %v8704_v62 = vld [vmem:[%s13648_s0 + $0xc4] ss:$8 sps:$4 sm:$0xff]   ;;  %v8702_v63 = vld [vmem:[%s13648_s0 + $0xc0] ss:$8 sps:$4 sm:$0xff]   ;;  %vm5827_vm4 = vcmask 1043456   ;;  %vm5516_vm5 = vcmask 457728  }
  0x17   :  { %1050 = vmatpush1.bf16.msra.mxu0 %v9685_v22  ;;  %1203 = vmatpush1.bf16.msra.mxu1 %v9692_v23  ;;  %vm5823_vm6 = vcmask 588800   ;;  %vm7038_vm7 = vcmask 949248   ;;  %vm7198_vm8 = vcmask 80896  }
  0x18   :  { %1051 = vmatprep.subr.bf16.mxu0 %v9697_v24  ;;  %1204 = vmatprep.subr.bf16.mxu1 %v9704_v25 }
  0x1b   :  { %1052 = vmatpush1.bf16.msra.mxu0 %v9709_v26  ;;  %1205 = vmatpush1.bf16.msra.mxu1 %v9714_v27 }
  0x1c   :  { %1053 = vmatprep.subr.bf16.mxu0 %v9721_v28  ;;  %1206 = vmatprep.subr.bf16.mxu1 %v9728_v29 }
  0x1f   :  { %1054 = vmatpush1.bf16.msra.mxu0 %v9736_v31  ;;  %1207 = vmatpush1.bf16.msra.mxu1 %v9741_v32 }
  0x20   :  { %7289 = vmatprep.subr.msk.bf16.mxu0 %vm1026_vm1, %v9746_v33  ;;  %7302 = vmatprep.subr.msk.bf16.mxu1 %vm1026_vm1, %v9751_v34 }
  0x23   :  { %1056 = vmatpush1.bf16.msra.mxu0 %v9772_v37  ;;  %1209 = vmatpush1.bf16.msra.mxu1 %v9775_v38 }
  0x24   :  { %1979 = vmatprep.subr.bf16.mxu1 %v9562_v1  ;;  %1826 = vmatprep.subr.bf16.mxu0 %v9557_v0  ;;  %v8705_v0 = vld [vmem:[%s13648_s0 + $0xd4] ss:$8 sps:$4 sm:$0xff]   ;;  %v8707_v1 = vld [vmem:[%s13648_s0 + $0xd0] ss:$8 sps:$4 sm:$0xff]  }
  0x26   :  { %1072 = vmatmul.mubr.bf16.vlgmr.msra.gmra.mrb[0].mxu0 %v8666_v39  ;;  %1225 = vmatmul.mubr.bf16.vlgmr.msra.gmra.mrb[0].mxu1 %v8666_v39 }
  0x27   :  { %1980 = vmatpush1.bf16.msra.mxu1 %v9573_v3  ;;  %1827 = vmatpush1.bf16.msra.mxu0 %v9568_v2  ;;  %v8708_v2 = vld [vmem:[%s13648_s0 + $0xe4] ss:$8 sps:$4 sm:$0xff]   ;;  %v8710_v3 = vld [vmem:[%s13648_s0 + $0xe0] ss:$8 sps:$4 sm:$0xff]  }
  0x28   :  { %7291 = vmatprep.mubr.msk.bf16.mxu0 %vm989_vm0, %v8669_v40  ;;  %7304 = vmatprep.mubr.msk.bf16.mxu1 %vm989_vm0, %v8669_v40 }
  0x29   :  { %1981 = vmatprep.subr.bf16.mxu1 %v9586_v5  ;;  %1828 = vmatprep.subr.bf16.mxu0 %v9579_v4  ;;  %v8711_v4 = vld [vmem:[%s13648_s0 + $0xf4] ss:$8 sps:$4 sm:$0xff]   ;;  %v8713_v5 = vld [vmem:[%s13648_s0 + $0xf0] ss:$8 sps:$4 sm:$0xff]  }
  0x2b   :  { %1982 = vmatpush1.bf16.msra.mxu1 %v9597_v7  ;;  %1829 = vmatpush1.bf16.msra.mxu0 %v9591_v6  ;;  %v8714_v6 = vld [vmem:[%s13648_s0 + $0x104] ss:$8 sps:$4 sm:$0xff]   ;;  %v8716_v7 = vld [vmem:[%s13648_s0 + $0x100] ss:$8 sps:$4 sm:$0xff]  }
  0x2c   :  { %1983 = vmatprep.subr.bf16.mxu1 %v9608_v9  ;;  %1830 = vmatprep.subr.bf16.mxu0 %v9603_v8  ;;  %v8717_v8 = vld [vmem:[%s13648_s0 + $0x114] ss:$8 sps:$4 sm:$0xff]   ;;  %v8719_v9 = vld [vmem:[%s13648_s0 + $0x110] ss:$8 sps:$4 sm:$0xff]  }
  0x2e   :  { %1082 = vmatmul.mubr.bf16.gmra.mrb[4].mxu0 %v8671_v41  ;;  %1235 = vmatmul.mubr.bf16.gmra.mrb[4].mxu1 %v8671_v41 }
  0x2f   :  { %7292 = vmatprep.mubr.msk.bf16.mxu0 %vm989_vm0, %v8672_v42  ;;  %7305 = vmatprep.mubr.msk.bf16.mxu1 %vm989_vm0, %v8672_v42 }
  0x30   :  { %1984 = vmatpush1.bf16.msra.mxu1 %v9618_v11  ;;  %1831 = vmatpush1.bf16.msra.mxu0 %v9613_v10  ;;  %v8720_v10 = vld [vmem:[%s13648_s0 + $0x124] ss:$8 sps:$4 sm:$0xff]   ;;  %v8722_v11 = vld [vmem:[%s13648_s0 + $0x120] ss:$8 sps:$4 sm:$0xff]  }
  0x31   :  { %1985 = vmatprep.subr.bf16.mxu1 %v9632_v13  ;;  %1832 = vmatprep.subr.bf16.mxu0 %v9625_v12  ;;  %v8723_v12 = vld [vmem:[%s13648_s0 + $0x134] ss:$8 sps:$4 sm:$0xff]   ;;  %v8725_v13 = vld [vmem:[%s13648_s0 + $0x130] ss:$8 sps:$4 sm:$0xff]  }
  0x34   :  { %1986 = vmatpush1.bf16.msra.mxu1 %v9644_v15  ;;  %1833 = vmatpush1.bf16.msra.mxu0 %v9637_v14  ;;  %v8726_v14 = vld [vmem:[%s13648_s0 + $0x144] ss:$8 sps:$4 sm:$0xff]   ;;  %v8728_v15 = vld [vmem:[%s13648_s0 + $0x140] ss:$8 sps:$4 sm:$0xff]  }
  0x35   :  { %1987 = vmatprep.subr.bf16.mxu1 %v9656_v17  ;;  %1834 = vmatprep.subr.bf16.mxu0 %v9649_v16  ;;  %v8729_v16 = vld [vmem:[%s13648_s0 + $0x154] ss:$8 sps:$4 sm:$0xff]   ;;  %v8731_v17 = vld [vmem:[%s13648_s0 + $0x150] ss:$8 sps:$4 sm:$0xff]  }
  0x36   :  { %1092 = vmatmul.mubr.bf16.gmra.mrb[8].mxu0 %v8674_v43  ;;  %1245 = vmatmul.mubr.bf16.gmra.mrb[8].mxu1 %v8674_v43 }
  0x37   :  { %7293 = vmatprep.mubr.msk.bf16.mxu0 %vm989_vm0, %v8675_v44  ;;  %7306 = vmatprep.mubr.msk.bf16.mxu1 %vm989_vm0, %v8675_v44 }
  0x38   :  { %1988 = vmatpush1.bf16.msra.mxu1 %v9666_v19  ;;  %1835 = vmatpush1.bf16.msra.mxu0 %v9661_v18  ;;  %v8732_v18 = vld [vmem:[%s13648_s0 + $0x164] ss:$8 sps:$4 sm:$0xff]   ;;  %v8734_v19 = vld [vmem:[%s13648_s0 + $0x160] ss:$8 sps:$4 sm:$0xff]  }
  0x39   :  { %1989 = vmatprep.subr.bf16.mxu1 %v9680_v21  ;;  %1836 = vmatprep.subr.bf16.mxu0 %v9673_v20  ;;  %v8735_v20 = vld [vmem:[%s13648_s0 + $0x174] ss:$8 sps:$4 sm:$0xff]   ;;  %v8737_v21 = vld [vmem:[%s13648_s0 + $0x170] ss:$8 sps:$4 sm:$0xff]  }
  0x3c   :  { %1990 = vmatpush1.bf16.msra.mxu1 %v9692_v23  ;;  %1837 = vmatpush1.bf16.msra.mxu0 %v9685_v22 }
  0x3d   :  { %1991 = vmatprep.subr.bf16.mxu1 %v9704_v25  ;;  %1838 = vmatprep.subr.bf16.mxu0 %v9697_v24 }
  0x3e   :  { %1102 = vmatmul.mubr.bf16.gmra.mrb[12].mxu0 %v8677_v45  ;;  %1255 = vmatmul.mubr.bf16.gmra.mrb[12].mxu1 %v8677_v45 }
  0x3f   :  { %7294 = vmatprep.mubr.msk.bf16.mxu0 %vm989_vm0, %v8678_v46  ;;  %7307 = vmatprep.mubr.msk.bf16.mxu1 %vm989_vm0, %v8678_v46 }
  0x40   :  { %1992 = vmatpush1.bf16.msra.mxu1 %v9714_v27  ;;  %1839 = vmatpush1.bf16.msra.mxu0 %v9709_v26 }
  0x41   :  { %1993 = vmatprep.subr.bf16.mxu1 %v9728_v29  ;;  %1840 = vmatprep.subr.bf16.mxu0 %v9721_v28 }
  0x44   :  { %1994 = vmatpush1.bf16.msra.mxu1 %v9741_v32  ;;  %1841 = vmatpush1.bf16.msra.mxu0 %v9736_v31 }
  0x45   :  { %7352 = vmatprep.subr.msk.bf16.mxu1 %vm1026_vm1, %v9751_v34  ;;  %7339 = vmatprep.subr.msk.bf16.mxu0 %vm1026_vm1, %v9746_v33 }
  0x46   :  { %1112 = vmatmul.mubr.bf16.gmra.mrb[16].mxu0 %v8680_v47  ;;  %1265 = vmatmul.mubr.bf16.gmra.mrb[16].mxu1 %v8680_v47 }
  0x47   :  { %7295 = vmatprep.mubr.msk.bf16.mxu0 %vm989_vm0, %v8681_v48  ;;  %7308 = vmatprep.mubr.msk.bf16.mxu1 %vm989_vm0, %v8681_v48 }
  0x48   :  { %1996 = vmatpush1.bf16.msra.mxu1 %v9775_v38  ;;  %1843 = vmatpush1.bf16.msra.mxu0 %v9772_v37  ;;  %v685_v38 = vlaneseq }
  0x4a   :  { %v686_v41 = vshrl.u32 %v685_v38, 7 }
  0x4c   :  { %v10016_v48 = vsub.s32 2, %v686_v41 }
  0x4e   :  { %1122 = vmatmul.mubr.bf16.gmra.mrb[20].mxu0 %v8683_v49  ;;  %1275 = vmatmul.mubr.bf16.gmra.mrb[20].mxu1 %v8683_v49  ;;  %13713 = vst [vmem:[#allocation2_spill] sm:$0xff] %v10016_v48  ;;  %v10018_v49 = vsub.s32 0, %v686_v41 }
  0x4f   :  { %7296 = vmatprep.mubr.msk.bf16.mxu0 %vm989_vm0, %v8684_v50  ;;  %7309 = vmatprep.mubr.msk.bf16.mxu1 %vm989_vm0, %v8684_v50  ;;  %v117_v50 = vld [vmem:[%s13649_s2] sm:$0xf]  ;;  %s9500_s2 = smov 16  }
  0x50   :  { %13714 = vst [vmem:[#allocation3_spill] sm:$0xff] %v10018_v49 }
  0x56   :  { %1132 = vmatmul.mubr.bf16.gmra.mrb[24].mxu0 %v8686_v51  ;;  %1285 = vmatmul.mubr.bf16.gmra.mrb[24].mxu1 %v8686_v51  ;;  %v10023_v51 = vsub.s32 3, %v686_v41 }
  0x57   :  { %7297 = vmatprep.mubr.msk.bf16.mxu0 %vm989_vm0, %v8687_v52  ;;  %7310 = vmatprep.mubr.msk.bf16.mxu1 %vm989_vm0, %v8687_v52  ;;  %v10025_v52 = vsub.s32 1, %v686_v41 }
  0x58   :  { %13715 = vst [vmem:[#allocation4_spill] sm:$0xff] %v10023_v51 }
  0x59   :  { %13716 = vst [vmem:[#allocation5_spill] sm:$0xff] %v10025_v52 }
  0x5e   :  { %1142 = vmatmul.mubr.bf16.gmra.mrb[28].mxu0 %v8689_v53  ;;  %1295 = vmatmul.mubr.bf16.gmra.mrb[28].mxu1 %v8689_v53 }
  0x5f   :  { %7298 = vmatprep.mubr.msk.bf16.mxu0 %vm989_vm0, %v8690_v54  ;;  %7311 = vmatprep.mubr.msk.bf16.mxu1 %vm989_vm0, %v8690_v54 }
  0x66   :  { %1152 = vmatmul.mubr.bf16.gmra.mrb[32].mxu0 %v8692_v55  ;;  %1305 = vmatmul.mubr.bf16.gmra.mrb[32].mxu1 %v8692_v55  ;;  %v10032_v55 = vrot.slane %v117_v50, %v10016_v48 }
  0x67   :  { %7299 = vmatprep.mubr.msk.bf16.mxu0 %vm989_vm0, %v8693_v56  ;;  %7312 = vmatprep.mubr.msk.bf16.mxu1 %vm989_vm0, %v8693_v56  ;;  %v10035_v56 = vrot.slane %v117_v50, %v10018_v49 }
  0x6e   :  { %1162 = vmatmul.mubr.bf16.gmra.mrb[36].mxu0 %v8695_v57  ;;  %1315 = vmatmul.mubr.bf16.gmra.mrb[36].mxu1 %v8695_v57 }
  0x6f   :  { %7300 = vmatprep.mubr.msk.bf16.mxu0 %vm989_vm0, %v8696_v58  ;;  %7313 = vmatprep.mubr.msk.bf16.mxu1 %vm989_vm0, %v8696_v58 }
  0x76   :  { %1172 = vmatmul.mubr.bf16.gmra.mrb[40].mxu0 %v8698_v59  ;;  %1325 = vmatmul.mubr.bf16.gmra.mrb[40].mxu1 %v8698_v59 }
  0x77   :  { %7301 = vmatprep.mubr.msk.bf16.mxu0 %vm989_vm0, %v8699_v60  ;;  %7314 = vmatprep.mubr.msk.bf16.mxu1 %vm989_vm0, %v8699_v60 }
  0x7e   :  { %1182 = vmatmul.mubr.bf16.gmra.mrb[44].mxu0 %v8701_v61  ;;  %1335 = vmatmul.mubr.bf16.gmra.mrb[44].mxu1 %v8701_v61 }
  0x7f   :  { %7340 = vmatprep.mubr.msk.bf16.mxu0 %vm989_vm0, %v8704_v62  ;;  %7353 = vmatprep.mubr.msk.bf16.mxu1 %vm989_vm0, %v8704_v62 }
  0x86   :  { %1859 = vmatmul.mubr.bf16.vlgmr.msra.gmra.mrb[48].mxu0 %v8702_v63  ;;  %2012 = vmatmul.mubr.bf16.vlgmr.msra.gmra.mrb[48].mxu1 %v8702_v63  ;;  %v10050_v63 = vrot.slane %v117_v50, %v10023_v51 }
  0x87   :  { %7341 = vmatprep.mubr.msk.bf16.mxu0 %vm989_vm0, %v8705_v0  ;;  %7354 = vmatprep.mubr.msk.bf16.mxu1 %vm989_vm0, %v8705_v0  ;;  %v10053_v0 = vrot.slane %v117_v50, %v10025_v52 }
  0x8e   :  { %1869 = vmatmul.mubr.bf16.gmra.mrb[52].mxu0 %v8707_v1  ;;  %2022 = vmatmul.mubr.bf16.gmra.mrb[52].mxu1 %v8707_v1 }
  0x8f   :  { %7342 = vmatprep.mubr.msk.bf16.mxu0 %vm989_vm0, %v8708_v2  ;;  %7355 = vmatprep.mubr.msk.bf16.mxu1 %vm989_vm0, %v8708_v2 }
  0x96   :  { %1879 = vmatmul.mubr.bf16.gmra.mrb[56].mxu0 %v8710_v3  ;;  %2032 = vmatmul.mubr.bf16.gmra.mrb[56].mxu1 %v8710_v3 }
  0x97   :  { %7343 = vmatprep.mubr.msk.bf16.mxu0 %vm989_vm0, %v8711_v4  ;;  %7356 = vmatprep.mubr.msk.bf16.mxu1 %vm989_vm0, %v8711_v4 }
  0x9e   :  { %1889 = vmatmul.mubr.bf16.gmra.mrb[60].mxu0 %v8713_v5  ;;  %2042 = vmatmul.mubr.bf16.gmra.mrb[60].mxu1 %v8713_v5 }
  0x9f   :  { %7344 = vmatprep.mubr.msk.bf16.mxu0 %vm989_vm0, %v8714_v6  ;;  %7357 = vmatprep.mubr.msk.bf16.mxu1 %vm989_vm0, %v8714_v6 }
  0xa6   :  { %1899 = vmatmul.mubr.bf16.gmra.mrb[64].mxu0 %v8716_v7  ;;  %2052 = vmatmul.mubr.bf16.gmra.mrb[64].mxu1 %v8716_v7 }
  0xa7   :  { %7345 = vmatprep.mubr.msk.bf16.mxu0 %vm989_vm0, %v8717_v8  ;;  %7358 = vmatprep.mubr.msk.bf16.mxu1 %vm989_vm0, %v8717_v8 }
  0xae   :  { %1909 = vmatmul.mubr.bf16.gmra.mrb[68].mxu0 %v8719_v9  ;;  %2062 = vmatmul.mubr.bf16.gmra.mrb[68].mxu1 %v8719_v9 }
  0xaf   :  { %7346 = vmatprep.mubr.msk.bf16.mxu0 %vm989_vm0, %v8720_v10  ;;  %7359 = vmatprep.mubr.msk.bf16.mxu1 %vm989_vm0, %v8720_v10 }
  0xb6   :  { %1919 = vmatmul.mubr.bf16.gmra.mrb[72].mxu0 %v8722_v11  ;;  %2072 = vmatmul.mubr.bf16.gmra.mrb[72].mxu1 %v8722_v11 }
  0xb7   :  { %7347 = vmatprep.mubr.msk.bf16.mxu0 %vm989_vm0, %v8723_v12  ;;  %7360 = vmatprep.mubr.msk.bf16.mxu1 %vm989_vm0, %v8723_v12 }
  0xbe   :  { %1929 = vmatmul.mubr.bf16.gmra.mrb[76].mxu0 %v8725_v13  ;;  %2082 = vmatmul.mubr.bf16.gmra.mrb[76].mxu1 %v8725_v13 }
  0xbf   :  { %7348 = vmatprep.mubr.msk.bf16.mxu0 %vm989_vm0, %v8726_v14  ;;  %7361 = vmatprep.mubr.msk.bf16.mxu1 %vm989_vm0, %v8726_v14 }
  0xc6   :  { %1939 = vmatmul.mubr.bf16.gmra.mrb[80].mxu0 %v8728_v15  ;;  %2092 = vmatmul.mubr.bf16.gmra.mrb[80].mxu1 %v8728_v15 }
  0xc7   :  { %7349 = vmatprep.mubr.msk.bf16.mxu0 %vm989_vm0, %v8729_v16  ;;  %7362 = vmatprep.mubr.msk.bf16.mxu1 %vm989_vm0, %v8729_v16 }
  0xce   :  { %1949 = vmatmul.mubr.bf16.gmra.mrb[84].mxu0 %v8731_v17  ;;  %2102 = vmatmul.mubr.bf16.gmra.mrb[84].mxu1 %v8731_v17 }
  0xcf   :  { %7350 = vmatprep.mubr.msk.bf16.mxu0 %vm989_vm0, %v8732_v18  ;;  %7363 = vmatprep.mubr.msk.bf16.mxu1 %vm989_vm0, %v8732_v18 }
  0xd6   :  { %1959 = vmatmul.mubr.bf16.gmra.mrb[88].mxu0 %v8734_v19  ;;  %2112 = vmatmul.mubr.bf16.gmra.mrb[88].mxu1 %v8734_v19 }
  0xd7   :  { %7351 = vmatprep.mubr.msk.bf16.mxu0 %vm989_vm0, %v8735_v20  ;;  %7364 = vmatprep.mubr.msk.bf16.mxu1 %vm989_vm0, %v8735_v20 }
  0xde   :  { %1969 = vmatmul.mubr.bf16.gmra.mrb[92].mxu0 %v8737_v21  ;;  %2122 = vmatmul.mubr.bf16.gmra.mrb[92].mxu1 %v8737_v21 }
  0xf9   :  { %v1226_v22 = vpop.f32.mrb[0].mxu1  ;;  %v1073_v23 = vpop.f32.mrb[0].mxu0 }
  0xfa   :  { %v1228_v24 = vpop.f32.mrb[1].mxu1  ;;  %v1075_v25 = vpop.f32.mrb[1].mxu0  ;;  %v10056_v1 = vadd.f32 %v1226_v22, %v10032_v55  ;;  %v10059_v2 = vadd.f32 %v1073_v23, %v10035_v56 }
  0xfb   :  { %v1230_v26 = vpop.f32.mrb[2].mxu1  ;;  %v1077_v27 = vpop.f32.mrb[2].mxu0  ;;  %v10062_v3 = vadd.f32 %v1228_v24, %v10050_v63  ;;  %v10065_v4 = vadd.f32 %v1075_v25, %v10053_v0 }
  0xfc   :  { %v1232_v28 = vpop.f32.mrb[3].mxu1  ;;  %v1079_v29 = vpop.f32.mrb[3].mxu0  ;;  %v10074_v9 = vadd.f32 %v1230_v26, %v10032_v55  ;;  %v10077_v10 = vadd.f32 %v1077_v27, %v10035_v56 }
  0xfd   :  { %v10084_v13 = vadd.f32 %v1232_v28, %v10050_v63  ;;  %v10087_v14 = vadd.f32 %v1079_v29, %v10053_v0 }
 0x101   :  { %v1236_v30 = vpop.f32.mrb[4].mxu1  ;;  %v1083_v31 = vpop.f32.mrb[4].mxu0 }
 0x102   :  { %v1238_v32 = vpop.f32.mrb[5].mxu1  ;;  %v1085_v33 = vpop.f32.mrb[5].mxu0  ;;  %v10090_v15 = vadd.f32 %v1236_v30, %v10032_v55  ;;  %v10093_v16 = vadd.f32 %v1083_v31, %v10035_v56 }
 0x103   :  { %v1240_v34 = vpop.f32.mrb[6].mxu1  ;;  %v1087_v35 = vpop.f32.mrb[6].mxu0  ;;  %v10100_v19 = vadd.f32 %v1238_v32, %v10050_v63  ;;  %v10103_v20 = vadd.f32 %v1085_v33, %v10053_v0 }
 0x104   :  { %v1242_v36 = vpop.f32.mrb[7].mxu1  ;;  %v1089_v37 = vpop.f32.mrb[7].mxu0  ;;  %v10106_v21 = vadd.f32 %v1240_v34, %v10032_v55  ;;  %v10109_v22 = vadd.f32 %v1087_v35, %v10035_v56 }
 0x105   :  { %v10118_v27 = vadd.f32 %v1242_v36, %v10050_v63  ;;  %v10121_v28 = vadd.f32 %v1089_v37, %v10053_v0 }
 0x109   :  { %v1246_v39 = vpop.f32.mrb[8].mxu1  ;;  %v1093_v40 = vpop.f32.mrb[8].mxu0 }
 0x10a   :  { %v10004_v42 = vpop.f32.mrb[9].mxu1  ;;  %v10006_v43 = vpop.f32.mrb[9].mxu0  ;;  %v10126_v31 = vadd.f32 %v1246_v39, %v10032_v55  ;;  %v10129_v32 = vadd.f32 %v1093_v40, %v10035_v56 }
 0x10b   :  { %v10008_v44 = vpop.f32.mrb[10].mxu1  ;;  %v10010_v45 = vpop.f32.mrb[10].mxu0  ;;  %v10143_v33 = vadd.f32 %v10004_v42, %v10050_v63  ;;  %v10147_v35 = vadd.f32 %v10006_v43, %v10053_v0 }
 0x10c   :  { %v10012_v46 = vpop.f32.mrb[11].mxu1  ;;  %v10014_v47 = vpop.f32.mrb[11].mxu0  ;;  %v10157_v50 = vadd.f32 %v10008_v44, %v10032_v55  ;;  %v10161_v42 = vadd.f32 %v10010_v45, %v10035_v56 }
 0x10d   :  { %v10169_v38 = vadd.f32 %v10012_v46, %v10050_v63  ;;  %v10173_v41 = vadd.f32 %v10014_v47, %v10053_v0 }
 0x111   :  { %v10027_v53 = vpop.f32.mrb[12].mxu1  ;;  %v10029_v54 = vpop.f32.mrb[12].mxu0 }
 0x112   :  { %v10037_v57 = vpop.f32.mrb[13].mxu1  ;;  %v10039_v58 = vpop.f32.mrb[13].mxu0  ;;  %v10177_v44 = vadd.f32 %v10027_v53, %v10032_v55  ;;  %v10181_v45 = vadd.f32 %v10029_v54, %v10035_v56 }
 0x113   :  { %v10041_v59 = vpop.f32.mrb[14].mxu1  ;;  %v10043_v60 = vpop.f32.mrb[14].mxu0  ;;  %v10189_v46 = vadd.f32 %v10037_v57, %v10050_v63  ;;  %v10193_v47 = vadd.f32 %v10039_v58, %v10053_v0 }
 0x114   :  { %v10045_v61 = vpop.f32.mrb[15].mxu1  ;;  %v10047_v62 = vpop.f32.mrb[15].mxu0  ;;  %v10197_v53 = vadd.f32 %v10041_v59, %v10032_v55  ;;  %v10201_v54 = vadd.f32 %v10043_v60, %v10035_v56 }
 0x115   :  { %v10211_v58 = vadd.f32 %v10045_v61, %v10050_v63  ;;  %v10215_v59 = vadd.f32 %v10047_v62, %v10053_v0 }
 0x116   :  { %13717 = vst [vmem:[#allocation6_spill] sm:$0xff] %v10197_v53  ;;  %13718 = vst [vmem:[#allocation7_spill] sm:$0xff] %v10201_v54 }
 0x117   :  { %13721 = vst [vmem:[#allocation10_spill] sm:$0xff] %v10211_v58  ;;  %13722 = vst [vmem:[#allocation11_spill] sm:$0xff] %v10215_v59 }
 0x119   :  { %v10067_v5 = vpop.f32.mrb[16].mxu1  ;;  %v10069_v6 = vpop.f32.mrb[16].mxu0 }
 0x11a   :  { %v10079_v11 = vpop.f32.mrb[17].mxu1  ;;  %v10081_v12 = vpop.f32.mrb[17].mxu0  ;;  %v10221_v7 = vadd.f32 %v10067_v5, %v10032_v55  ;;  %v10225_v25 = vadd.f32 %v10069_v6, %v10035_v56 }
 0x11b   :  { %v10095_v17 = vpop.f32.mrb[18].mxu1  ;;  %v10097_v18 = vpop.f32.mrb[18].mxu0  ;;  %v10239_v57 = vadd.f32 %v10079_v11, %v10050_v63  ;;  %v10243_v8 = vadd.f32 %v10081_v12, %v10053_v0 }
 0x11c   :  { %v10111_v23 = vpop.f32.mrb[19].mxu1  ;;  %v10113_v24 = vpop.f32.mrb[19].mxu0  ;;  %13723 = vst [vmem:[#allocation12_spill] sm:$0xff] %v10221_v7  ;;  %13724 = vst [vmem:[#allocation13_spill] sm:$0xff] %v10225_v25  ;;  %v10251_v11 = vadd.f32 %v10095_v17, %v10032_v55  ;;  %v10255_v12 = vadd.f32 %v10097_v18, %v10035_v56 }
 0x121   :  { %v10149_v36 = vpop.f32.mrb[20].mxu1  ;;  %v10151_v37 = vpop.f32.mrb[20].mxu0 }
 0x122   :  { %v10163_v40 = vpop.f32.mrb[21].mxu1  ;;  %v10165_v43 = vpop.f32.mrb[21].mxu0 }
 0x123   :  { %v10183_v39 = vpop.f32.mrb[22].mxu1  ;;  %v10185_v34 = vpop.f32.mrb[22].mxu0 }
 0x124   :  { %v10203_v29 = vpop.f32.mrb[23].mxu1  ;;  %v10205_v30 = vpop.f32.mrb[23].mxu0 }
 0x125   :  { %13719 = vst [vmem:[#allocation8_spill] sm:$0xff] %v10203_v29  ;;  %13720 = vst [vmem:[#allocation9_spill] sm:$0xff] %v10205_v30 }
 0x129   :  { %v1133_v62 = vpop.f32.mrb[24].mxu0  ;;  %v1286_v26 = vpop.f32.mrb[24].mxu1 }
 0x12a   :  { %v1134_v5 = vadd.f32 %v1133_v62, %v10035_v56  ;;  %v1287_v51 = vadd.f32 %v1286_v26, %v10032_v55  ;;  %v1135_v61 = vpop.f32.mrb[25].mxu0  ;;  %v1288_v6 = vpop.f32.mrb[25].mxu1 }
 0x12b   :  { %v1136_v48 = vadd.f32 %v1135_v61, %v10053_v0  ;;  %v1289_v60 = vadd.f32 %v1288_v6, %v10050_v63  ;;  %v1137_v49 = vpop.f32.mrb[26].mxu0  ;;  %v1290_v52 = vpop.f32.mrb[26].mxu1  ;;  %v13725_v61 = vmax.f32 %v10059_v2, 0.0  ;;  %v13727_v6 = vmax.f32 %v10056_v1, 0.0 }
 0x12c   :  { %v1393_v7 = vmax.f32 %v1134_v5, 0.0  ;;  %v1395_v62 = vmax.f32 %v1287_v51, 0.0  ;;  %v1138_v26 = vadd.f32 %v1137_v49, %v10035_v56  ;;  %v1291_v25 = vadd.f32 %v1290_v52, %v10032_v55  ;;  %v1139_v30 = vpop.f32.mrb[27].mxu0  ;;  %v1292_v29 = vpop.f32.mrb[27].mxu1 }
 0x12d   :  { %v1394_v17 = vmax.f32 %v1136_v48, 0.0  ;;  %v1396_v58 = vmax.f32 %v1289_v60, 0.0  ;;  %v1140_v59 = vadd.f32 %v1139_v30, %v10053_v0  ;;  %v1293_v18 = vadd.f32 %v1292_v29, %v10050_v63 }
 0x12e   :  { %v10265_v53 = vmax.f32 %v13725_v61, %v1393_v7  ;;  %v10269_v5 = vmax.f32 %v13727_v6, %v1395_v62  ;;  %v1397_v51 = vmax.f32 %v1138_v26, 0.0  ;;  %v1399_v49 = vmax.f32 %v1291_v25, 0.0 }
 0x12f   :  { %v13729_v52 = vmax.f32 %v10065_v4, 0.0  ;;  %v13731_v48 = vmax.f32 %v10062_v3, 0.0  ;;  %v1398_v30 = vmax.f32 %v1140_v59, 0.0  ;;  %v1400_v29 = vmax.f32 %v1293_v18, 0.0 }
 0x130   :  { %13726 = vst [vmem:[#allocation14_spill] sm:$0xff] %v10265_v53  ;;  %13728 = vst [vmem:[#allocation15_spill] sm:$0xff] %v10269_v5  ;;  %v13733_v1 = vmax.f32 %v10077_v10, 0.0  ;;  %v13735_v25 = vmax.f32 %v10074_v9, 0.0  ;;  %v10291_v4 = vadd.f32 %v10111_v23, %v10050_v63  ;;  %v13737_v3 = vmax.f32 %v10087_v14, 0.0 }
 0x131   :  { %v10273_v54 = vmax.f32 %v13729_v52, %v1394_v17  ;;  %v10277_v60 = vmax.f32 %v13731_v48, %v1396_v58  ;;  %v13739_v59 = vmax.f32 %v10084_v13, 0.0  ;;  %v1143_v18 = vpop.f32.mrb[28].mxu0  ;;  %v1296_v10 = vpop.f32.mrb[28].mxu1  ;;  %v10306_v6 = vadd.f32 %v10113_v24, %v10053_v0 }
 0x132   :  { %v10283_v62 = vmax.f32 %v13733_v1, %v1397_v51  ;;  %v10287_v26 = vmax.f32 %v13735_v25, %v1399_v49  ;;  %v10295_v58 = vmax.f32 %v13737_v3, %v1398_v30  ;;  %v1144_v23 = vadd.f32 %v1143_v18, %v10035_v56  ;;  %v1145_v51 = vpop.f32.mrb[29].mxu0  ;;  %v1298_v49 = vpop.f32.mrb[29].mxu1 }
 0x133   :  { %13730 = vst [vmem:[#allocation16_spill] sm:$0xff] %v10273_v54  ;;  %13732 = vst [vmem:[#allocation17_spill] sm:$0xff] %v10277_v60  ;;  %v10299_v17 = vmax.f32 %v13739_v59, %v1400_v29  ;;  %v1297_v14 = vadd.f32 %v1296_v10, %v10032_v55  ;;  %v1146_v52 = vadd.f32 %v1145_v51, %v10053_v0  ;;  %v1147_v30 = vpop.f32.mrb[30].mxu0  ;;  %v1300_v29 = vpop.f32.mrb[30].mxu1  ;;  %v13743_v1 = vmax.f32 %v10090_v15, 0.0 }
 0x134   :  { %13734 = vst [vmem:[#allocation18_spill] sm:$0xff] %v10283_v62  ;;  %13736 = vst [vmem:[#allocation19_spill] sm:$0xff] %v10287_v26  ;;  %v1299_v48 = vadd.f32 %v1298_v49, %v10050_v63  ;;  %v1401_v25 = vmax.f32 %v1144_v23, 0.0  ;;  %v1148_v3 = vadd.f32 %v1147_v30, %v10035_v56  ;;  %v1301_v59 = vadd.f32 %v1300_v29, %v10032_v55  ;;  %v1149_v18 = vpop.f32.mrb[31].mxu0  ;;  %v1302_v10 = vpop.f32.mrb[31].mxu1 }
 0x135   :  { %13738 = vst [vmem:[#allocation20_spill] sm:$0xff] %v10295_v58  ;;  %13740 = vst [vmem:[#allocation21_spill] sm:$0xff] %v10299_v17  ;;  %v1403_v24 = vmax.f32 %v1297_v14, 0.0  ;;  %v1402_v61 = vmax.f32 %v1146_v52, 0.0  ;;  %v1150_v13 = vadd.f32 %v1149_v18, %v10053_v0  ;;  %v1303_v51 = vadd.f32 %v1302_v10, %v10050_v63 }
 0x136   :  { %v1404_v9 = vmax.f32 %v1299_v48, 0.0  ;;  %v13741_v49 = vmax.f32 %v10093_v16, 0.0  ;;  %v1405_v14 = vmax.f32 %v1148_v3, 0.0  ;;  %v1407_v30 = vmax.f32 %v1301_v59, 0.0 }
 0x137   :  { %v10325_v23 = vmax.f32 %v13743_v1, %v1403_v24  ;;  %v13745_v29 = vmax.f32 %v10103_v20, 0.0  ;;  %v13747_v52 = vmax.f32 %v10100_v19, 0.0  ;;  %v1406_v18 = vmax.f32 %v1150_v13, 0.0  ;;  %v8738_v19 = vld [vmem:[%s13650_s3 + $0x1e8] ss:$16 sps:$4 sm:$0xff]  }
 0x138   :  { %v10321_v2 = vmax.f32 %v13741_v49, %v1401_v25  ;;  %v1408_v10 = vmax.f32 %v1303_v51, 0.0  ;;  %v13749_v15 = vmax.f32 %v10109_v22, 0.0  ;;  %v13751_v24 = vmax.f32 %v10106_v21, 0.0  ;;  %v8740_v21 = vld [vmem:[%s13650_s3 + $0x1ec] ss:$16 sps:$4 sm:$0xff]  }
 0x139   :  { %13744 = vst [vmem:[#allocation23_spill] sm:$0xff] %v10325_v23  ;;  %v10329_v7 = vmax.f32 %v13745_v29, %v1402_v61  ;;  %v10333_v48 = vmax.f32 %v13747_v52, %v1404_v9  ;;  %v13753_v20 = vmax.f32 %v10121_v28, 0.0  ;;  %v13755_v9 = vmax.f32 %v10118_v27, 0.0  ;;  %v1153_v59 = vpop.f32.mrb[32].mxu0  ;;  %v1306_v22 = vpop.f32.mrb[32].mxu1  ;;  %2906 = vmatprep.subr.bf16.mxu1 %v8740_v21 }
 0x13a   :  { %13742 = vst [vmem:[#allocation22_spill] sm:$0xff] %v10321_v2  ;;  %v10339_v1 = vmax.f32 %v13749_v15, %v1405_v14  ;;  %v10343_v3 = vmax.f32 %v13751_v24, %v1407_v30  ;;  %v10363_v49 = vadd.f32 %v10149_v36, %v10032_v55  ;;  %v1154_v28 = vadd.f32 %v1153_v59, %v10035_v56  ;;  %v1155_v27 = vpop.f32.mrb[33].mxu0  ;;  %v1308_v30 = vpop.f32.mrb[33].mxu1  ;;  %v8741_v29 = vld [vmem:[%s13650_s3 + $0x1e0] ss:$16 sps:$4 sm:$0xff]  }
 0x13b   :  { %13746 = vst [vmem:[#allocation24_spill] sm:$0xff] %v10329_v7  ;;  %13748 = vst [vmem:[#allocation25_spill] sm:$0xff] %v10333_v48  ;;  %v10350_v61 = vmax.f32 %v13753_v20, %v1406_v18  ;;  %v10354_v13 = vmax.f32 %v13755_v9, %v1408_v10  ;;  %v1307_v14 = vadd.f32 %v1306_v22, %v10032_v55  ;;  %v8743_v52 = vld [vmem:[%s13650_s3 + $0x1e4] ss:$16 sps:$4 sm:$0xff]   ;;  %v1157_v15 = vpop.f32.mrb[34].mxu0  ;;  %v1310_v24 = vpop.f32.mrb[34].mxu1  ;;  %2907 = vmatpush1.bf16.msra.mxu1 %v8738_v19 }
 0x13c   :  { %13750 = vst [vmem:[#allocation26_spill] sm:$0xff] %v10339_v1  ;;  %13752 = vst [vmem:[#allocation27_spill] sm:$0xff] %v10343_v3  ;;  %v10375_v18 = vadd.f32 %v10151_v37, %v10035_v56  ;;  %v1156_v36 = vadd.f32 %v1155_v27, %v10053_v0  ;;  %v1309_v10 = vadd.f32 %v1308_v30, %v10050_v63  ;;  %v8744_v9 = vld [vmem:[%s13650_s3 + $0x208] ss:$16 sps:$4 sm:$0xff]   ;;  %v1409_v59 = vmax.f32 %v1154_v28, 0.0  ;;  %v1159_v16 = vpop.f32.mrb[35].mxu0 }
 0x13d   :  { %13754 = vst [vmem:[#allocation28_spill] sm:$0xff] %v10350_v61  ;;  %13756 = vst [vmem:[#allocation29_spill] sm:$0xff] %v10354_v13  ;;  %v1411_v22 = vmax.f32 %v1307_v14, 0.0  ;;  %v1158_v51 = vadd.f32 %v1157_v15, %v10035_v56  ;;  %v1311_v37 = vadd.f32 %v1310_v24, %v10032_v55  ;;  %v1312_v27 = vpop.f32.mrb[35].mxu1  ;;  %2793 = vmatprep.subr.bf16.mxu0 %v8743_v52  ;;  %v8746_v21 = vld [vmem:[%s13650_s3 + $0x20c] ss:$16 sps:$4 sm:$0xff]  }
 0x13e   :  { %v1410_v30 = vmax.f32 %v1156_v36, 0.0  ;;  %v1412_v20 = vmax.f32 %v1309_v10, 0.0  ;;  %v1160_v25 = vadd.f32 %v1159_v16, %v10053_v0  ;;  %v1313_v53 = vadd.f32 %v1312_v27, %v10050_v63  ;;  %2794 = vmatpush1.bf16.msra.mxu0 %v8741_v29  ;;  %v8747_v28 = vld [vmem:[%s13650_s3 + $0x200] ss:$16 sps:$4 sm:$0xff]   ;;  %2908 = vmatprep.subr.bf16.mxu1 %v8746_v21  ;;  %v8749_v16 = vld [vmem:[%s13650_s3 + $0x204] ss:$16 sps:$4 sm:$0xff]  }
 0x13f   :  { %v13757_v14 = vmax.f32 %v10129_v32, 0.0  ;;  %v13759_v19 = vmax.f32 %v10126_v31, 0.0  ;;  %v1413_v24 = vmax.f32 %v1158_v51, 0.0  ;;  %v1415_v36 = vmax.f32 %v1311_v37, 0.0  ;;  %v8750_v31 = vld [vmem:[%s13650_s3 + $0x228] ss:$16 sps:$4 sm:$0xff]   ;;  %2909 = vmatpush1.bf16.msra.mxu1 %v8744_v9  ;;  %2795 = vmatprep.subr.bf16.mxu0 %v8749_v16 }
 0x140   :  { %v13761_v29 = vmax.f32 %v10147_v35, 0.0  ;;  %v13763_v27 = vmax.f32 %v10143_v33, 0.0  ;;  %v8752_v51 = vld [vmem:[%s13650_s3 + $0x22c] ss:$16 sps:$4 sm:$0xff]   ;;  %v10422_v35 = vadd.f32 %v10163_v40, %v10050_v63  ;;  %v13765_v33 = vmax.f32 %v10161_v42, 0.0 }
 0x141   :  { %v10396_v15 = vmax.f32 %v13757_v14, %v1409_v59  ;;  %v10400_v52 = vmax.f32 %v13759_v19, %v1411_v22  ;;  %v1414_v59 = vmax.f32 %v1160_v25, 0.0  ;;  %v1416_v14 = vmax.f32 %v1313_v53, 0.0  ;;  %v8753_v37 = vld [vmem:[%s13650_s3 + $0x220] ss:$16 sps:$4 sm:$0xff]   ;;  %v1163_v42 = vpop.f32.mrb[36].mxu0  ;;  %2910 = vmatprep.subr.bf16.mxu1 %v8752_v51 }
 0x142   :  { %v10407_v10 = vmax.f32 %v13761_v29, %v1410_v30  ;;  %v10411_v32 = vmax.f32 %v13763_v27, %v1412_v20  ;;  %v10426_v20 = vmax.f32 %v13765_v33, %v1413_v24  ;;  %v13767_v53 = vmax.f32 %v10157_v50, 0.0  ;;  %v1316_v24 = vpop.f32.mrb[36].mxu1  ;;  %2796 = vmatpush1.bf16.msra.mxu0 %v8747_v28  ;;  %v8755_v9 = vld [vmem:[%s13650_s3 + $0x224] ss:$16 sps:$4 sm:$0xff]   ;;  %v1165_v29 = vpop.f32.mrb[37].mxu0 }
 0x143   :  { %13758 = vst [vmem:[#allocation30_spill] sm:$0xff] %v10396_v15  ;;  %13760 = vst [vmem:[#allocation31_spill] sm:$0xff] %v10400_v52  ;;  %v13769_v21 = vmax.f32 %v10173_v41, 0.0  ;;  %v13771_v40 = vmax.f32 %v10169_v38, 0.0  ;;  %v10451_v41 = vadd.f32 %v10165_v43, %v10053_v0  ;;  %v1164_v38 = vadd.f32 %v1163_v42, %v10035_v56  ;;  %v1318_v27 = vpop.f32.mrb[37].mxu1  ;;  %v1167_v51 = vpop.f32.mrb[38].mxu0  ;;  %2797 = vmatprep.subr.bf16.mxu0 %v8755_v9 }
 0x144   :  { %13762 = vst [vmem:[#allocation32_spill] sm:$0xff] %v10407_v10  ;;  %13764 = vst [vmem:[#allocation33_spill] sm:$0xff] %v10411_v32  ;;  %v10430_v25 = vmax.f32 %v13767_v53, %v1415_v36  ;;  %v1317_v16 = vadd.f32 %v1316_v24, %v10032_v55  ;;  %v10457_v28 = vadd.f32 %v10183_v39, %v10032_v55  ;;  %v1320_v33 = vpop.f32.mrb[38].mxu1  ;;  %v1169_v24 = vpop.f32.mrb[39].mxu0  ;;  %2911 = vmatpush1.bf16.msra.mxu1 %v8750_v31  ;;  %v8756_v9 = vld [vmem:[%s13650_s3 + $0x248] ss:$16 sps:$4 sm:$0xff]  }
 0x145   :  { %13766 = vst [vmem:[#allocation34_spill] sm:$0xff] %v10426_v20  ;;  %v10437_v30 = vmax.f32 %v13769_v21, %v1414_v59  ;;  %v10441_v19 = vmax.f32 %v13771_v40, %v1416_v14  ;;  %v1166_v59 = vadd.f32 %v1165_v29, %v10053_v0  ;;  %v1319_v14 = vadd.f32 %v1318_v27, %v10050_v63  ;;  %v1322_v50 = vpop.f32.mrb[39].mxu1  ;;  %v8765_v20 = vld [vmem:[%s13650_s3 + $0x260] ss:$16 sps:$4 sm:$0xff]  }
 0x146   :  { %13768 = vst [vmem:[#allocation35_spill] sm:$0xff] %v10430_v25  ;;  %v1417_v53 = vmax.f32 %v1164_v38, 0.0  ;;  %v1419_v21 = vmax.f32 %v1317_v16, 0.0  ;;  %v1168_v40 = vadd.f32 %v1167_v51, %v10035_v56  ;;  %v1321_v42 = vadd.f32 %v1320_v33, %v10032_v55  ;;  %2798 = vmatpush1.bf16.msra.mxu0 %v8753_v37  ;;  %v8758_v38 = vld [vmem:[%s13650_s3 + $0x24c] ss:$16 sps:$4 sm:$0xff]   ;;  %v13798_v15 = vld [vmem:[#allocation12_spill] sm:$0xff] }
 0x147   :  { %13770 = vst [vmem:[#allocation36_spill] sm:$0xff] %v10437_v30  ;;  %13772 = vst [vmem:[#allocation37_spill] sm:$0xff] %v10441_v19  ;;  %v1418_v39 = vmax.f32 %v1166_v59, 0.0  ;;  %v1420_v22 = vmax.f32 %v1319_v14, 0.0  ;;  %v1170_v29 = vadd.f32 %v1169_v24, %v10053_v0  ;;  %v1323_v27 = vadd.f32 %v1322_v50, %v10050_v63  ;;  %2912 = vmatprep.subr.bf16.mxu1 %v8758_v38  ;;  %v8818_v25 = vld [vmem:[%s13650_s3 + $0x38c] ss:$16 sps:$4 sm:$0xff]  }
 0x148   :  { %v13773_v16 = vmax.f32 %v10181_v45, 0.0  ;;  %v13775_v31 = vmax.f32 %v10177_v44, 0.0  ;;  %v1421_v14 = vmax.f32 %v1168_v40, 0.0  ;;  %v1423_v33 = vmax.f32 %v1321_v42, 0.0  ;;  %v8759_v45 = vld [vmem:[%s13650_s3 + $0x240] ss:$16 sps:$4 sm:$0xff]   ;;  %2913 = vmatpush1.bf16.msra.mxu1 %v8756_v9 }
 0x149   :  { %v13777_v37 = vmax.f32 %v10193_v47, 0.0  ;;  %v13779_v24 = vmax.f32 %v10189_v46, 0.0  ;;  %v1422_v36 = vmax.f32 %v1170_v29, 0.0  ;;  %v1424_v62 = vmax.f32 %v1323_v27, 0.0  ;;  %v8761_v44 = vld [vmem:[%s13650_s3 + $0x244] ss:$16 sps:$4 sm:$0xff]  }
 0x14a   :  { %v10475_v51 = vmax.f32 %v13773_v16, %v1417_v53  ;;  %v10479_v59 = vmax.f32 %v13775_v31, %v1419_v21  ;;  %v10498_v47 = vadd.f32 %v10185_v34, %v10035_v56  ;;  %v13781_v46 = vld [vmem:[#allocation7_spill] sm:$0xff]  ;;  %v13784_v40 = vld [vmem:[#allocation6_spill] sm:$0xff]  ;;  %v1173_v34 = vpop.f32.mrb[40].mxu0  ;;  %v1326_v53 = vpop.f32.mrb[40].mxu1  ;;  %2799 = vmatprep.subr.bf16.mxu0 %v8761_v44  ;;  %v13793_v9 = vld [vmem:[#allocation8_spill] sm:$0xff]  ;;  %v13803_v1 = vmax.f32 %v10239_v57, 0.0 }
 0x14b   :  { %v10483_v50 = vmax.f32 %v13777_v37, %v1418_v39  ;;  %v10487_v43 = vmax.f32 %v13779_v24, %v1420_v22  ;;  %v13782_v22 = vmax.f32 %v13781_v46, 0.0  ;;  %v13785_v42 = vmax.f32 %v13784_v40, 0.0  ;;  %v13787_v27 = vld [vmem:[#allocation11_spill] sm:$0xff]  ;;  %v13790_v31 = vld [vmem:[#allocation10_spill] sm:$0xff]  ;;  %v1175_v40 = vpop.f32.mrb[41].mxu0  ;;  %2800 = vmatpush1.bf16.msra.mxu0 %v8759_v45 }
 0x14c   :  { %13774 = vst [vmem:[#allocation38_spill] sm:$0xff] %v10475_v51  ;;  %13776 = vst [vmem:[#allocation39_spill] sm:$0xff] %v10479_v59  ;;  %v13788_v38 = vmax.f32 %v13787_v27, 0.0  ;;  %v13791_v37 = vmax.f32 %v13790_v31, 0.0  ;;  %v10522_v46 = vadd.f32 %v13793_v9, %v10050_v63  ;;  %v1177_v31 = vpop.f32.mrb[42].mxu0  ;;  %v13809_v57 = vmax.f32 %v10306_v6, 0.0 }
 0x14d   :  { %13778 = vst [vmem:[#allocation40_spill] sm:$0xff] %v10483_v50  ;;  %13780 = vst [vmem:[#allocation41_spill] sm:$0xff] %v10487_v43  ;;  %v10502_v21 = vmax.f32 %v13782_v22, %v1421_v14  ;;  %v10506_v39 = vmax.f32 %v13785_v42, %v1423_v33  ;;  %v1174_v22 = vadd.f32 %v1173_v34, %v10035_v56  ;;  %v1328_v42 = vpop.f32.mrb[41].mxu1  ;;  %v8764_v45 = vld [vmem:[%s13650_s3 + $0x26c] ss:$16 sps:$4 sm:$0xff]  }
 0x14e   :  { %v10511_v16 = vmax.f32 %v13788_v38, %v1422_v36  ;;  %v10515_v24 = vmax.f32 %v13791_v37, %v1424_v62  ;;  %v1327_v36 = vadd.f32 %v1326_v53, %v10032_v55  ;;  %v13794_v62 = vld [vmem:[#allocation9_spill] sm:$0xff]  ;;  %v1176_v38 = vadd.f32 %v1175_v40, %v10053_v0  ;;  %v1330_v37 = vpop.f32.mrb[42].mxu1  ;;  %2914 = vmatprep.subr.bf16.mxu1 %v8764_v45  ;;  %v8819_v32 = vld [vmem:[%s13650_s3 + $0x380] ss:$16 sps:$4 sm:$0xff]  }
 0x14f   :  { %13783 = vst [vmem:[#allocation7_spill] sm:$0xff] %v10502_v21  ;;  %13786 = vst [vmem:[#allocation6_spill] sm:$0xff] %v10506_v39  ;;  %v10528_v27 = vadd.f32 %v13794_v62, %v10053_v0  ;;  %v1329_v44 = vadd.f32 %v1328_v42, %v10050_v63  ;;  %v8762_v53 = vld [vmem:[%s13650_s3 + $0x268] ss:$16 sps:$4 sm:$0xff]   ;;  %v1425_v34 = vmax.f32 %v1174_v22, 0.0  ;;  %v1178_v14 = vadd.f32 %v1177_v31, %v10035_v56  ;;  %v1179_v42 = vpop.f32.mrb[43].mxu0 }
 0x150   :  { %13789 = vst [vmem:[#allocation11_spill] sm:$0xff] %v10511_v16  ;;  %13792 = vst [vmem:[#allocation10_spill] sm:$0xff] %v10515_v24  ;;  %v1427_v62 = vmax.f32 %v1327_v36, 0.0  ;;  %v1331_v40 = vadd.f32 %v1330_v37, %v10032_v55  ;;  %v1332_v33 = vpop.f32.mrb[43].mxu1  ;;  %v1426_v29 = vmax.f32 %v1176_v38, 0.0  ;;  %v1180_v9 = vadd.f32 %v1179_v42, %v10053_v0  ;;  %v13795_v36 = vld [vmem:[#allocation13_spill] sm:$0xff]  ;;  %2915 = vmatpush1.bf16.msra.mxu1 %v8762_v53 }
 0x151   :  { %v1428_v51 = vmax.f32 %v1329_v44, 0.0  ;;  %v1333_v21 = vadd.f32 %v1332_v33, %v10050_v63  ;;  %v8767_v22 = vld [vmem:[%s13650_s3 + $0x264] ss:$16 sps:$4 sm:$0xff]   ;;  %v13796_v31 = vmax.f32 %v13795_v36, 0.0  ;;  %v13799_v38 = vmax.f32 %v13798_v15, 0.0 }
 0x152   :  { %v1429_v42 = vmax.f32 %v1178_v14, 0.0  ;;  %v1431_v2 = vmax.f32 %v1331_v40, 0.0  ;;  %v13801_v33 = vmax.f32 %v10243_v8, 0.0  ;;  %v1430_v54 = vmax.f32 %v1180_v9, 0.0  ;;  %2801 = vmatprep.subr.bf16.mxu0 %v8767_v22 }
 0x153   :  { %v10552_v37 = vmax.f32 %v13796_v31, %v1425_v34  ;;  %v10556_v44 = vmax.f32 %v13799_v38, %v1427_v62  ;;  %v10564_v58 = vmax.f32 %v13803_v1, %v1428_v51  ;;  %v1432_v26 = vmax.f32 %v1333_v21, 0.0  ;;  %2802 = vmatpush1.bf16.msra.mxu0 %v8765_v20  ;;  %v8773_v31 = vld [vmem:[%s13650_s3 + $0x284] ss:$16 sps:$4 sm:$0xff]  }
 0x154   :  { %v10560_v45 = vmax.f32 %v13801_v33, %v1426_v29  ;;  %v1389_v34 = vmax.f32 %v10498_v47, 0.0  ;;  %v1392_v15 = vmax.f32 %v10522_v46, 0.0  ;;  %v13805_v62 = vmax.f32 %v10255_v12, 0.0  ;;  %v1183_v47 = vpop.f32.mrb[44].mxu0  ;;  %v1336_v29 = vpop.f32.mrb[44].mxu1  ;;  %2803 = vmatprep.subr.bf16.mxu0 %v8773_v31 }
 0x155   :  { %13797 = vst [vmem:[#allocation8_spill] sm:$0xff] %v10552_v37  ;;  %13800 = vst [vmem:[#allocation9_spill] sm:$0xff] %v10556_v44  ;;  %v13807_v53 = vmax.f32 %v10251_v11, 0.0  ;;  %v10578_v1 = vmax.f32 %v13809_v57, %v1430_v54  ;;  %v13811_v51 = vmax.f32 %v10291_v4, 0.0  ;;  %v8768_v11 = vld [vmem:[%s13650_s3 + $0x288] ss:$16 sps:$4 sm:$0xff]   ;;  %v1184_v6 = vadd.f32 %v1183_v47, %v10035_v56 }
 0x156   :  { %13802 = vst [vmem:[#allocation13_spill] sm:$0xff] %v10560_v45  ;;  %13804 = vst [vmem:[#allocation12_spill] sm:$0xff] %v10564_v58  ;;  %v10570_v14 = vmax.f32 %v13805_v62, %v1429_v42  ;;  %v1390_v54 = vmax.f32 %v10528_v27, 0.0  ;;  %v1185_v4 = vpop.f32.mrb[45].mxu0  ;;  %v1338_v20 = vpop.f32.mrb[45].mxu1 }
 0x157   :  { %v10574_v8 = vmax.f32 %v13807_v53, %v1431_v2  ;;  %13810 = vst [vmem:[#allocation44_spill] sm:$0xff] %v10578_v1  ;;  %v10582_v21 = vmax.f32 %v13811_v51, %v1432_v26  ;;  %v8770_v2 = vld [vmem:[%s13650_s3 + $0x28c] ss:$16 sps:$4 sm:$0xff]   ;;  %v1337_v26 = vadd.f32 %v1336_v29, %v10032_v55  ;;  %v1186_v46 = vadd.f32 %v1185_v4, %v10053_v0  ;;  %v1187_v40 = vpop.f32.mrb[46].mxu0  ;;  %v1340_v22 = vpop.f32.mrb[46].mxu1 }
 0x158   :  { %13806 = vst [vmem:[#allocation42_spill] sm:$0xff] %v10570_v14  ;;  %v1339_v9 = vadd.f32 %v1338_v20, %v10050_v63  ;;  %2916 = vmatprep.subr.bf16.mxu1 %v8770_v2  ;;  %v8771_v27 = vld [vmem:[%s13650_s3 + $0x280] ss:$16 sps:$4 sm:$0xff]   ;;  %v1433_v38 = vmax.f32 %v1184_v6, 0.0  ;;  %v1188_v33 = vadd.f32 %v1187_v40, %v10035_v56  ;;  %v1341_v62 = vadd.f32 %v1340_v22, %v10032_v55  ;;  %v1189_v53 = vpop.f32.mrb[47].mxu0  ;;  %v1342_v57 = vpop.f32.mrb[47].mxu1 }
 0x159   :  { %13808 = vst [vmem:[#allocation43_spill] sm:$0xff] %v10574_v8  ;;  %13812 = vst [vmem:[#allocation45_spill] sm:$0xff] %v10582_v21  ;;  %v1435_v42 = vmax.f32 %v1337_v26, 0.0  ;;  %2917 = vmatpush1.bf16.msra.mxu1 %v8768_v11  ;;  %v1434_v51 = vmax.f32 %v1186_v46, 0.0  ;;  %v1190_v29 = vadd.f32 %v1189_v53, %v10053_v0  ;;  %v1343_v2 = vadd.f32 %v1342_v57, %v10050_v63  ;;  %v8800_v12 = vld [vmem:[%s13650_s3 + $0x32c] ss:$16 sps:$4 sm:$0xff]  }
 0x15a   :  { %v1436_v47 = vmax.f32 %v1339_v9, 0.0  ;;  %v13813_v4 = vmax.f32 %v10375_v18, 0.0  ;;  %v13815_v6 = vmax.f32 %v10363_v49, 0.0  ;;  %v1437_v40 = vmax.f32 %v1188_v33, 0.0  ;;  %2804 = vmatpush1.bf16.msra.mxu0 %v8771_v27  ;;  %v8774_v18 = vld [vmem:[%s13650_s3 + $0x2a8] ss:$16 sps:$4 sm:$0xff]  }
 0x15b   :  { %v1439_v22 = vmax.f32 %v1341_v62, 0.0  ;;  %v13817_v11 = vmax.f32 %v10451_v41, 0.0  ;;  %v13819_v9 = vmax.f32 %v10422_v35, 0.0  ;;  %v1438_v31 = vmax.f32 %v1190_v29, 0.0  ;;  %v8776_v49 = vld [vmem:[%s13650_s3 + $0x2ac] ss:$16 sps:$4 sm:$0xff]  }
 0x15c   :  { %v10611_v20 = vmax.f32 %v13813_v4, %v1433_v38  ;;  %v10615_v26 = vmax.f32 %v13815_v6, %v1435_v42  ;;  %v1440_v57 = vmax.f32 %v1343_v2, 0.0  ;;  %v10631_v38 = vmax.f32 %v1389_v34, %v1437_v40  ;;  %v10641_v33 = vpop.f32.mrb[48].mxu1  ;;  %v10643_v62 = vpop.f32.mrb[48].mxu0  ;;  %2918 = vmatprep.subr.bf16.mxu1 %v8776_v49  ;;  %v8777_v34 = vld [vmem:[%s13650_s3 + $0x2a0] ss:$16 sps:$4 sm:$0xff]  }
 0x15d   :  { %v10619_v46 = vmax.f32 %v13817_v11, %v1434_v51  ;;  %v10623_v53 = vmax.f32 %v13819_v9, %v1436_v47  ;;  %v13822_v41 = vmax.f32 %v10457_v28, 0.0  ;;  %v10637_v42 = vmax.f32 %v1390_v54, %v1438_v31  ;;  %v8779_v28 = vld [vmem:[%s13650_s3 + $0x2a4] ss:$16 sps:$4 sm:$0xff]   ;;  %v10653_v54 = vpop.f32.mrb[49].mxu1  ;;  %2919 = vmatpush1.bf16.msra.mxu1 %v8774_v18  ;;  %v8780_v40 = vld [vmem:[%s13650_s3 + $0x2c8] ss:$16 sps:$4 sm:$0xff]  }
 0x15e   :  { %13814 = vst [vmem:[#allocation46_spill] sm:$0xff] %v10611_v20  ;;  %13816 = vst [vmem:[#allocation47_spill] sm:$0xff] %v10615_v26  ;;  %v10639_v35 = vmax.f32 %v1392_v15, %v1440_v57  ;;  %v10655_v15 = vpop.f32.mrb[49].mxu0  ;;  %v10657_v47 = vpop.f32.mrb[50].mxu1  ;;  %2805 = vmatprep.subr.bf16.mxu0 %v8779_v28  ;;  %v8783_v11 = vld [vmem:[%s13650_s3 + $0x2c0] ss:$16 sps:$4 sm:$0xff]  }
 0x15f   :  { %13818 = vst [vmem:[#allocation48_spill] sm:$0xff] %v10619_v46  ;;  %13820 = vst [vmem:[#allocation49_spill] sm:$0xff] %v10623_v53  ;;  %v10635_v27 = vmax.f32 %v13822_v41, %v1439_v22  ;;  %v10659_v29 = vpop.f32.mrb[50].mxu0  ;;  %v10663_v4 = vpop.f32.mrb[51].mxu1  ;;  %2806 = vmatpush1.bf16.msra.mxu0 %v8777_v34  ;;  %v8782_v22 = vld [vmem:[%s13650_s3 + $0x2cc] ss:$16 sps:$4 sm:$0xff]   ;;  %v10806_v8 = vadd.f32 %v10657_v47, %v10032_v55 }
 0x160   :  { %13821 = vst [vmem:[#allocation50_spill] sm:$0xff] %v10631_v38  ;;  %13824 = vst [vmem:[#allocation52_spill] sm:$0xff] %v10637_v42  ;;  %v10665_v6 = vpop.f32.mrb[51].mxu0  ;;  %2920 = vmatprep.subr.bf16.mxu1 %v8782_v22  ;;  %v8785_v9 = vld [vmem:[%s13650_s3 + $0x2c4] ss:$16 sps:$4 sm:$0xff]  }
 0x161   :  { %13823 = vst [vmem:[#allocation51_spill] sm:$0xff] %v10635_v27  ;;  %13825 = vst [vmem:[#allocation53_spill] sm:$0xff] %v10639_v35  ;;  %2921 = vmatpush1.bf16.msra.mxu1 %v8780_v40  ;;  %v8786_v31 = vld [vmem:[%s13650_s3 + $0x2e8] ss:$16 sps:$4 sm:$0xff]   ;;  %v8788_v57 = vld [vmem:[%s13650_s3 + $0x2ec] ss:$16 sps:$4 sm:$0xff]   ;;  %2807 = vmatprep.subr.bf16.mxu0 %v8785_v9 }
 0x162   :  { %v10685_v18 = vpop.f32.mrb[52].mxu1  ;;  %v10687_v49 = vpop.f32.mrb[52].mxu0  ;;  %v8791_v41 = vld [vmem:[%s13650_s3 + $0x2e4] ss:$16 sps:$4 sm:$0xff]   ;;  %2922 = vmatprep.subr.bf16.mxu1 %v8788_v57  ;;  %v8789_v40 = vld [vmem:[%s13650_s3 + $0x2e0] ss:$16 sps:$4 sm:$0xff]  }
 0x163   :  { %v10692_v34 = vpop.f32.mrb[53].mxu1  ;;  %v10694_v28 = vpop.f32.mrb[53].mxu0  ;;  %2808 = vmatpush1.bf16.msra.mxu0 %v8783_v11  ;;  %v8794_v22 = vld [vmem:[%s13650_s3 + $0x30c] ss:$16 sps:$4 sm:$0xff]   ;;  %v8797_v51 = vld [vmem:[%s13650_s3 + $0x304] ss:$16 sps:$4 sm:$0xff]  }
 0x164   :  { %v10702_v2 = vpop.f32.mrb[54].mxu1  ;;  %v10704_v9 = vpop.f32.mrb[54].mxu0  ;;  %2809 = vmatprep.subr.bf16.mxu0 %v8791_v41  ;;  %v8792_v57 = vld [vmem:[%s13650_s3 + $0x308] ss:$16 sps:$4 sm:$0xff]   ;;  %v8795_v41 = vld [vmem:[%s13650_s3 + $0x300] ss:$16 sps:$4 sm:$0xff]  }
 0x165   :  { %v10709_v36 = vpop.f32.mrb[55].mxu1  ;;  %v10711_v11 = vpop.f32.mrb[55].mxu0  ;;  %2923 = vmatpush1.bf16.msra.mxu1 %v8786_v31  ;;  %v8803_v20 = vld [vmem:[%s13650_s3 + $0x324] ss:$16 sps:$4 sm:$0xff]   ;;  %v8798_v31 = vld [vmem:[%s13650_s3 + $0x328] ss:$16 sps:$4 sm:$0xff]  }
 0x166   :  { %2924 = vmatprep.subr.bf16.mxu1 %v8794_v22  ;;  %v8801_v22 = vld [vmem:[%s13650_s3 + $0x320] ss:$16 sps:$4 sm:$0xff]   ;;  %v8804_v42 = vld [vmem:[%s13650_s3 + $0x348] ss:$16 sps:$4 sm:$0xff]   ;;  %v8815_v53 = vld [vmem:[%s13650_s3 + $0x364] ss:$16 sps:$4 sm:$0xff]  }
 0x167   :  { %2810 = vmatpush1.bf16.msra.mxu0 %v8789_v40  ;;  %v8806_v40 = vld [vmem:[%s13650_s3 + $0x34c] ss:$16 sps:$4 sm:$0xff]   ;;  %v8807_v26 = vld [vmem:[%s13650_s3 + $0x340] ss:$16 sps:$4 sm:$0xff]  }
 0x168   :  { %2811 = vmatprep.subr.bf16.mxu0 %v8797_v51 }
 0x169   :  { %2925 = vmatpush1.bf16.msra.mxu1 %v8792_v57  ;;  %v10734_v38 = vpop.f32.mrb[56].mxu1  ;;  %v10736_v51 = vpop.f32.mrb[56].mxu0  ;;  %v8809_v57 = vld [vmem:[%s13650_s3 + $0x344] ss:$16 sps:$4 sm:$0xff]  }
 0x16a   :  { %2926 = vmatprep.subr.bf16.mxu1 %v8800_v12  ;;  %v10741_v14 = vpop.f32.mrb[57].mxu1  ;;  %v10743_v37 = vpop.f32.mrb[57].mxu0  ;;  %v10882_v44 = vadd.f32 %v10736_v51, %v10035_v56 }
 0x16b   :  { %2812 = vmatpush1.bf16.msra.mxu0 %v8795_v41  ;;  %v10748_v46 = vpop.f32.mrb[58].mxu1  ;;  %v10750_v27 = vpop.f32.mrb[58].mxu0  ;;  %v8812_v41 = vld [vmem:[%s13650_s3 + $0x36c] ss:$16 sps:$4 sm:$0xff]   ;;  %v10889_v43 = vadd.f32 %v10741_v14, %v10050_v63  ;;  %v10896_v51 = vadd.f32 %v10743_v37, %v10053_v0 }
 0x16c   :  { %2813 = vmatprep.subr.bf16.mxu0 %v8803_v20  ;;  %v10752_v35 = vpop.f32.mrb[59].mxu1  ;;  %v10754_v12 = vpop.f32.mrb[59].mxu0  ;;  %v8810_v20 = vld [vmem:[%s13650_s3 + $0x368] ss:$16 sps:$4 sm:$0xff]   ;;  %v10906_v14 = vadd.f32 %v10750_v27, %v10035_v56 }
 0x16d   :  { %2927 = vmatpush1.bf16.msra.mxu1 %v8798_v31  ;;  %v8813_v31 = vld [vmem:[%s13650_s3 + $0x360] ss:$16 sps:$4 sm:$0xff]   ;;  %v10911_v16 = vadd.f32 %v10752_v35, %v10050_v63  ;;  %v10915_v37 = vadd.f32 %v10754_v12, %v10053_v0 }
 0x16e   :  { %2928 = vmatprep.subr.bf16.mxu1 %v8806_v40 }
 0x16f   :  { %2814 = vmatpush1.bf16.msra.mxu0 %v8801_v22 }
 0x170   :  { %2815 = vmatprep.subr.bf16.mxu0 %v8809_v57 }
 0x171   :  { %2929 = vmatpush1.bf16.msra.mxu1 %v8804_v42  ;;  %v10771_v17 = vpop.f32.mrb[60].mxu1  ;;  %v10773_v5 = vpop.f32.mrb[60].mxu0  ;;  %v10785_v42 = vadd.f32 %v10641_v33, %v10032_v55 }
 0x172   :  { %2930 = vmatprep.subr.bf16.mxu1 %v8812_v41  ;;  %v10775_v40 = vpop.f32.mrb[61].mxu1  ;;  %v10777_v60 = vpop.f32.mrb[61].mxu0  ;;  %v10793_v41 = vadd.f32 %v10643_v62, %v10035_v56  ;;  %v10832_v62 = vadd.f32 %v10687_v49, %v10035_v56  ;;  %v10853_v49 = vadd.f32 %v10704_v9, %v10035_v56  ;;  %v10871_v9 = vadd.f32 %v10734_v38, %v10032_v55 }
 0x173   :  { %2816 = vmatpush1.bf16.msra.mxu0 %v8807_v26  ;;  %v10779_v22 = vpop.f32.mrb[62].mxu1  ;;  %v10781_v1 = vpop.f32.mrb[62].mxu0  ;;  %v10797_v26 = vadd.f32 %v10653_v54, %v10050_v63  ;;  %v10815_v54 = vadd.f32 %v10663_v4, %v10050_v63  ;;  %v10836_v4 = vadd.f32 %v10692_v34, %v10050_v63  ;;  %v10857_v34 = vadd.f32 %v10709_v36, %v10050_v63 }
 0x174   :  { %2817 = vmatprep.subr.bf16.mxu0 %v8815_v53  ;;  %v10787_v57 = vpop.f32.mrb[63].mxu1  ;;  %v10789_v45 = vpop.f32.mrb[63].mxu0  ;;  %v10801_v53 = vadd.f32 %v10655_v15, %v10053_v0  ;;  %v10819_v15 = vadd.f32 %v10665_v6, %v10053_v0  ;;  %v10840_v6 = vadd.f32 %v10694_v28, %v10053_v0  ;;  %v10902_v38 = vadd.f32 %v10748_v46, %v10032_v55 }
 0x175   :  { %2931 = vmatpush1.bf16.msra.mxu1 %v8810_v20  ;;  %v10810_v20 = vadd.f32 %v10659_v29, %v10035_v56  ;;  %v10849_v29 = vadd.f32 %v10702_v2, %v10032_v55  ;;  %v10867_v2 = vadd.f32 %v10711_v11, %v10053_v0  ;;  %v10919_v59 = vadd.f32 %v10771_v17, %v10032_v55 }
 0x176   :  { %v10928_v24 = vadd.f32 %v10773_v5, %v10035_v56  ;;  %v10932_v35 = vadd.f32 %v10775_v40, %v10050_v63  ;;  %v10936_v12 = vadd.f32 %v10777_v60, %v10053_v0  ;;  %v10945_v27 = vadd.f32 %v10779_v22, %v10032_v55  ;;  %2932 = vmatprep.subr.bf16.mxu1 %v8818_v25 }
 0x177   :  { %2818 = vmatpush1.bf16.msra.mxu0 %v8813_v31  ;;  %v10823_v31 = vadd.f32 %v10685_v18, %v10032_v55  ;;  %v10949_v5 = vadd.f32 %v10781_v1, %v10035_v56  ;;  %v10953_v40 = vadd.f32 %v10787_v57, %v10050_v63  ;;  %v10963_v22 = vadd.f32 %v10789_v45, %v10053_v0 }
 0x178   :  { %13826 = vst [vmem:[#allocation54_spill] sm:$0xff] %v10945_v27 }
 0x179   :  { %v10825_v47 = vpop.f32.mrb[64].mxu1  ;;  %v10827_v33 = vpop.f32.mrb[64].mxu0  ;;  %13827 = vst [vmem:[#allocation55_spill] sm:$0xff] %v10949_v5  ;;  %13828 = vst [vmem:[#allocation56_spill] sm:$0xff] %v10953_v40 }
 0x17a   :  { %v10842_v18 = vpop.f32.mrb[65].mxu1  ;;  %v10844_v21 = vpop.f32.mrb[65].mxu0  ;;  %13831 = vst [vmem:[#allocation59_spill] sm:$0xff] %v10963_v22  ;;  %v10977_v45 = vadd.f32 %v10825_v47, %v10032_v55  ;;  %v10984_v57 = vadd.f32 %v10827_v33, %v10035_v56  ;;  %v8821_v47 = vld [vmem:[%s13650_s3 + $0x384] ss:$16 sps:$4 sm:$0xff]  }
 0x17b   :  { %v10859_v28 = vpop.f32.mrb[66].mxu1  ;;  %v10861_v58 = vpop.f32.mrb[66].mxu0  ;;  %v10995_v13 = vadd.f32 %v10842_v18, %v10050_v63  ;;  %v8816_v33 = vld [vmem:[%s13650_s3 + $0x388] ss:$16 sps:$4 sm:$0xff]   ;;  %v11006_v3 = vadd.f32 %v10844_v21, %v10053_v0  ;;  %2819 = vmatprep.subr.bf16.mxu0 %v8821_v47 }
 0x17c   :  { %v10873_v50 = vpop.f32.mrb[67].mxu1  ;;  %v10875_v36 = vpop.f32.mrb[67].mxu0  ;;  %13834 = vst [vmem:[#allocation62_spill] sm:$0xff] %v10977_v45  ;;  %13835 = vst [vmem:[#allocation63_spill] sm:$0xff] %v10984_v57  ;;  %2933 = vmatpush1.bf16.msra.mxu1 %v8816_v33  ;;  %2820 = vmatpush1.bf16.msra.mxu0 %v8819_v32  ;;  %v8825_v32 = vld [vmem:[%s13650_s3 + $0x3a0] ss:$16 sps:$4 sm:$0xff]  }
 0x181   :  { %v10921_v46 = vpop.f32.mrb[68].mxu1  ;;  %v10923_v11 = vpop.f32.mrb[68].mxu0 }
 0x182   :  { %v10938_v17 = vpop.f32.mrb[69].mxu1  ;;  %v10940_v39 = vpop.f32.mrb[69].mxu0 }
 0x183   :  { %v10955_v60 = vpop.f32.mrb[70].mxu1  ;;  %v10957_v10 = vpop.f32.mrb[70].mxu0 }
 0x184   :  { %13829 = vst [vmem:[#allocation57_spill] sm:$0xff] %v10955_v60  ;;  %13830 = vst [vmem:[#allocation58_spill] sm:$0xff] %v10957_v10  ;;  %v10965_v19 = vpop.f32.mrb[71].mxu1  ;;  %v10967_v1 = vpop.f32.mrb[71].mxu0  ;;  %v13839_v10 = vmax.f32 %v10797_v26, 0.0  ;;  %v2165_v26 = vmax.f32 %v11006_v3, 0.0 }
 0x185   :  { %13832 = vst [vmem:[#allocation60_spill] sm:$0xff] %v10965_v19  ;;  %13833 = vst [vmem:[#allocation61_spill] sm:$0xff] %v10967_v1  ;;  %v11013_v19 = vadd.f32 %v10859_v28, %v10032_v55  ;;  %v8824_v28 = vld [vmem:[%s13650_s3 + $0x3ac] ss:$16 sps:$4 sm:$0xff]  }
 0x186   :  { %2934 = vmatprep.subr.bf16.mxu1 %v8824_v28  ;;  %v13843_v28 = vmax.f32 %v10815_v54, 0.0 }
 0x189   :  { %v1920_v61 = vpop.f32.mrb[72].mxu0  ;;  %v2073_v52 = vpop.f32.mrb[72].mxu1 }
 0x18a   :  { %v1921_v7 = vadd.f32 %v1920_v61, %v10035_v56  ;;  %v2074_v18 = vadd.f32 %v2073_v52, %v10032_v55  ;;  %v1922_v23 = vpop.f32.mrb[73].mxu0  ;;  %v2075_v48 = vpop.f32.mrb[73].mxu1 }
 0x18b   :  { %v1923_v30 = vadd.f32 %v1922_v23, %v10053_v0  ;;  %v2076_v45 = vadd.f32 %v2075_v48, %v10050_v63  ;;  %v1924_v21 = vpop.f32.mrb[74].mxu0  ;;  %v2077_v40 = vpop.f32.mrb[74].mxu1 }
 0x18c   :  { %v2180_v61 = vmax.f32 %v1921_v7, 0.0  ;;  %v2182_v52 = vmax.f32 %v2074_v18, 0.0  ;;  %v1925_v22 = vadd.f32 %v1924_v21, %v10035_v56  ;;  %v2078_v25 = vadd.f32 %v2077_v40, %v10032_v55  ;;  %v1926_v47 = vpop.f32.mrb[75].mxu0  ;;  %v2079_v1 = vpop.f32.mrb[75].mxu1  ;;  %v8822_v7 = vld [vmem:[%s13650_s3 + $0x3a8] ss:$16 sps:$4 sm:$0xff]  }
 0x18d   :  { %v2181_v57 = vmax.f32 %v1923_v30, 0.0  ;;  %v2183_v23 = vmax.f32 %v2076_v45, 0.0  ;;  %v1927_v48 = vadd.f32 %v1926_v47, %v10053_v0  ;;  %v2080_v5 = vadd.f32 %v2079_v1, %v10050_v63  ;;  %v8827_v1 = vld [vmem:[%s13650_s3 + $0x3a4] ss:$16 sps:$4 sm:$0xff]   ;;  %2935 = vmatpush1.bf16.msra.mxu1 %v8822_v7 }
 0x18e   :  { %v13836_v40 = vmax.f32 %v10793_v41, 0.0  ;;  %v13837_v18 = vmax.f32 %v10785_v42, 0.0  ;;  %v2184_v45 = vmax.f32 %v1925_v22, 0.0  ;;  %v2186_v21 = vmax.f32 %v2078_v25, 0.0  ;;  %2821 = vmatprep.subr.bf16.mxu0 %v8827_v1 }
 0x18f   :  { %v13838_v47 = vmax.f32 %v10801_v53, 0.0  ;;  %v2231_v60 = vmax.f32 %v13839_v10, %v2183_v23  ;;  %v2185_v41 = vmax.f32 %v1927_v48, 0.0  ;;  %v2167_v42 = vmax.f32 %v10995_v13, 0.0  ;;  %2822 = vmatpush1.bf16.msra.mxu0 %v8825_v32 }
 0x190   :  { %v11032_v33 = vmax.f32 %v13836_v40, %v2180_v61  ;;  %v2230_v30 = vmax.f32 %v13837_v18, %v2182_v52  ;;  %v2187_v61 = vmax.f32 %v2080_v5, 0.0  ;;  %v11048_v22 = vadd.f32 %v10861_v58, %v10035_v56 }
 0x191   :  { %v11041_v27 = vmax.f32 %v13838_v47, %v2181_v57  ;;  %v13840_v52 = vmax.f32 %v10810_v20, 0.0  ;;  %v13841_v53 = vmax.f32 %v10806_v8, 0.0  ;;  %v13842_v10 = vmax.f32 %v10819_v15, 0.0  ;;  %v1930_v48 = vpop.f32.mrb[76].mxu0  ;;  %v2083_v58 = vpop.f32.mrb[76].mxu1 }
 0x192   :  { %v2235_v23 = vmax.f32 %v13843_v28, %v2187_v61  ;;  %v8372_v7 = vpack.i.bf16 %v2231_v60, %v2230_v30  ;;  %v11065_v20 = vadd.f32 %v10873_v50, %v10050_v63  ;;  %v11069_v8 = vadd.f32 %v10875_v36, %v10053_v0  ;;  %v1932_v18 = vpop.f32.mrb[77].mxu0 }
 0x193   :  { %v11052_v25 = vmax.f32 %v13840_v52, %v2184_v45  ;;  %v2234_v57 = vmax.f32 %v13841_v53, %v2186_v21  ;;  %v11059_v5 = vmax.f32 %v13842_v10, %v2185_v41  ;;  %v1931_v40 = vadd.f32 %v1930_v48, %v10035_v56  ;;  %v2085_v45 = vpop.f32.mrb[77].mxu1  ;;  %v1934_v50 = vpop.f32.mrb[78].mxu0  ;;  %v8830_v53 = vld [vmem:[%s13650_s3 + $0xc] ss:$16 sps:$4 sm:$0xff]  }
 0x194   :  { %v2084_v15 = vadd.f32 %v2083_v58, %v10032_v55  ;;  %v1933_v54 = vadd.f32 %v1932_v18, %v10053_v0  ;;  %v2086_v21 = vadd.f32 %v2085_v45, %v10050_v63  ;;  %v2087_v60 = vpop.f32.mrb[78].mxu1  ;;  %8373 = vrot.lane.b32.xlu0 %v8372_v7, %s9500_s2  ;;  %v1935_v41 = vadd.f32 %v1934_v50, %v10035_v56  ;;  %v1936_v61 = vpop.f32.mrb[79].mxu0  ;;  %v8833_v45 = vld [vmem:[%s13650_s3 + $0x4] ss:$16 sps:$4 sm:$0xff]  }
 0x195   :  { %v8382_v32 = vpack.i.bf16 %v11059_v5, %v11041_v27  ;;  %v8377_v36 = vpack.i.bf16 %v2235_v23, %v2234_v57  ;;  %v2188_v30 = vmax.f32 %v1931_v40, 0.0  ;;  %v2088_v47 = vadd.f32 %v2087_v60, %v10032_v55  ;;  %v2089_v52 = vpop.f32.mrb[79].mxu1  ;;  %3435 = vmatprep.subr.bf16.mxu1 %v8830_v53  ;;  %3322 = vmatprep.subr.bf16.mxu0 %v8833_v45 }
 0x196   :  { %v2190_v1 = vmax.f32 %v2084_v15, 0.0  ;;  %v2189_v10 = vmax.f32 %v1933_v54, 0.0  ;;  %v2191_v28 = vmax.f32 %v2086_v21, 0.0  ;;  %v1937_v48 = vadd.f32 %v1936_v61, %v10053_v0 }
 0x197   :  { %v2090_v58 = vadd.f32 %v2089_v52, %v10050_v63  ;;  %8383 = vrot.lane.b32.xlu1 %v8382_v32, %s9500_s2  ;;  %v13844_v57 = vmax.f32 %v10832_v62, 0.0  ;;  %v13845_v7 = vmax.f32 %v10823_v31, 0.0  ;;  %v2194_v15 = vmax.f32 %v2088_v47, 0.0 }
 0x198   :  { %v2192_v18 = vmax.f32 %v1935_v41, 0.0  ;;  %v13846_v54 = vmax.f32 %v10840_v6, 0.0  ;;  %v13847_v60 = vmax.f32 %v10836_v4, 0.0  ;;  %v2193_v62 = vmax.f32 %v1937_v48, 0.0  ;;  %8378 = vrot.lane.b32.xlu0 %v8377_v36, %s9500_s2 }
 0x199   :  { %v11088_v23 = vmax.f32 %v13844_v57, %v2188_v30  ;;  %v2238_v40 = vmax.f32 %v13845_v7, %v2190_v1  ;;  %v2195_v32 = vmax.f32 %v2090_v58, 0.0  ;;  %v2170_v31 = vmax.f32 %v11013_v19, 0.0 }
 0x19a   :  { %v11097_v21 = vmax.f32 %v13846_v54, %v2189_v10  ;;  %v2239_v50 = vmax.f32 %v13847_v60, %v2191_v28  ;;  %v2168_v30 = vmax.f32 %v11048_v22, 0.0  ;;  %v13848_v1 = vmax.f32 %v10849_v29, 0.0  ;;  %v1940_v10 = vpop.f32.mrb[80].mxu0  ;;  %v2093_v28 = vpop.f32.mrb[80].mxu1  ;;  %v13881_v22 = vld [vmem:[#allocation23_spill] sm:$0xff] }
 0x19b   :  { %v13849_v41 = vmax.f32 %v10853_v49, 0.0  ;;  %v2171_v6 = vmax.f32 %v11065_v20, 0.0  ;;  %v13850_v4 = vmax.f32 %v10867_v2, 0.0  ;;  %v13851_v36 = vmax.f32 %v10857_v34, 0.0  ;;  %v1942_v57 = vpop.f32.mrb[81].mxu0  ;;  %v2095_v7 = vpop.f32.mrb[81].mxu1 }
 0x19c   :  { %v2242_v47 = vmax.f32 %v13848_v1, %v2194_v15  ;;  %v8387_v48 = vpack.i.bf16 %v2239_v50, %v2238_v40  ;;  %v11119_v29 = vadd.f32 %v10921_v46, %v10032_v55  ;;  %v11123_v49 = vadd.f32 %v10923_v11, %v10035_v56  ;;  %v2097_v40 = vpop.f32.mrb[82].mxu1  ;;  %v13883_v20 = vld [vmem:[#allocation24_spill] sm:$0xff] }
 0x19d   :  { %v11108_v61 = vmax.f32 %v13849_v41, %v2192_v18  ;;  %v11113_v52 = vmax.f32 %v13850_v4, %v2193_v62  ;;  %v2243_v53 = vmax.f32 %v13851_v36, %v2195_v32  ;;  %v1941_v58 = vadd.f32 %v1940_v10, %v10035_v56  ;;  %v1944_v18 = vpop.f32.mrb[82].mxu0  ;;  %v2099_v32 = vpop.f32.mrb[83].mxu1 }
 0x19e   :  { %v2094_v2 = vadd.f32 %v2093_v28, %v10032_v55  ;;  %v1943_v34 = vadd.f32 %v1942_v57, %v10053_v0  ;;  %v2096_v15 = vadd.f32 %v2095_v7, %v10050_v63  ;;  %8388 = vrot.lane.b32.xlu1 %v8387_v48, %s9500_s2  ;;  %v1945_v60 = vadd.f32 %v1944_v18, %v10035_v56  ;;  %v1946_v62 = vpop.f32.mrb[83].mxu0 }
 0x19f   :  { %v8392_v46 = vpack.i.bf16 %v2243_v53, %v2242_v47  ;;  %v8397_v45 = vpack.i.bf16 %v11113_v52, %v11097_v21  ;;  %v2196_v11 = vmax.f32 %v1941_v58, 0.0  ;;  %v2098_v50 = vadd.f32 %v2097_v40, %v10032_v55 }
 0x1a0   :  { %v2198_v54 = vmax.f32 %v2094_v2, 0.0  ;;  %v2197_v1 = vmax.f32 %v1943_v34, 0.0  ;;  %v2199_v41 = vmax.f32 %v2096_v15, 0.0  ;;  %v1947_v4 = vadd.f32 %v1946_v62, %v10053_v0 }
 0x1a1   :  { %v2100_v36 = vadd.f32 %v2099_v32, %v10050_v63  ;;  %8393 = vrot.lane.b32.xlu0 %v8392_v46, %s9500_s2  ;;  %v13852_v47 = vmax.f32 %v10882_v44, 0.0  ;;  %v13853_v10 = vmax.f32 %v10871_v9, 0.0  ;;  %v2200_v48 = vmax.f32 %v1945_v60, 0.0  ;;  %v1950_v62 = vpop.f32.mrb[84].mxu0  ;;  %v2103_v32 = vpop.f32.mrb[84].mxu1 }
 0x1a2   :  { %v2202_v58 = vmax.f32 %v2098_v50, 0.0  ;;  %v13854_v2 = vmax.f32 %v10896_v51, 0.0  ;;  %v13855_v7 = vmax.f32 %v10889_v43, 0.0  ;;  %v2201_v15 = vmax.f32 %v1947_v4, 0.0  ;;  %8398 = vrot.lane.b32.xlu1 %v8397_v45, %s9500_s2  ;;  %v1952_v4 = vpop.f32.mrb[85].mxu0 }
 0x1a3   :  { %v11139_v53 = vmax.f32 %v13852_v47, %v2196_v11  ;;  %v2246_v28 = vmax.f32 %v13853_v10, %v2198_v54  ;;  %v2203_v18 = vmax.f32 %v2100_v36, 0.0  ;;  %v2169_v44 = vmax.f32 %v11069_v8, 0.0  ;;  %v1954_v10 = vpop.f32.mrb[86].mxu0 }
 0x1a4   :  { %v11145_v57 = vmax.f32 %v13854_v2, %v2197_v1  ;;  %v2247_v34 = vmax.f32 %v13855_v7, %v2199_v41  ;;  %v11153_v40 = vadd.f32 %v10938_v17, %v10050_v63  ;;  %v13856_v9 = vmax.f32 %v10906_v14, 0.0 }
 0x1a5   :  { %v13857_v51 = vmax.f32 %v10902_v38, 0.0  ;;  %v2174_v43 = vmax.f32 %v11119_v29, 0.0  ;;  %v13858_v54 = vmax.f32 %v10915_v37, 0.0  ;;  %v13859_v45 = vmax.f32 %v10911_v16, 0.0  ;;  %v2105_v37 = vpop.f32.mrb[85].mxu1 }
 0x1a6   :  { %v11157_v46 = vmax.f32 %v13856_v9, %v2200_v48  ;;  %v8402_v17 = vpack.i.bf16 %v2247_v34, %v2246_v28  ;;  %v2172_v1 = vmax.f32 %v11123_v49, 0.0  ;;  %v11171_v14 = vadd.f32 %v10940_v39, %v10053_v0  ;;  %v2107_v47 = vpop.f32.mrb[86].mxu1  ;;  %v1956_v34 = vpop.f32.mrb[87].mxu0 }
 0x1a7   :  { %v2250_v11 = vmax.f32 %v13857_v51, %v2202_v58  ;;  %v11164_v60 = vmax.f32 %v13858_v54, %v2201_v15  ;;  %v2251_v50 = vmax.f32 %v13859_v45, %v2203_v18  ;;  %v1951_v38 = vadd.f32 %v1950_v62, %v10035_v56  ;;  %v2109_v15 = vpop.f32.mrb[87].mxu1 }
 0x1a8   :  { %v2104_v41 = vadd.f32 %v2103_v32, %v10032_v55  ;;  %v1953_v36 = vadd.f32 %v1952_v4, %v10053_v0  ;;  %v2106_v16 = vadd.f32 %v2105_v37, %v10050_v63  ;;  %8403 = vrot.lane.b32.xlu0 %v8402_v17, %s9500_s2  ;;  %v2108_v2 = vadd.f32 %v2107_v47, %v10032_v55 }
 0x1a9   :  { %v8407_v28 = vpack.i.bf16 %v2251_v50, %v2250_v11  ;;  %v8412_v48 = vpack.i.bf16 %v11164_v60, %v11145_v57  ;;  %v2204_v39 = vmax.f32 %v1951_v38, 0.0  ;;  %v1955_v7 = vadd.f32 %v1954_v10, %v10035_v56 }
 0x1aa   :  { %v2206_v58 = vmax.f32 %v2104_v41, 0.0  ;;  %v2205_v18 = vmax.f32 %v1953_v36, 0.0  ;;  %v2207_v9 = vmax.f32 %v2106_v16, 0.0  ;;  %v1957_v51 = vadd.f32 %v1956_v34, %v10053_v0  ;;  %v13870_v34 = vld [vmem:[#allocation59_spill] sm:$0xff] }
 0x1ab   :  { %v2110_v54 = vadd.f32 %v2109_v15, %v10050_v63  ;;  %8408 = vrot.lane.b32.xlu1 %v8407_v28, %s9500_s2  ;;  %v13860_v11 = vmax.f32 %v10928_v24, 0.0  ;;  %v13861_v50 = vmax.f32 %v10919_v59, 0.0  ;;  %v2210_v32 = vmax.f32 %v2108_v2, 0.0  ;;  %v13864_v24 = vld [vmem:[#allocation57_spill] sm:$0xff]  ;;  %v13865_v59 = vld [vmem:[#allocation58_spill] sm:$0xff] }
 0x1ac   :  { %v2208_v17 = vmax.f32 %v1955_v7, 0.0  ;;  %v13862_v38 = vmax.f32 %v10936_v12, 0.0  ;;  %v13863_v4 = vmax.f32 %v10932_v35, 0.0  ;;  %v2209_v36 = vmax.f32 %v1957_v51, 0.0  ;;  %8413 = vrot.lane.b32.xlu0 %v8412_v48, %s9500_s2  ;;  %v13866_v28 = vld [vmem:[#allocation54_spill] sm:$0xff] }
 0x1ad   :  { %v11187_v45 = vmax.f32 %v13860_v11, %v2204_v39  ;;  %v2254_v62 = vmax.f32 %v13861_v50, %v2206_v58  ;;  %v2211_v16 = vmax.f32 %v2110_v54, 0.0  ;;  %v11200_v47 = vadd.f32 %v13864_v24, %v10032_v55  ;;  %v13868_v58 = vld [vmem:[#allocation55_spill] sm:$0xff]  ;;  %v1960_v54 = vpop.f32.mrb[88].mxu0  ;;  %v2113_v11 = vpop.f32.mrb[88].mxu1 }
 0x1ae   :  { %v11193_v41 = vmax.f32 %v13862_v38, %v2205_v18  ;;  %v2255_v37 = vmax.f32 %v13863_v4, %v2207_v9  ;;  %v11204_v10 = vadd.f32 %v13865_v59, %v10035_v56  ;;  %v13867_v39 = vmax.f32 %v13866_v28, 0.0  ;;  %v13872_v18 = vld [vmem:[#allocation56_spill] sm:$0xff]  ;;  %v2115_v28 = vpop.f32.mrb[89].mxu1 }
 0x1af   :  { %v13869_v2 = vmax.f32 %v13868_v58, 0.0  ;;  %v13871_v15 = vmax.f32 %v13870_v34, 0.0  ;;  %v13873_v9 = vmax.f32 %v13872_v18, 0.0  ;;  %v13874_v38 = vld [vmem:[#allocation60_spill] sm:$0xff]  ;;  %v1961_v24 = vadd.f32 %v1960_v54, %v10035_v56 }
 0x1b0   :  { %v2258_v12 = vmax.f32 %v13867_v39, %v2210_v32  ;;  %v8417_v50 = vpack.i.bf16 %v2255_v37, %v2254_v62  ;;  %v11221_v4 = vadd.f32 %v13874_v38, %v10050_v63  ;;  %v13875_v32 = vld [vmem:[#allocation61_spill] sm:$0xff]  ;;  %v2114_v59 = vadd.f32 %v2113_v11, %v10032_v55  ;;  %v2117_v62 = vpop.f32.mrb[90].mxu1 }
 0x1b1   :  { %v11210_v7 = vmax.f32 %v13869_v2, %v2208_v17  ;;  %v11215_v48 = vmax.f32 %v13871_v15, %v2209_v36  ;;  %v2259_v51 = vmax.f32 %v13873_v9, %v2211_v16  ;;  %v11225_v17 = vadd.f32 %v13875_v32, %v10053_v0  ;;  %v1962_v36 = vpop.f32.mrb[89].mxu0  ;;  %v2119_v11 = vpop.f32.mrb[91].mxu1 }
 0x1b2   :  { %v1963_v39 = vadd.f32 %v1962_v36, %v10053_v0  ;;  %v2116_v16 = vadd.f32 %v2115_v28, %v10050_v63  ;;  %v1964_v58 = vpop.f32.mrb[90].mxu0  ;;  %8418 = vrot.lane.b32.xlu1 %v8417_v50, %s9500_s2  ;;  %v2212_v34 = vmax.f32 %v1961_v24, 0.0  ;;  %v2214_v15 = vmax.f32 %v2114_v59, 0.0  ;;  %v13878_v24 = vld [vmem:[#allocation62_spill] sm:$0xff] }
 0x1b3   :  { %v8422_v37 = vpack.i.bf16 %v2259_v51, %v2258_v12  ;;  %v8427_v2 = vpack.i.bf16 %v11215_v48, %v11193_v41  ;;  %v1965_v18 = vadd.f32 %v1964_v58, %v10035_v56  ;;  %v2118_v9 = vadd.f32 %v2117_v62, %v10032_v55  ;;  %v1966_v54 = vpop.f32.mrb[91].mxu0  ;;  %v13876_v12 = vld [vmem:[#allocation63_spill] sm:$0xff] }
 0x1b4   :  { %v2213_v38 = vmax.f32 %v1963_v39, 0.0  ;;  %v2215_v32 = vmax.f32 %v2116_v16, 0.0  ;;  %v1967_v36 = vadd.f32 %v1966_v54, %v10053_v0  ;;  %v2120_v28 = vadd.f32 %v2119_v11, %v10050_v63 }
 0x1b5   :  { %8423 = vrot.lane.b32.xlu0 %v8422_v37, %s9500_s2  ;;  %v13877_v51 = vmax.f32 %v13876_v12, 0.0  ;;  %v13879_v59 = vmax.f32 %v13878_v24, 0.0  ;;  %v2216_v58 = vmax.f32 %v1965_v18, 0.0  ;;  %v2218_v62 = vmax.f32 %v2118_v9, 0.0 }
 0x1b6   :  { %v11249_v39 = vmax.f32 %v2165_v26, %v2213_v38  ;;  %v11253_v16 = vmax.f32 %v2167_v42, %v2215_v32  ;;  %v2217_v54 = vmax.f32 %v1967_v36, 0.0  ;;  %v2219_v37 = vmax.f32 %v2120_v28, 0.0  ;;  %8428 = vrot.lane.b32.xlu1 %v8427_v2, %s9500_s2  ;;  %v2123_v2 = vpop.f32.mrb[92].mxu1 }
 0x1b7   :  { %v11241_v50 = vmax.f32 %v13877_v51, %v2212_v34  ;;  %v11245_v35 = vmax.f32 %v13879_v59, %v2214_v15  ;;  %v2173_v34 = vmax.f32 %v11171_v14, 0.0  ;;  %v2178_v11 = vmax.f32 %v11200_v47, 0.0  ;;  %v1970_v14 = vpop.f32.mrb[92].mxu0  ;;  %v13880_v47 = vld [vmem:[#allocation25_spill] sm:$0xff]  ;;  %v2125_v18 = vpop.f32.mrb[93].mxu1 }
 0x1b8   :  { %v11260_v15 = vmax.f32 %v2168_v30, %v2216_v58  ;;  %v11264_v3 = vmax.f32 %v2170_v31, %v2218_v62  ;;  %v2176_v13 = vmax.f32 %v11204_v10, 0.0  ;;  %v11269_v42 = vmax.f32 %v2169_v44, %v2217_v54  ;;  %v1972_v44 = vpop.f32.mrb[93].mxu0  ;;  %v2127_v12 = vpop.f32.mrb[94].mxu1 }
 0x1b9   :  { %v2267_v26 = vmax.f32 %v2171_v6, %v2219_v37  ;;  %v13882_v30 = vpack.i.bf16 %v13880_v47, %v13881_v22  ;;  %v8507_v19 = vpack.i.bf16 %v11253_v16, %v11245_v35  ;;  %v2179_v31 = vmax.f32 %v11221_v4, 0.0  ;;  %v13884_v6 = vld [vmem:[#allocation28_spill] sm:$0xff]  ;;  %v1974_v28 = vpop.f32.mrb[94].mxu0  ;;  %v13885_v35 = vld [vmem:[#allocation29_spill] sm:$0xff]  ;;  %v13886_v4 = vld [vmem:[#allocation27_spill] sm:$0xff]  ;;  %v2129_v54 = vpop.f32.mrb[95].mxu1 }
 0x1ba   :  { %v1971_v10 = vadd.f32 %v1970_v14, %v10035_v56  ;;  %v2124_v8 = vadd.f32 %v2123_v2, %v10032_v55  ;;  %v8442_v9 = vpack.i.bf16 %v13884_v6, %v13883_v20  ;;  %v2177_v38 = vmax.f32 %v11225_v17, 0.0  ;;  %v1976_v17 = vpop.f32.mrb[95].mxu0 }
 0x1bb   :  { %8433 = vrot.lane.b32.xlu0 %v13882_v30, %s9500_s2  ;;  %v1973_v32 = vadd.f32 %v1972_v44, %v10053_v0  ;;  %v2126_v36 = vadd.f32 %v2125_v18, %v10050_v63  ;;  %v13887_v51 = vpack.i.bf16 %v13885_v35, %v13886_v4  ;;  %v8512_v24 = vpack.i.bf16 %v2267_v26, %v11264_v3  ;;  %v13890_v44 = vld [vmem:[#allocation31_spill] sm:$0xff]  ;;  %v13897_v4 = vld [vmem:[#allocation41_spill] sm:$0xff] }
 0x1bc   :  { %v2220_v59 = vmax.f32 %v1971_v10, 0.0  ;;  %v2222_v58 = vmax.f32 %v2124_v8, 0.0  ;;  %v1975_v62 = vadd.f32 %v1974_v28, %v10035_v56  ;;  %v2128_v16 = vadd.f32 %v2127_v12, %v10032_v55 }
 0x1bd   :  { %8438 = vrot.lane.b32.xlu1 %v13887_v51, %s9500_s2  ;;  %v2221_v37 = vmax.f32 %v1973_v32, 0.0  ;;  %v2223_v14 = vmax.f32 %v2126_v36, 0.0  ;;  %v1977_v2 = vadd.f32 %v1976_v17, %v10053_v0  ;;  %v2130_v47 = vadd.f32 %v2129_v54, %v10050_v63  ;;  %v13889_v63 = vld [vmem:[#allocation33_spill] sm:$0xff]  ;;  %v13896_v36 = vld [vmem:[#allocation36_spill] sm:$0xff] }
 0x1be   :  { %v11299_v22 = vmax.f32 %v2172_v1, %v2220_v59  ;;  %v2270_v3 = vmax.f32 %v2174_v43, %v2222_v58  ;;  %v2224_v56 = vmax.f32 %v1975_v62, 0.0  ;;  %v2226_v26 = vmax.f32 %v2128_v16, 0.0  ;;  %v13892_v43 = vld [vmem:[#allocation37_spill] sm:$0xff]  ;;  %v13903_v59 = vld [vmem:[#allocation40_spill] sm:$0xff]  ;;  %v13904_v58 = vld [vmem:[#allocation11_spill] sm:$0xff] }
 0x1bf   :  { %8443 = vrot.lane.b32.xlu0 %v8442_v9, %s9500_s2  ;;  %v11303_v55 = vmax.f32 %v2173_v34, %v2221_v37  ;;  %v13888_v30 = vmax.f32 %v11153_v40, 0.0  ;;  %v2225_v8 = vmax.f32 %v1977_v2, 0.0  ;;  %v2227_v0 = vmax.f32 %v2130_v47, 0.0  ;;  %v13893_v34 = vld [vmem:[#allocation35_spill] sm:$0xff]  ;;  %v13895_v40 = vld [vmem:[#allocation32_spill] sm:$0xff]  ;;  %v13906_v17 = vld [vmem:[#allocation9_spill] sm:$0xff] }
 0x1c0   :  { %v13891_v18 = vpack.i.bf16 %v13889_v63, %v13890_v44  ;;  %v11311_v49 = vmax.f32 %v2176_v13, %v2224_v56  ;;  %v2274_v1 = vmax.f32 %v2178_v11, %v2226_v26  ;;  %v13894_v32 = vpack.i.bf16 %v13892_v43, %v13893_v34  ;;  %v13898_v13 = vld [vmem:[#allocation39_spill] sm:$0xff]  ;;  %v13900_v11 = vld [vmem:[#allocation10_spill] sm:$0xff]  ;;  %v13905_v16 = vld [vmem:[#allocation12_spill] sm:$0xff] }
 0x1c1   :  { %v2271_v10 = vmax.f32 %v13888_v30, %v2223_v14  ;;  %v11313_v9 = vmax.f32 %v2177_v38, %v2225_v8  ;;  %v2275_v29 = vmax.f32 %v2179_v31, %v2227_v0  ;;  %v8457_v28 = vpack.i.bf16 %v13896_v36, %v13895_v40  ;;  %v13901_v31 = vld [vmem:[#allocation6_spill] sm:$0xff]  ;;  %v13908_v37 = vld [vmem:[#allocation45_spill] sm:$0xff]  ;;  %v13909_v14 = vld [vmem:[#allocation43_spill] sm:$0xff] }
 0x1c2   :  { %8448 = vrot.lane.b32.xlu1 %v13891_v18, %s9500_s2  ;;  %v13899_v51 = vpack.i.bf16 %v13897_v4, %v13898_v13  ;;  %v13902_v38 = vpack.i.bf16 %v13900_v11, %v13901_v31  ;;  %v8472_v62 = vpack.i.bf16 %v13904_v58, %v13903_v59  ;;  %v13907_v54 = vpack.i.bf16 %v13905_v16, %v13906_v17  ;;  %v13911_v47 = vld [vmem:[#allocation13_spill] sm:$0xff]  ;;  %v13914_v30 = vld [vmem:[#allocation15_spill] sm:$0xff]  ;;  %v13919_v44 = vld [vmem:[#allocation16_spill] sm:$0xff] }
 0x1c3   :  { %8453 = vrot.lane.b32.xlu0 %v13894_v32, %s9500_s2  ;;  %v8537_v12 = vpack.i.bf16 %v2271_v10, %v2270_v3  ;;  %v8542_v35 = vpack.i.bf16 %v2275_v29, %v2274_v1  ;;  %v13910_v2 = vpack.i.bf16 %v13908_v37, %v13909_v14  ;;  %v13912_v3 = vld [vmem:[#allocation44_spill] sm:$0xff]  ;;  %v13913_v26 = vld [vmem:[#allocation17_spill] sm:$0xff]  ;;  %v13917_v0 = vld [vmem:[#allocation19_spill] sm:$0xff]  ;;  %v8517_v29 = vpack.i.bf16 %v11269_v42, %v11249_v39 }
 0x1c4   :  { %v8487_v56 = vpack.i.bf16 %v13912_v3, %v13911_v47  ;;  %v13915_v10 = vpack.i.bf16 %v13913_v26, %v13914_v30  ;;  %v13916_v8 = vld [vmem:[#allocation21_spill] sm:$0xff]  ;;  %v13920_v18 = vld [vmem:[#allocation20_spill] sm:$0xff]  ;;  %v13922_v34 = vld [vmem:[#allocation47_spill] sm:$0xff] }
 0x1c5   :  { %v13918_v63 = vpack.i.bf16 %v13916_v8, %v13917_v0  ;;  %v8502_v1 = vpack.i.bf16 %v13920_v18, %v13919_v44  ;;  %v13921_v43 = vld [vmem:[#allocation49_spill] sm:$0xff]  ;;  %v13925_v4 = vld [vmem:[#allocation51_spill] sm:$0xff]  ;;  %v13928_v11 = vld [vmem:[#allocation52_spill] sm:$0xff] }
 0x1c6   :  { %8458 = vrot.lane.b32.xlu1 %v8457_v28, %s9500_s2  ;;  %v13923_v32 = vpack.i.bf16 %v13921_v43, %v13922_v34  ;;  %v13924_v28 = vld [vmem:[#allocation53_spill] sm:$0xff] }
 0x1c7   :  { %8463 = vrot.lane.b32.xlu0 %v13899_v51, %s9500_s2  ;;  %v13926_v13 = vpack.i.bf16 %v13924_v28, %v13925_v4  ;;  %v13927_v51 = vld [vmem:[#allocation48_spill] sm:$0xff]  ;;  %v8828_v28 = vld [vmem:[%s13650_s3 + $0x8] ss:$16 sps:$4 sm:$0xff]   ;;  %v8836_v4 = vld [vmem:[%s13650_s3 + $0x2c] ss:$16 sps:$4 sm:$0xff]  }
 0x1ca   :  { %8468 = vrot.lane.b32.xlu1 %v13902_v38, %s9500_s2 }
 0x1cb   :  { %8473 = vrot.lane.b32.xlu0 %v8472_v62, %s9500_s2 }
 0x1ce   :  { %8478 = vrot.lane.b32.xlu1 %v13907_v54, %s9500_s2 }
 0x1cf   :  { %8483 = vrot.lane.b32.xlu0 %v13910_v2, %s9500_s2 }
 0x1d2   :  { %8488 = vrot.lane.b32.xlu1 %v8487_v56, %s9500_s2 }
 0x1d3   :  { %8493 = vrot.lane.b32.xlu0 %v13915_v10, %s9500_s2 }
 0x1d6   :  { %8498 = vrot.lane.b32.xlu1 %v13918_v63, %s9500_s2 }
 0x1d7   :  { %8503 = vrot.lane.b32.xlu0 %v8502_v1, %s9500_s2 }
 0x1da   :  { %8508 = vrot.lane.b32.xlu1 %v8507_v19, %s9500_s2  ;;  %v8532_v19 = vpack.i.bf16 %v13928_v11, %v13927_v51 }
 0x1db   :  { %8513 = vrot.lane.b32.xlu0 %v8512_v24, %s9500_s2  ;;  %v8547_v24 = vpack.i.bf16 %v11313_v9, %v11303_v55 }
 0x1de   :  { %8518 = vrot.lane.b32.xlu1 %v8517_v29, %s9500_s2 }
 0x1df   :  { %8523 = vrot.lane.b32.xlu0 %v13923_v32, %s9500_s2 }
 0x1e2   :  { %8528 = vrot.lane.b32.xlu1 %v13926_v13, %s9500_s2  ;;  %v8839_v13 = vld [vmem:[%s13650_s3 + $0x24] ss:$16 sps:$4 sm:$0xff]  }
 0x1e3   :  { %8533 = vrot.lane.b32.xlu0 %v8532_v19, %s9500_s2 }
 0x1e6   :  { %8538 = vrot.lane.b32.xlu1 %v8537_v12, %s9500_s2 }
 0x1e7   :  { %8543 = vrot.lane.b32.xlu0 %v8542_v35, %s9500_s2 }
 0x1ea   :  { %8548 = vrot.lane.b32.xlu1 %v8547_v24, %s9500_s2 }
 0x206   :  { %v8374_v31 = vpop.permute.xlu0 %8373 }
 0x207   :  { %v8376_v38 = vunpack.i.h.bf16 %v8374_v31  ;;  %v8375_v62 = vunpack.i.l.bf16 %v8374_v31 }
 0x209   :  { %v8384_v16 = vpop.permute.xlu1 %8383  ;;  %v2385_v54 = vsel %vm1597_vm2, %v8375_v62, %v8376_v38 }
 0x20a   :  { %v8385_v17 = vunpack.i.l.bf16 %v8384_v16  ;;  %v8379_v37 = vpop.permute.xlu0 %8378  ;;  %v8386_v14 = vunpack.i.h.bf16 %v8384_v16  ;;  %v2433_v30 = vmax.f32 %v11041_v27, %v2385_v54  ;;  %v8831_v27 = vld [vmem:[%s13650_s3] ss:$16 sps:$4 sm:$0xff]  }
 0x20b   :  { %v8381_v12 = vunpack.i.h.bf16 %v8379_v37  ;;  %v8380_v56 = vunpack.i.l.bf16 %v8379_v37  ;;  %v8834_v37 = vld [vmem:[%s13650_s3 + $0x28] ss:$16 sps:$4 sm:$0xff]  }
 0x20c   :  { %v2384_v2 = vsel %vm1597_vm2, %v8385_v17, %v8375_v62 }
 0x20d   :  { %v2386_v35 = vsel %vm1597_vm2, %v8386_v14, %v8380_v56  ;;  %v2387_v26 = vsel %vm1597_vm2, %v8380_v56, %v8381_v12  ;;  %v2432_v10 = vmax.f32 %v11032_v33, %v2384_v2  ;;  %v8837_v14 = vld [vmem:[%s13650_s3 + $0x20] ss:$16 sps:$4 sm:$0xff]   ;;  %v8842_v56 = vld [vmem:[%s13650_s3 + $0x4c] ss:$16 sps:$4 sm:$0xff]  }
 0x20e   :  { %v2434_v8 = vmax.f32 %v11052_v25, %v2386_v35  ;;  %v2435_v0 = vmax.f32 %v11059_v5, %v2387_v26  ;;  %v8845_v35 = vld [vmem:[%s13650_s3 + $0x44] ss:$16 sps:$4 sm:$0xff]  }
 0x210   :  { %v8389_v63 = vpop.permute.xlu1 %8388  ;;  %v11384_v43 = vpack.c.bf16 %v2434_v8, %v2432_v10  ;;  %v11386_v32 = vpack.c.bf16 %v2435_v0, %v2433_v30 }
 0x211   :  { %v8391_v1 = vunpack.i.h.bf16 %v8389_v63  ;;  %v8390_v29 = vunpack.i.l.bf16 %v8389_v63  ;;  %v8840_v63 = vld [vmem:[%s13650_s3 + $0x48] ss:$16 sps:$4 sm:$0xff]  }
 0x212   :  { %7425 = vmatprep.mubr.msk.bf16.mxu0 %vm2768_vm3, %v11386_v32  ;;  %7433 = vmatprep.mubr.msk.bf16.mxu1 %vm2768_vm3, %v11386_v32 }
 0x213   :  { %v8394_v34 = vpop.permute.xlu0 %8393  ;;  %v2389_v33 = vsel %vm1597_vm2, %v8390_v29, %v8391_v1  ;;  %2826 = vmatmul.mubr.bf16.vlgmr.msra.gmra.mrb[96].mxu0 %v11384_v43  ;;  %2939 = vmatmul.mubr.bf16.vlgmr.msra.gmra.mrb[96].mxu1 %v11384_v43  ;;  %v8843_v1 = vld [vmem:[%s13650_s3 + $0x40] ss:$16 sps:$4 sm:$0xff]  }
 0x214   :  { %v8396_v25 = vunpack.i.h.bf16 %v8394_v34  ;;  %v8395_v5 = vunpack.i.l.bf16 %v8394_v34  ;;  %v8399_v19 = vpop.permute.xlu1 %8398  ;;  %v2437_v62 = vmax.f32 %v11097_v21, %v2389_v33  ;;  %3436 = vmatpush1.bf16.msra.mxu1 %v8828_v28  ;;  %3323 = vmatpush1.bf16.msra.mxu0 %v8831_v27  ;;  %v8848_v34 = vld [vmem:[%s13650_s3 + $0x6c] ss:$16 sps:$4 sm:$0xff]   ;;  %v8851_v28 = vld [vmem:[%s13650_s3 + $0x64] ss:$16 sps:$4 sm:$0xff]  }
 0x215   :  { %v8401_v31 = vunpack.i.h.bf16 %v8399_v19  ;;  %v8400_v38 = vunpack.i.l.bf16 %v8399_v19  ;;  %3437 = vmatprep.subr.bf16.mxu1 %v8836_v4  ;;  %3324 = vmatprep.subr.bf16.mxu0 %v8839_v13 }
 0x216   :  { %v2391_v24 = vsel %vm1597_vm2, %v8395_v5, %v8396_v25 }
 0x217   :  { %v2439_v16 = vmax.f32 %v11113_v52, %v2391_v24  ;;  %v2390_v17 = vsel %vm1597_vm2, %v8401_v31, %v8395_v5  ;;  %v2388_v54 = vsel %vm1597_vm2, %v8400_v38, %v8390_v29  ;;  %v8846_v24 = vld [vmem:[%s13650_s3 + $0x68] ss:$16 sps:$4 sm:$0xff]   ;;  %v8849_v31 = vld [vmem:[%s13650_s3 + $0x60] ss:$16 sps:$4 sm:$0xff]  }
 0x218   :  { %v2438_v21 = vmax.f32 %v11108_v61, %v2390_v17  ;;  %v2436_v52 = vmax.f32 %v11088_v23, %v2388_v54  ;;  %3438 = vmatpush1.bf16.msra.mxu1 %v8834_v37  ;;  %3325 = vmatpush1.bf16.msra.mxu0 %v8837_v14  ;;  %v8857_v17 = vld [vmem:[%s13650_s3 + $0x84] ss:$16 sps:$4 sm:$0xff]  }
 0x219   :  { %v11418_v2 = vpack.c.bf16 %v2439_v16, %v2437_v62  ;;  %3439 = vmatprep.subr.bf16.mxu1 %v8842_v56  ;;  %3326 = vmatprep.subr.bf16.mxu0 %v8845_v35  ;;  %v8854_v16 = vld [vmem:[%s13650_s3 + $0x8c] ss:$16 sps:$4 sm:$0xff]   ;;  %v8855_v56 = vld [vmem:[%s13650_s3 + $0x80] ss:$16 sps:$4 sm:$0xff]  }
 0x21a   :  { %v8404_v12 = vpop.permute.xlu0 %8403  ;;  %v11428_v10 = vpack.c.bf16 %v2438_v21, %v2436_v52 }
 0x21b   :  { %v8406_v26 = vunpack.i.h.bf16 %v8404_v12  ;;  %v8405_v30 = vunpack.i.l.bf16 %v8404_v12  ;;  %7426 = vmatprep.mubr.msk.bf16.mxu0 %vm2768_vm3, %v11418_v2  ;;  %7434 = vmatprep.mubr.msk.bf16.mxu1 %vm2768_vm3, %v11418_v2  ;;  %v8852_v12 = vld [vmem:[%s13650_s3 + $0x88] ss:$16 sps:$4 sm:$0xff]  }
 0x21c   :  { %2836 = vmatmul.mubr.bf16.gmra.mrb[100].mxu0 %v11428_v10  ;;  %2949 = vmatmul.mubr.bf16.gmra.mrb[100].mxu1 %v11428_v10 }
 0x21d   :  { %v8409_v8 = vpop.permute.xlu1 %8408  ;;  %v2393_v23 = vsel %vm1597_vm2, %v8405_v30, %v8406_v26  ;;  %3440 = vmatpush1.bf16.msra.mxu1 %v8840_v63  ;;  %3327 = vmatpush1.bf16.msra.mxu0 %v8843_v1  ;;  %v8860_v26 = vld [vmem:[%s13650_s3 + $0xac] ss:$16 sps:$4 sm:$0xff]  }
 0x21e   :  { %v8411_v61 = vunpack.i.h.bf16 %v8409_v8  ;;  %v8410_v0 = vunpack.i.l.bf16 %v8409_v8  ;;  %v8414_v29 = vpop.permute.xlu0 %8413  ;;  %v2441_v5 = vmax.f32 %v11145_v57, %v2393_v23  ;;  %3441 = vmatprep.subr.bf16.mxu1 %v8848_v34  ;;  %3328 = vmatprep.subr.bf16.mxu0 %v8851_v28 }
 0x21f   :  { %v8416_v33 = vunpack.i.h.bf16 %v8414_v29  ;;  %v8415_v25 = vunpack.i.l.bf16 %v8414_v29 }
 0x220   :  { %v2395_v27 = vsel %vm1597_vm2, %v8410_v0, %v8411_v61 }
 0x221   :  { %v2443_v4 = vmax.f32 %v11164_v60, %v2395_v27  ;;  %v2392_v13 = vsel %vm1597_vm2, %v8415_v25, %v8405_v30  ;;  %v2394_v19 = vsel %vm1597_vm2, %v8416_v33, %v8410_v0  ;;  %3442 = vmatpush1.bf16.msra.mxu1 %v8846_v24  ;;  %3329 = vmatpush1.bf16.msra.mxu0 %v8849_v31  ;;  %v8863_v30 = vld [vmem:[%s13650_s3 + $0xa4] ss:$16 sps:$4 sm:$0xff]   ;;  %v8858_v33 = vld [vmem:[%s13650_s3 + $0xa8] ss:$16 sps:$4 sm:$0xff]   ;;  %v8861_v25 = vld [vmem:[%s13650_s3 + $0xa0] ss:$16 sps:$4 sm:$0xff]  }
 0x222   :  { %v2440_v57 = vmax.f32 %v11139_v53, %v2392_v13  ;;  %v2442_v60 = vmax.f32 %v11157_v46, %v2394_v19  ;;  %3443 = vmatprep.subr.bf16.mxu1 %v8854_v16  ;;  %3330 = vmatprep.subr.bf16.mxu0 %v8857_v17  ;;  %v8866_v13 = vld [vmem:[%s13650_s3 + $0xcc] ss:$16 sps:$4 sm:$0xff]   ;;  %v8869_v19 = vld [vmem:[%s13650_s3 + $0xc4] ss:$16 sps:$4 sm:$0xff]   ;;  %v8864_v17 = vld [vmem:[%s13650_s3 + $0xc8] ss:$16 sps:$4 sm:$0xff]  }
 0x223   :  { %v11460_v38 = vpack.c.bf16 %v2443_v4, %v2441_v5 }
 0x224   :  { %v8419_v62 = vpop.permute.xlu1 %8418  ;;  %v11470_v14 = vpack.c.bf16 %v2442_v60, %v2440_v57 }
 0x225   :  { %v8421_v54 = vunpack.i.h.bf16 %v8419_v62  ;;  %v8420_v37 = vunpack.i.l.bf16 %v8419_v62  ;;  %7427 = vmatprep.mubr.msk.bf16.mxu0 %vm2768_vm3, %v11460_v38  ;;  %7435 = vmatprep.mubr.msk.bf16.mxu1 %vm2768_vm3, %v11460_v38 }
 0x226   :  { %2846 = vmatmul.mubr.bf16.gmra.mrb[104].mxu0 %v11470_v14  ;;  %2959 = vmatmul.mubr.bf16.gmra.mrb[104].mxu1 %v11470_v14 }
 0x227   :  { %v8424_v21 = vpop.permute.xlu0 %8423  ;;  %v2397_v53 = vsel %vm1597_vm2, %v8420_v37, %v8421_v54  ;;  %3444 = vmatpush1.bf16.msra.mxu1 %v8852_v12  ;;  %3331 = vmatpush1.bf16.msra.mxu0 %v8855_v56  ;;  %v8867_v54 = vld [vmem:[%s13650_s3 + $0xc0] ss:$16 sps:$4 sm:$0xff]  }
 0x228   :  { %v8426_v46 = vunpack.i.h.bf16 %v8424_v21  ;;  %v8425_v52 = vunpack.i.l.bf16 %v8424_v21  ;;  %v8429_v35 = vpop.permute.xlu1 %8428  ;;  %v2445_v0 = vmax.f32 %v11193_v41, %v2397_v53  ;;  %3445 = vmatprep.subr.bf16.mxu1 %v8860_v26  ;;  %3332 = vmatprep.subr.bf16.mxu0 %v8863_v30  ;;  %v13929_v26 = vld [vmem:[#allocation26_spill] sm:$0xff] }
 0x229   :  { %v8431_v23 = vunpack.i.h.bf16 %v8429_v35  ;;  %v8430_v61 = vunpack.i.l.bf16 %v8429_v35  ;;  %v8872_v35 = vld [vmem:[%s13650_s3 + $0xec] ss:$16 sps:$4 sm:$0xff]  }
 0x22a   :  { %v2399_v8 = vsel %vm1597_vm2, %v8425_v52, %v8426_v46 }
 0x22b   :  { %v2447_v63 = vmax.f32 %v11215_v48, %v2399_v8  ;;  %v2398_v29 = vsel %vm1597_vm2, %v8431_v23, %v8425_v52  ;;  %v2396_v34 = vsel %vm1597_vm2, %v8430_v61, %v8420_v37  ;;  %3446 = vmatpush1.bf16.msra.mxu1 %v8858_v33  ;;  %3333 = vmatpush1.bf16.msra.mxu0 %v8861_v25  ;;  %v13930_v8 = vld [vmem:[#allocation22_spill] sm:$0xff]  ;;  %v8878_v33 = vld [vmem:[%s13650_s3 + $0x10c] ss:$16 sps:$4 sm:$0xff]  }
 0x22c   :  { %v2446_v48 = vmax.f32 %v11210_v7, %v2398_v29  ;;  %v2444_v5 = vmax.f32 %v11187_v45, %v2396_v34  ;;  %3447 = vmatprep.subr.bf16.mxu1 %v8866_v13  ;;  %3334 = vmatprep.subr.bf16.mxu0 %v8869_v19  ;;  %v8870_v29 = vld [vmem:[%s13650_s3 + $0xe8] ss:$16 sps:$4 sm:$0xff]   ;;  %v8873_v34 = vld [vmem:[%s13650_s3 + $0xe0] ss:$16 sps:$4 sm:$0xff]   ;;  %v8881_v25 = vld [vmem:[%s13650_s3 + $0x104] ss:$16 sps:$4 sm:$0xff]  }
 0x22d   :  { %v8434_v1 = vpop.permute.xlu0 %8433  ;;  %v11502_v41 = vpack.c.bf16 %v2447_v63, %v2445_v0 }
 0x22e   :  { %v8436_v28 = vunpack.i.h.bf16 %v8434_v1  ;;  %v8435_v27 = vunpack.i.l.bf16 %v8434_v1  ;;  %v11513_v60 = vpack.c.bf16 %v2446_v48, %v2444_v5 }
 0x22f   :  { %v8439_v4 = vpop.permute.xlu1 %8438  ;;  %7428 = vmatprep.mubr.msk.bf16.mxu0 %vm2768_vm3, %v11502_v41  ;;  %7436 = vmatprep.mubr.msk.bf16.mxu1 %vm2768_vm3, %v11502_v41 }
 0x230   :  { %v1603_v24 = vsel %vm1597_vm2, %v8435_v27, %v8436_v28  ;;  %v8441_v31 = vunpack.i.h.bf16 %v8439_v4  ;;  %v8440_v57 = vunpack.i.l.bf16 %v8439_v4  ;;  %2856 = vmatmul.mubr.bf16.gmra.mrb[108].mxu0 %v11513_v60  ;;  %2969 = vmatmul.mubr.bf16.gmra.mrb[108].mxu1 %v11513_v60 }
 0x231   :  { %v8444_v45 = vpop.permute.xlu0 %8443  ;;  %v1651_v37 = vmax.f32 %v13883_v20, %v1603_v24  ;;  %v8875_v20 = vld [vmem:[%s13650_s3 + $0xe4] ss:$16 sps:$4 sm:$0xff]   ;;  %3448 = vmatpush1.bf16.msra.mxu1 %v8864_v17  ;;  %3335 = vmatpush1.bf16.msra.mxu0 %v8867_v54 }
 0x232   :  { %v1605_v7 = vsel %vm1597_vm2, %v8440_v57, %v8441_v31  ;;  %v8446_v62 = vunpack.i.h.bf16 %v8444_v45  ;;  %v8445_v16 = vunpack.i.l.bf16 %v8444_v45  ;;  %3449 = vmatprep.subr.bf16.mxu1 %v8872_v35  ;;  %3336 = vmatprep.subr.bf16.mxu0 %v8875_v20  ;;  %v13932_v54 = vld [vmem:[#allocation34_spill] sm:$0xff] }
 0x233   :  { %v1653_v21 = vmax.f32 %v13884_v6, %v1605_v7 }
 0x234   :  { %v8449_v53 = vpop.permute.xlu1 %8448  ;;  %v1604_v46 = vsel %vm1597_vm2, %v8446_v62, %v8440_v57  ;;  %v1602_v52 = vsel %vm1597_vm2, %v8445_v16, %v8435_v27  ;;  %v8876_v62 = vld [vmem:[%s13650_s3 + $0x108] ss:$16 sps:$4 sm:$0xff]   ;;  %v8879_v16 = vld [vmem:[%s13650_s3 + $0x100] ss:$16 sps:$4 sm:$0xff]  }
 0x235   :  { %v8451_v12 = vunpack.i.h.bf16 %v8449_v53  ;;  %v8450_v56 = vunpack.i.l.bf16 %v8449_v53  ;;  %v11538_v6 = vpack.c.bf16 %v1653_v21, %v1651_v37  ;;  %v1652_v30 = vmax.f32 %v13929_v26, %v1604_v46  ;;  %v8454_v61 = vpop.permute.xlu0 %8453  ;;  %3450 = vmatpush1.bf16.msra.mxu1 %v8870_v29  ;;  %3337 = vmatpush1.bf16.msra.mxu0 %v8873_v34  ;;  %v8884_v53 = vld [vmem:[%s13650_s3 + $0x12c] ss:$16 sps:$4 sm:$0xff]   ;;  %v8887_v46 = vld [vmem:[%s13650_s3 + $0x124] ss:$16 sps:$4 sm:$0xff]  }
 0x236   :  { %v1650_v23 = vmax.f32 %v13930_v8, %v1602_v52  ;;  %v8456_v63 = vunpack.i.h.bf16 %v8454_v61  ;;  %v8455_v1 = vunpack.i.l.bf16 %v8454_v61  ;;  %3451 = vmatprep.subr.bf16.mxu1 %v8878_v33  ;;  %3338 = vmatprep.subr.bf16.mxu0 %v8881_v25  ;;  %v8885_v61 = vld [vmem:[%s13650_s3 + $0x120] ss:$16 sps:$4 sm:$0xff]   ;;  %v8893_v29 = vld [vmem:[%s13650_s3 + $0x144] ss:$16 sps:$4 sm:$0xff]   ;;  %v13933_v25 = vld [vmem:[#allocation7_spill] sm:$0xff] }
 0x237   :  { %v1607_v0 = vsel %vm1597_vm2, %v8450_v56, %v8451_v12  ;;  %7429 = vmatprep.mubr.msk.bf16.mxu0 %vm2768_vm3, %v11538_v6  ;;  %7437 = vmatprep.mubr.msk.bf16.mxu1 %vm2768_vm3, %v11538_v6 }
 0x238   :  { %v11549_v28 = vpack.c.bf16 %v1652_v30, %v1650_v23  ;;  %v8459_v27 = vpop.permute.xlu1 %8458  ;;  %v1609_v48 = vsel %vm1597_vm2, %v8455_v1, %v8456_v63  ;;  %v1655_v13 = vmax.f32 %v13895_v40, %v1607_v0  ;;  %v8882_v23 = vld [vmem:[%s13650_s3 + $0x128] ss:$16 sps:$4 sm:$0xff]  }
 0x239   :  { %v8461_v5 = vunpack.i.h.bf16 %v8459_v27  ;;  %v8460_v4 = vunpack.i.l.bf16 %v8459_v27  ;;  %v1657_v19 = vmax.f32 %v13896_v36, %v1609_v48  ;;  %v8464_v24 = vpop.permute.xlu0 %8463  ;;  %v13931_v36 = vld [vmem:[#allocation30_spill] sm:$0xff]  ;;  %3452 = vmatpush1.bf16.msra.mxu1 %v8876_v62  ;;  %3339 = vmatpush1.bf16.msra.mxu0 %v8879_v16  ;;  %v8896_v16 = vld [vmem:[%s13650_s3 + $0x16c] ss:$16 sps:$4 sm:$0xff]  }
 0x23a   :  { %v8466_v45 = vunpack.i.h.bf16 %v8464_v24  ;;  %v8465_v7 = vunpack.i.l.bf16 %v8464_v24  ;;  %2866 = vmatmul.mubr.bf16.gmra.mrb[112].mxu0 %v11549_v28  ;;  %2979 = vmatmul.mubr.bf16.gmra.mrb[112].mxu1 %v11549_v28 }
 0x23b   :  { %v1606_v31 = vsel %vm1597_vm2, %v8460_v4, %v8450_v56  ;;  %v1608_v57 = vsel %vm1597_vm2, %v8461_v5, %v8455_v1  ;;  %v11572_v40 = vpack.c.bf16 %v1657_v19, %v1655_v13  ;;  %3453 = vmatprep.subr.bf16.mxu1 %v8884_v53  ;;  %3340 = vmatprep.subr.bf16.mxu0 %v8887_v46  ;;  %v8890_v1 = vld [vmem:[%s13650_s3 + $0x14c] ss:$16 sps:$4 sm:$0xff]  }
 0x23c   :  { %v1654_v17 = vmax.f32 %v13931_v36, %v1606_v31  ;;  %v1656_v37 = vmax.f32 %v13932_v54, %v1608_v57  ;;  %v8469_v21 = vpop.permute.xlu1 %8468  ;;  %v1611_v20 = vsel %vm1597_vm2, %v8465_v7, %v8466_v45  ;;  %v8888_v57 = vld [vmem:[%s13650_s3 + $0x148] ss:$16 sps:$4 sm:$0xff]   ;;  %v8891_v45 = vld [vmem:[%s13650_s3 + $0x140] ss:$16 sps:$4 sm:$0xff]   ;;  %v8899_v36 = vld [vmem:[%s13650_s3 + $0x164] ss:$16 sps:$4 sm:$0xff]  }
 0x23d   :  { %v8471_v52 = vunpack.i.h.bf16 %v8469_v21  ;;  %v8470_v12 = vunpack.i.l.bf16 %v8469_v21  ;;  %v8474_v35 = vpop.permute.xlu0 %8473  ;;  %7430 = vmatprep.mubr.msk.bf16.mxu0 %vm2768_vm3, %v11572_v40  ;;  %7438 = vmatprep.mubr.msk.bf16.mxu1 %vm2768_vm3, %v11572_v40  ;;  %v1659_v33 = vmax.f32 %v13903_v59, %v1611_v20 }
 0x23e   :  { %v11584_v56 = vpack.c.bf16 %v1656_v37, %v1654_v17  ;;  %v8476_v30 = vunpack.i.h.bf16 %v8474_v35  ;;  %v8475_v8 = vunpack.i.l.bf16 %v8474_v35  ;;  %3454 = vmatpush1.bf16.msra.mxu1 %v8882_v23  ;;  %3341 = vmatpush1.bf16.msra.mxu0 %v8885_v61  ;;  %v8897_v35 = vld [vmem:[%s13650_s3 + $0x160] ss:$16 sps:$4 sm:$0xff]  }
 0x23f   :  { %v1613_v26 = vsel %vm1597_vm2, %v8470_v12, %v8471_v52  ;;  %3455 = vmatprep.subr.bf16.mxu1 %v8890_v1  ;;  %3342 = vmatprep.subr.bf16.mxu0 %v8893_v29 }
 0x240   :  { %v1661_v0 = vmax.f32 %v13904_v58, %v1613_v26  ;;  %v8479_v63 = vpop.permute.xlu1 %8478  ;;  %v1612_v34 = vsel %vm1597_vm2, %v8476_v30, %v8470_v12  ;;  %v1610_v27 = vsel %vm1597_vm2, %v8475_v8, %v8465_v7  ;;  %v13934_v58 = vld [vmem:[#allocation38_spill] sm:$0xff]  ;;  %v8894_v12 = vld [vmem:[%s13650_s3 + $0x168] ss:$16 sps:$4 sm:$0xff]   ;;  %v13935_v26 = vld [vmem:[#allocation8_spill] sm:$0xff] }
 0x241   :  { %v1660_v48 = vmax.f32 %v13933_v25, %v1612_v34  ;;  %v1658_v5 = vmax.f32 %v13934_v58, %v1610_v27  ;;  %v8484_v4 = vpop.permute.xlu0 %8483  ;;  %v8481_v13 = vunpack.i.h.bf16 %v8479_v63  ;;  %v8480_v19 = vunpack.i.l.bf16 %v8479_v63  ;;  %v13936_v8 = vld [vmem:[#allocation42_spill] sm:$0xff]  ;;  %v8905_v63 = vld [vmem:[%s13650_s3 + $0x18c] ss:$16 sps:$4 sm:$0xff]  }
 0x242   :  { %v8486_v24 = vunpack.i.h.bf16 %v8484_v4  ;;  %v8485_v31 = vunpack.i.l.bf16 %v8484_v4  ;;  %v11616_v59 = vpack.c.bf16 %v1661_v0, %v1659_v33  ;;  %2876 = vmatmul.mubr.bf16.gmra.mrb[116].mxu0 %v11584_v56  ;;  %2989 = vmatmul.mubr.bf16.gmra.mrb[116].mxu1 %v11584_v56  ;;  %v8902_v0 = vld [vmem:[%s13650_s3 + $0x184] ss:$16 sps:$4 sm:$0xff]   ;;  %v8903_v4 = vld [vmem:[%s13650_s3 + $0x188] ss:$16 sps:$4 sm:$0xff]  }
 0x243   :  { %v11618_v7 = vpack.c.bf16 %v1660_v48, %v1658_v5  ;;  %v1615_v53 = vsel %vm1597_vm2, %v8480_v19, %v8481_v13  ;;  %3456 = vmatpush1.bf16.msra.mxu1 %v8888_v57  ;;  %3343 = vmatpush1.bf16.msra.mxu0 %v8891_v45  ;;  %v8900_v5 = vld [vmem:[%s13650_s3 + $0x180] ss:$16 sps:$4 sm:$0xff]  }
 0x244   :  { %v8489_v62 = vpop.permute.xlu1 %8488  ;;  %v1617_v17 = vsel %vm1597_vm2, %v8485_v31, %v8486_v24  ;;  %7431 = vmatprep.mubr.msk.bf16.mxu0 %vm2768_vm3, %v11616_v59  ;;  %7439 = vmatprep.mubr.msk.bf16.mxu1 %vm2768_vm3, %v11616_v59  ;;  %v1663_v34 = vmax.f32 %v13911_v47, %v1615_v53  ;;  %v8911_v24 = vld [vmem:[%s13650_s3 + $0x1ac] ss:$16 sps:$4 sm:$0xff]   ;;  %v8909_v53 = vld [vmem:[%s13650_s3 + $0x1a8] ss:$16 sps:$4 sm:$0xff]  }
 0x245   :  { %v8491_v54 = vunpack.i.h.bf16 %v8489_v62  ;;  %v8490_v37 = vunpack.i.l.bf16 %v8489_v62  ;;  %v8494_v21 = vpop.permute.xlu0 %8493  ;;  %v1665_v20 = vmax.f32 %v13912_v3, %v1617_v17  ;;  %3457 = vmatprep.subr.bf16.mxu1 %v8896_v16  ;;  %3344 = vmatprep.subr.bf16.mxu0 %v8899_v36  ;;  %v13937_v62 = vld [vmem:[#allocation18_spill] sm:$0xff] }
 0x246   :  { %v8496_v33 = vunpack.i.h.bf16 %v8494_v21  ;;  %v8495_v25 = vunpack.i.l.bf16 %v8494_v21  ;;  %v13938_v36 = vld [vmem:[#allocation14_spill] sm:$0xff] }
 0x247   :  { %v1614_v46 = vsel %vm1597_vm2, %v8490_v37, %v8480_v19  ;;  %v1616_v52 = vsel %vm1597_vm2, %v8491_v54, %v8485_v31  ;;  %3458 = vmatpush1.bf16.msra.mxu1 %v8894_v12  ;;  %3345 = vmatpush1.bf16.msra.mxu0 %v8897_v35  ;;  %v11660_v13 = vpack.c.bf16 %v1665_v20, %v1663_v34  ;;  %v8908_v19 = vld [vmem:[%s13650_s3 + $0x1a4] ss:$16 sps:$4 sm:$0xff]   ;;  %v8906_v21 = vld [vmem:[%s13650_s3 + $0x1a0] ss:$16 sps:$4 sm:$0xff]   ;;  %v8917_v20 = vld [vmem:[%s13650_s3 + $0x1cc] ss:$16 sps:$4 sm:$0xff]  }
 0x248   :  { %v1662_v30 = vmax.f32 %v13935_v26, %v1614_v46  ;;  %v1664_v23 = vmax.f32 %v13936_v8, %v1616_v52  ;;  %v8499_v61 = vpop.permute.xlu1 %8498  ;;  %3346 = vmatprep.subr.bf16.mxu0 %v8902_v0  ;;  %3459 = vmatprep.subr.bf16.mxu1 %v8905_v63  ;;  %v1599_v37 = vsel %vm1597_vm2, %v8495_v25, %v8496_v33  ;;  %v8914_v35 = vld [vmem:[%s13650_s3 + $0x1c4] ss:$16 sps:$4 sm:$0xff]  }
 0x249   :  { %v8501_v1 = vunpack.i.h.bf16 %v8499_v61  ;;  %v8500_v29 = vunpack.i.l.bf16 %v8499_v61  ;;  %v8504_v27 = vpop.permute.xlu0 %8503 }
 0x24a   :  { %v11652_v3 = vpack.c.bf16 %v1664_v23, %v1662_v30  ;;  %v8506_v48 = vunpack.i.h.bf16 %v8504_v27  ;;  %v8505_v58 = vunpack.i.l.bf16 %v8504_v27  ;;  %2886 = vmatmul.mubr.bf16.gmra.mrb[120].mxu0 %v11618_v7  ;;  %2999 = vmatmul.mubr.bf16.gmra.mrb[120].mxu1 %v11618_v7 }
 0x24b   :  { %v1601_v31 = vsel %vm1597_vm2, %v8500_v29, %v8501_v1  ;;  %7432 = vmatprep.mubr.msk.bf16.mxu0 %vm2768_vm3, %v11660_v13  ;;  %7440 = vmatprep.mubr.msk.bf16.mxu1 %vm2768_vm3, %v11660_v13  ;;  %v8912_v1 = vld [vmem:[%s13650_s3 + $0x1c0] ss:$16 sps:$4 sm:$0xff]  }
 0x24c   :  { %v11662_v47 = vpop.permute.xlu1 %8508  ;;  %v1600_v57 = vsel %vm1597_vm2, %v8506_v48, %v8500_v29  ;;  %v1598_v45 = vsel %vm1597_vm2, %v8505_v58, %v8495_v25  ;;  %3347 = vmatpush1.bf16.msra.mxu0 %v8900_v5  ;;  %3460 = vmatpush1.bf16.msra.mxu1 %v8903_v4  ;;  %v1649_v46 = vmax.f32 %v13920_v18, %v1601_v31  ;;  %v8920_v25 = vld [vmem:[%s13650_s3 + $0x3cc] ss:$16 sps:$4 sm:$0xff]   ;;  %v8923_v48 = vld [vmem:[%s13650_s3 + $0x3c4] ss:$16 sps:$4 sm:$0xff]  }
 0x24d   :  { %v1648_v16 = vmax.f32 %v13937_v62, %v1600_v57  ;;  %v1646_v17 = vmax.f32 %v13938_v36, %v1598_v45  ;;  %v11681_v54 = vpop.permute.xlu0 %8513  ;;  %3348 = vmatprep.subr.bf16.mxu0 %v8908_v19  ;;  %3461 = vmatprep.subr.bf16.mxu1 %v8911_v24  ;;  %v8510_v26 = vunpack.i.l.bf16 %v11662_v47  ;;  %v1647_v18 = vmax.f32 %v13919_v44, %v1599_v37  ;;  %v8915_v44 = vld [vmem:[%s13650_s3 + $0x1c8] ss:$16 sps:$4 sm:$0xff]   ;;  %v13939_v45 = vld [vmem:[#allocation50_spill] sm:$0xff] }
 0x24e   :  { %v8515_v30 = vunpack.i.l.bf16 %v11681_v54  ;;  %v8918_v37 = vld [vmem:[%s13650_s3 + $0x3c8] ss:$16 sps:$4 sm:$0xff]  }
 0x24f   :  { %v1670_v52 = vpack.c.bf16 %v1648_v16, %v1646_v17  ;;  %v1671_v33 = vpack.c.bf16 %v1649_v46, %v1647_v18  ;;  %v13940_v16 = vld [vmem:[#allocation46_spill] sm:$0xff]  ;;  %v8926_v46 = vld [vmem:[%s13650_s3 + $0x3ec] ss:$16 sps:$4 sm:$0xff]  }
 0x250   :  { %v8519_v12 = vpop.permute.xlu1 %8518  ;;  %3349 = vmatpush1.bf16.msra.mxu0 %v8906_v21  ;;  %3462 = vmatpush1.bf16.msra.mxu1 %v8909_v53  ;;  %v8921_v21 = vld [vmem:[%s13650_s3 + $0x3c0] ss:$16 sps:$4 sm:$0xff]  }
 0x251   :  { %v8521_v8 = vunpack.i.h.bf16 %v8519_v12  ;;  %v8520_v23 = vunpack.i.l.bf16 %v8519_v12  ;;  %v11700_v61 = vpop.permute.xlu0 %8523  ;;  %3350 = vmatprep.subr.bf16.mxu0 %v8914_v35  ;;  %3463 = vmatprep.subr.bf16.mxu1 %v8917_v20  ;;  %v8929_v12 = vld [vmem:[%s13650_s3 + $0x3e4] ss:$16 sps:$4 sm:$0xff]  }
 0x252   :  { %2896 = vmatmul.mubr.bf16.gmra.mrb[124].mxu0 %v11652_v3  ;;  %3009 = vmatmul.mubr.bf16.gmra.mrb[124].mxu1 %v11652_v3  ;;  %v8525_v58 = vunpack.i.l.bf16 %v11700_v61 }
 0x253   :  { %v2400_v0 = vsel %vm1597_vm2, %v8520_v23, %v8510_v26  ;;  %v2402_v63 = vsel %vm1597_vm2, %v8521_v8, %v8515_v30  ;;  %7501 = vmatprep.mubr.msk.bf16.mxu0 %vm2768_vm3, %v1671_v33  ;;  %7509 = vmatprep.mubr.msk.bf16.mxu1 %vm2768_vm3, %v1671_v33 }
 0x254   :  { %v2448_v29 = vmax.f32 %v11241_v50, %v2400_v0  ;;  %v2450_v34 = vmax.f32 %v11260_v15, %v2402_v63  ;;  %v11716_v27 = vpop.permute.xlu1 %8528  ;;  %3351 = vmatpush1.bf16.msra.mxu0 %v8912_v1  ;;  %3464 = vmatpush1.bf16.msra.mxu1 %v8915_v44  ;;  %v8927_v1 = vld [vmem:[%s13650_s3 + $0x3e0] ss:$16 sps:$4 sm:$0xff]   ;;  %v8932_v44 = vld [vmem:[%s13650_s3 + $0x40c] ss:$16 sps:$4 sm:$0xff]  }
 0x255   :  { %v8534_v15 = vpop.permute.xlu0 %8533  ;;  %v8530_v5 = vunpack.i.l.bf16 %v11716_v27  ;;  %3964 = vmatprep.subr.bf16.mxu1 %v8920_v25  ;;  %3851 = vmatprep.subr.bf16.mxu0 %v8923_v48  ;;  %v8930_v48 = vld [vmem:[%s13650_s3 + $0x408] ss:$16 sps:$4 sm:$0xff]  }
 0x256   :  { %v11726_v50 = vpack.c.bf16 %v2450_v34, %v2448_v29  ;;  %v8536_v4 = vunpack.i.h.bf16 %v8534_v15  ;;  %v8535_v19 = vunpack.i.l.bf16 %v8534_v15  ;;  %v8935_v29 = vld [vmem:[%s13650_s3 + $0x404] ss:$16 sps:$4 sm:$0xff]   ;;  %v8933_v15 = vld [vmem:[%s13650_s3 + $0x400] ss:$16 sps:$4 sm:$0xff]  }
 0x258   :  { %v11732_v24 = vpop.permute.xlu1 %8538  ;;  %v1620_v31 = vsel %vm1597_vm2, %v8536_v4, %v8530_v5  ;;  %v1618_v57 = vsel %vm1597_vm2, %v8535_v19, %v8525_v58  ;;  %v8936_v4 = vld [vmem:[%s13650_s3 + $0x428] ss:$16 sps:$4 sm:$0xff]   ;;  %v8939_v19 = vld [vmem:[%s13650_s3 + $0x420] ss:$16 sps:$4 sm:$0xff]  }
 0x259   :  { %v1668_v62 = vmax.f32 %v13939_v45, %v1620_v31  ;;  %v1666_v36 = vmax.f32 %v13940_v16, %v1618_v57  ;;  %v11742_v17 = vpop.permute.xlu0 %8543  ;;  %v8540_v20 = vunpack.i.l.bf16 %v11732_v24  ;;  %v8944_v31 = vld [vmem:[%s13650_s3 + $0x44c] ss:$16 sps:$4 sm:$0xff]   ;;  %v8947_v57 = vld [vmem:[%s13650_s3 + $0x444] ss:$16 sps:$4 sm:$0xff]   ;;  %v8942_v45 = vld [vmem:[%s13650_s3 + $0x448] ss:$16 sps:$4 sm:$0xff]  }
 0x25a   :  { %v8545_v8 = vunpack.i.l.bf16 %v11742_v17  ;;  %3355 = vmatmul.mubr.bf16.vlgmr.msra.gmra.mrb[96].mxu0 %v1670_v52  ;;  %3468 = vmatmul.mubr.bf16.vlgmr.msra.gmra.mrb[96].mxu1 %v1670_v52  ;;  %v8924_v52 = vld [vmem:[%s13650_s3 + $0x3e8] ss:$16 sps:$4 sm:$0xff]   ;;  %v8950_v16 = vld [vmem:[%s13650_s3 + $0x46c] ss:$16 sps:$4 sm:$0xff]  }
 0x25b   :  { %v11756_v35 = vpack.c.bf16 %v1668_v62, %v1666_v36  ;;  %7502 = vmatprep.mubr.msk.bf16.mxu0 %vm2768_vm3, %v11538_v6  ;;  %7510 = vmatprep.mubr.msk.bf16.mxu1 %vm2768_vm3, %v11538_v6  ;;  %v8945_v62 = vld [vmem:[%s13650_s3 + $0x440] ss:$16 sps:$4 sm:$0xff]   ;;  %v8953_v36 = vld [vmem:[%s13650_s3 + $0x464] ss:$16 sps:$4 sm:$0xff]  }
 0x25c   :  { %v8549_v53 = vpop.permute.xlu1 %8548  ;;  %3965 = vmatpush1.bf16.msra.mxu1 %v8918_v37  ;;  %3852 = vmatpush1.bf16.msra.mxu0 %v8921_v21  ;;  %v8948_v37 = vld [vmem:[%s13650_s3 + $0x468] ss:$16 sps:$4 sm:$0xff]   ;;  %v8951_v21 = vld [vmem:[%s13650_s3 + $0x460] ss:$16 sps:$4 sm:$0xff]  }
 0x25d   :  { %v8551_v23 = vunpack.i.h.bf16 %v8549_v53  ;;  %v8550_v18 = vunpack.i.l.bf16 %v8549_v53  ;;  %3966 = vmatprep.subr.bf16.mxu1 %v8926_v46  ;;  %3853 = vmatprep.subr.bf16.mxu0 %v8929_v12  ;;  %v8956_v53 = vld [vmem:[%s13650_s3 + $0x48c] ss:$16 sps:$4 sm:$0xff]   ;;  %v8959_v46 = vld [vmem:[%s13650_s3 + $0x484] ss:$16 sps:$4 sm:$0xff]   ;;  %v8954_v12 = vld [vmem:[%s13650_s3 + $0x488] ss:$16 sps:$4 sm:$0xff]  }
 0x25f   :  { %v2404_v0 = vsel %vm1597_vm2, %v8550_v18, %v8540_v20  ;;  %v2406_v63 = vsel %vm1597_vm2, %v8551_v23, %v8545_v8  ;;  %v8957_v23 = vld [vmem:[%s13650_s3 + $0x480] ss:$16 sps:$4 sm:$0xff]   ;;  %v8962_v18 = vld [vmem:[%s13650_s3 + $0x4ac] ss:$16 sps:$4 sm:$0xff]  }
 0x260   :  { %v2452_v34 = vmax.f32 %v11299_v22, %v2404_v0  ;;  %v2454_v33 = vmax.f32 %v11311_v49, %v2406_v63  ;;  %3967 = vmatpush1.bf16.msra.mxu1 %v8924_v52  ;;  %3854 = vmatpush1.bf16.msra.mxu0 %v8927_v1  ;;  %v8938_v22 = vld [vmem:[%s13650_s3 + $0x42c] ss:$16 sps:$4 sm:$0xff]   ;;  %v8941_v49 = vld [vmem:[%s13650_s3 + $0x424] ss:$16 sps:$4 sm:$0xff]   ;;  %v8960_v63 = vld [vmem:[%s13650_s3 + $0x4a8] ss:$16 sps:$4 sm:$0xff]  }
 0x261   :  { %3968 = vmatprep.subr.bf16.mxu1 %v8932_v44  ;;  %3855 = vmatprep.subr.bf16.mxu0 %v8935_v29  ;;  %v8965_v0 = vld [vmem:[%s13650_s3 + $0x4a4] ss:$16 sps:$4 sm:$0xff]   ;;  %v8963_v52 = vld [vmem:[%s13650_s3 + $0x4a0] ss:$16 sps:$4 sm:$0xff]   ;;  %v8968_v1 = vld [vmem:[%s13650_s3 + $0x4cc] ss:$16 sps:$4 sm:$0xff]  }
 0x262   :  { %v11784_v25 = vpack.c.bf16 %v2454_v33, %v2452_v34  ;;  %3365 = vmatmul.mubr.bf16.gmra.mrb[100].mxu0 %v11549_v28  ;;  %3478 = vmatmul.mubr.bf16.gmra.mrb[100].mxu1 %v11549_v28  ;;  %v8966_v44 = vld [vmem:[%s13650_s3 + $0x4c8] ss:$16 sps:$4 sm:$0xff]   ;;  %v8969_v29 = vld [vmem:[%s13650_s3 + $0x4c0] ss:$16 sps:$4 sm:$0xff]   ;;  %v8974_v34 = vld [vmem:[%s13650_s3 + $0x4ec] ss:$16 sps:$4 sm:$0xff]  }
 0x263   :  { %7503 = vmatprep.mubr.msk.bf16.mxu0 %vm2768_vm3, %v11572_v40  ;;  %7511 = vmatprep.mubr.msk.bf16.mxu1 %vm2768_vm3, %v11572_v40  ;;  %v8977_v33 = vld [vmem:[%s13650_s3 + $0x4e4] ss:$16 sps:$4 sm:$0xff]  }
 0x264   :  { %3969 = vmatpush1.bf16.msra.mxu1 %v8930_v48  ;;  %3856 = vmatpush1.bf16.msra.mxu0 %v8933_v15  ;;  %v8972_v48 = vld [vmem:[%s13650_s3 + $0x4e8] ss:$16 sps:$4 sm:$0xff]   ;;  %v8975_v15 = vld [vmem:[%s13650_s3 + $0x4e0] ss:$16 sps:$4 sm:$0xff]  }
 0x265   :  { %3970 = vmatprep.subr.bf16.mxu1 %v8938_v22  ;;  %3857 = vmatprep.subr.bf16.mxu0 %v8941_v49  ;;  %v8983_v22 = vld [vmem:[%s13650_s3 + $0x504] ss:$16 sps:$4 sm:$0xff]   ;;  %v8978_v49 = vld [vmem:[%s13650_s3 + $0x508] ss:$16 sps:$4 sm:$0xff]  }
 0x268   :  { %3971 = vmatpush1.bf16.msra.mxu1 %v8936_v4  ;;  %3858 = vmatpush1.bf16.msra.mxu0 %v8939_v19  ;;  %v8981_v4 = vld [vmem:[%s13650_s3 + $0x500] ss:$16 sps:$4 sm:$0xff]   ;;  %v8986_v19 = vld [vmem:[%s13650_s3 + $0x52c] ss:$16 sps:$4 sm:$0xff]  }
 0x269   :  { %3972 = vmatprep.subr.bf16.mxu1 %v8944_v31  ;;  %3859 = vmatprep.subr.bf16.mxu0 %v8947_v57  ;;  %v8989_v31 = vld [vmem:[%s13650_s3 + $0x524] ss:$16 sps:$4 sm:$0xff]   ;;  %v8984_v57 = vld [vmem:[%s13650_s3 + $0x528] ss:$16 sps:$4 sm:$0xff]  }
 0x26a   :  { %3375 = vmatmul.mubr.bf16.gmra.mrb[104].mxu0 %v11584_v56  ;;  %3488 = vmatmul.mubr.bf16.gmra.mrb[104].mxu1 %v11584_v56 }
 0x26b   :  { %7504 = vmatprep.mubr.msk.bf16.mxu0 %vm2768_vm3, %v11616_v59  ;;  %7512 = vmatprep.mubr.msk.bf16.mxu1 %vm2768_vm3, %v11616_v59 }
 0x26c   :  { %3973 = vmatpush1.bf16.msra.mxu1 %v8942_v45  ;;  %3860 = vmatpush1.bf16.msra.mxu0 %v8945_v62  ;;  %v8987_v45 = vld [vmem:[%s13650_s3 + $0x520] ss:$16 sps:$4 sm:$0xff]   ;;  %v8992_v62 = vld [vmem:[%s13650_s3 + $0x544] ss:$16 sps:$4 sm:$0xff]  }
 0x26d   :  { %3974 = vmatprep.subr.bf16.mxu1 %v8950_v16  ;;  %3861 = vmatprep.subr.bf16.mxu0 %v8953_v36  ;;  %v8995_v16 = vld [vmem:[%s13650_s3 + $0x54c] ss:$16 sps:$4 sm:$0xff]   ;;  %v8990_v36 = vld [vmem:[%s13650_s3 + $0x540] ss:$16 sps:$4 sm:$0xff]  }
 0x270   :  { %3975 = vmatpush1.bf16.msra.mxu1 %v8948_v37  ;;  %3862 = vmatpush1.bf16.msra.mxu0 %v8951_v21  ;;  %v8993_v37 = vld [vmem:[%s13650_s3 + $0x548] ss:$16 sps:$4 sm:$0xff]   ;;  %v8998_v21 = vld [vmem:[%s13650_s3 + $0x564] ss:$16 sps:$4 sm:$0xff]  }
 0x271   :  { %3976 = vmatprep.subr.bf16.mxu1 %v8956_v53  ;;  %3863 = vmatprep.subr.bf16.mxu0 %v8959_v46  ;;  %v9001_v53 = vld [vmem:[%s13650_s3 + $0x56c] ss:$16 sps:$4 sm:$0xff]   ;;  %v8996_v46 = vld [vmem:[%s13650_s3 + $0x560] ss:$16 sps:$4 sm:$0xff]  }
 0x272   :  { %3385 = vmatmul.mubr.bf16.gmra.mrb[108].mxu0 %v11618_v7  ;;  %3498 = vmatmul.mubr.bf16.gmra.mrb[108].mxu1 %v11618_v7 }
 0x273   :  { %7505 = vmatprep.mubr.msk.bf16.mxu0 %vm2768_vm3, %v11386_v32  ;;  %7513 = vmatprep.mubr.msk.bf16.mxu1 %vm2768_vm3, %v11386_v32  ;;  %v8971_v32 = vld [vmem:[%s13650_s3 + $0x4c4] ss:$16 sps:$4 sm:$0xff]  }
 0x274   :  { %3977 = vmatpush1.bf16.msra.mxu1 %v8954_v12  ;;  %3864 = vmatpush1.bf16.msra.mxu0 %v8957_v23  ;;  %v8999_v12 = vld [vmem:[%s13650_s3 + $0x568] ss:$16 sps:$4 sm:$0xff]   ;;  %v9004_v23 = vld [vmem:[%s13650_s3 + $0x584] ss:$16 sps:$4 sm:$0xff]  }
 0x275   :  { %3978 = vmatprep.subr.bf16.mxu1 %v8962_v18  ;;  %3865 = vmatprep.subr.bf16.mxu0 %v8965_v0  ;;  %v9007_v18 = vld [vmem:[%s13650_s3 + $0x58c] ss:$16 sps:$4 sm:$0xff]   ;;  %v9002_v0 = vld [vmem:[%s13650_s3 + $0x580] ss:$16 sps:$4 sm:$0xff]  }
 0x278   :  { %3979 = vmatpush1.bf16.msra.mxu1 %v8960_v63  ;;  %3866 = vmatpush1.bf16.msra.mxu0 %v8963_v52  ;;  %v9005_v63 = vld [vmem:[%s13650_s3 + $0x588] ss:$16 sps:$4 sm:$0xff]   ;;  %v9010_v52 = vld [vmem:[%s13650_s3 + $0x5ac] ss:$16 sps:$4 sm:$0xff]  }
 0x279   :  { %3980 = vmatprep.subr.bf16.mxu1 %v8968_v1  ;;  %3867 = vmatprep.subr.bf16.mxu0 %v8971_v32  ;;  %v9013_v1 = vld [vmem:[%s13650_s3 + $0x5a4] ss:$16 sps:$4 sm:$0xff]   ;;  %v9008_v32 = vld [vmem:[%s13650_s3 + $0x5a8] ss:$16 sps:$4 sm:$0xff]  }
 0x27a   :  { %3395 = vmatmul.mubr.bf16.gmra.mrb[112].mxu0 %v11384_v43  ;;  %3508 = vmatmul.mubr.bf16.gmra.mrb[112].mxu1 %v11384_v43  ;;  %v8980_v43 = vld [vmem:[%s13650_s3 + $0x50c] ss:$16 sps:$4 sm:$0xff]  }
 0x27b   :  { %7506 = vmatprep.mubr.msk.bf16.mxu0 %vm2768_vm3, %v11418_v2  ;;  %7514 = vmatprep.mubr.msk.bf16.mxu1 %vm2768_vm3, %v11418_v2 }
 0x27c   :  { %3981 = vmatpush1.bf16.msra.mxu1 %v8966_v44  ;;  %3868 = vmatpush1.bf16.msra.mxu0 %v8969_v29  ;;  %v9011_v44 = vld [vmem:[%s13650_s3 + $0x5a0] ss:$16 sps:$4 sm:$0xff]   ;;  %v9016_v29 = vld [vmem:[%s13650_s3 + $0x5cc] ss:$16 sps:$4 sm:$0xff]  }
 0x27d   :  { %3982 = vmatprep.subr.bf16.mxu1 %v8974_v34  ;;  %3869 = vmatprep.subr.bf16.mxu0 %v8977_v33  ;;  %v9014_v34 = vld [vmem:[%s13650_s3 + $0x5c8] ss:$16 sps:$4 sm:$0xff]   ;;  %v9017_v33 = vld [vmem:[%s13650_s3 + $0x5c0] ss:$16 sps:$4 sm:$0xff]  }
 0x280   :  { %3983 = vmatpush1.bf16.msra.mxu1 %v8972_v48  ;;  %3870 = vmatpush1.bf16.msra.mxu0 %v8975_v15  ;;  %v9025_v48 = vld [vmem:[%s13650_s3 + $0x5e4] ss:$16 sps:$4 sm:$0xff]   ;;  %v9020_v15 = vld [vmem:[%s13650_s3 + $0x5e8] ss:$16 sps:$4 sm:$0xff]  }
 0x281   :  { %3984 = vmatprep.subr.bf16.mxu1 %v8980_v43  ;;  %3871 = vmatprep.subr.bf16.mxu0 %v8983_v22  ;;  %v9023_v43 = vld [vmem:[%s13650_s3 + $0x5e0] ss:$16 sps:$4 sm:$0xff]   ;;  %v9028_v22 = vld [vmem:[%s13650_s3 + $0x60c] ss:$16 sps:$4 sm:$0xff]  }
 0x282   :  { %3405 = vmatmul.mubr.bf16.gmra.mrb[116].mxu0 %v11428_v10  ;;  %3518 = vmatmul.mubr.bf16.gmra.mrb[116].mxu1 %v11428_v10 }
 0x283   :  { %7507 = vmatprep.mubr.msk.bf16.mxu0 %vm2768_vm3, %v11460_v38  ;;  %7515 = vmatprep.mubr.msk.bf16.mxu1 %vm2768_vm3, %v11460_v38 }
 0x284   :  { %3985 = vmatpush1.bf16.msra.mxu1 %v8978_v49  ;;  %3872 = vmatpush1.bf16.msra.mxu0 %v8981_v4  ;;  %v9031_v49 = vld [vmem:[%s13650_s3 + $0x604] ss:$16 sps:$4 sm:$0xff]   ;;  %v9026_v4 = vld [vmem:[%s13650_s3 + $0x608] ss:$16 sps:$4 sm:$0xff]  }
 0x285   :  { %3986 = vmatprep.subr.bf16.mxu1 %v8986_v19  ;;  %3873 = vmatprep.subr.bf16.mxu0 %v8989_v31  ;;  %v9029_v19 = vld [vmem:[%s13650_s3 + $0x600] ss:$16 sps:$4 sm:$0xff]   ;;  %v9034_v31 = vld [vmem:[%s13650_s3 + $0x62c] ss:$16 sps:$4 sm:$0xff]  }
 0x288   :  { %3987 = vmatpush1.bf16.msra.mxu1 %v8984_v57  ;;  %3874 = vmatpush1.bf16.msra.mxu0 %v8987_v45  ;;  %v9037_v57 = vld [vmem:[%s13650_s3 + $0x624] ss:$16 sps:$4 sm:$0xff]   ;;  %v9032_v45 = vld [vmem:[%s13650_s3 + $0x628] ss:$16 sps:$4 sm:$0xff]  }
 0x289   :  { %3875 = vmatprep.subr.bf16.mxu0 %v8992_v62  ;;  %3988 = vmatprep.subr.bf16.mxu1 %v8995_v16  ;;  %v9035_v62 = vld [vmem:[%s13650_s3 + $0x620] ss:$16 sps:$4 sm:$0xff]   ;;  %v9040_v16 = vld [vmem:[%s13650_s3 + $0x64c] ss:$16 sps:$4 sm:$0xff]  }
 0x28a   :  { %3415 = vmatmul.mubr.bf16.gmra.mrb[120].mxu0 %v11470_v14  ;;  %3528 = vmatmul.mubr.bf16.gmra.mrb[120].mxu1 %v11470_v14 }
 0x28b   :  { %7508 = vmatprep.mubr.msk.bf16.mxu0 %vm2768_vm3, %v11502_v41  ;;  %7516 = vmatprep.mubr.msk.bf16.mxu1 %vm2768_vm3, %v11502_v41 }
 0x28c   :  { %3876 = vmatpush1.bf16.msra.mxu0 %v8990_v36  ;;  %3989 = vmatpush1.bf16.msra.mxu1 %v8993_v37  ;;  %v9043_v36 = vld [vmem:[%s13650_s3 + $0x644] ss:$16 sps:$4 sm:$0xff]   ;;  %v9038_v37 = vld [vmem:[%s13650_s3 + $0x648] ss:$16 sps:$4 sm:$0xff]  }
 0x28d   :  { %3877 = vmatprep.subr.bf16.mxu0 %v8998_v21  ;;  %3990 = vmatprep.subr.bf16.mxu1 %v9001_v53  ;;  %v9041_v21 = vld [vmem:[%s13650_s3 + $0x640] ss:$16 sps:$4 sm:$0xff]   ;;  %v9046_v53 = vld [vmem:[%s13650_s3 + $0x66c] ss:$16 sps:$4 sm:$0xff]  }
 0x290   :  { %3878 = vmatpush1.bf16.msra.mxu0 %v8996_v46  ;;  %3991 = vmatpush1.bf16.msra.mxu1 %v8999_v12  ;;  %v9049_v46 = vld [vmem:[%s13650_s3 + $0x664] ss:$16 sps:$4 sm:$0xff]   ;;  %v9044_v12 = vld [vmem:[%s13650_s3 + $0x668] ss:$16 sps:$4 sm:$0xff]  }
 0x291   :  { %3879 = vmatprep.subr.bf16.mxu0 %v9004_v23  ;;  %3992 = vmatprep.subr.bf16.mxu1 %v9007_v18  ;;  %v9047_v23 = vld [vmem:[%s13650_s3 + $0x660] ss:$16 sps:$4 sm:$0xff]   ;;  %v9052_v18 = vld [vmem:[%s13650_s3 + $0x68c] ss:$16 sps:$4 sm:$0xff]  }
 0x292   :  { %3425 = vmatmul.mubr.bf16.gmra.mrb[124].mxu0 %v11513_v60  ;;  %3538 = vmatmul.mubr.bf16.gmra.mrb[124].mxu1 %v11513_v60 }
 0x293   :  { %7577 = vmatprep.mubr.msk.bf16.mxu0 %vm2768_vm3, %v11538_v6  ;;  %7585 = vmatprep.mubr.msk.bf16.mxu1 %vm2768_vm3, %v11538_v6  ;;  %v9019_v6 = vld [vmem:[%s13650_s3 + $0x5c4] ss:$16 sps:$4 sm:$0xff]  }
 0x294   :  { %3880 = vmatpush1.bf16.msra.mxu0 %v9002_v0  ;;  %3993 = vmatpush1.bf16.msra.mxu1 %v9005_v63  ;;  %v9055_v0 = vld [vmem:[%s13650_s3 + $0x684] ss:$16 sps:$4 sm:$0xff]   ;;  %v9050_v63 = vld [vmem:[%s13650_s3 + $0x688] ss:$16 sps:$4 sm:$0xff]  }
 0x295   :  { %4557 = vmatprep.subr.bf16.mxu1 %v9010_v52  ;;  %4444 = vmatprep.subr.bf16.mxu0 %v9013_v1  ;;  %v9053_v52 = vld [vmem:[%s13650_s3 + $0x680] ss:$16 sps:$4 sm:$0xff]   ;;  %v9058_v1 = vld [vmem:[%s13650_s3 + $0x6ac] ss:$16 sps:$4 sm:$0xff]  }
 0x29a   :  { %3884 = vmatmul.mubr.bf16.vlgmr.msra.gmra.mrb[96].mxu0 %v11549_v28  ;;  %3997 = vmatmul.mubr.bf16.vlgmr.msra.gmra.mrb[96].mxu1 %v11549_v28  ;;  %v9022_v28 = vld [vmem:[%s13650_s3 + $0x5ec] ss:$16 sps:$4 sm:$0xff]  }
 0x29b   :  { %7578 = vmatprep.mubr.msk.bf16.mxu0 %vm2768_vm3, %v11572_v40  ;;  %7586 = vmatprep.mubr.msk.bf16.mxu1 %vm2768_vm3, %v11572_v40 }
 0x29c   :  { %4558 = vmatpush1.bf16.msra.mxu1 %v9008_v32  ;;  %4445 = vmatpush1.bf16.msra.mxu0 %v9011_v44  ;;  %v9061_v32 = vld [vmem:[%s13650_s3 + $0x6a4] ss:$16 sps:$4 sm:$0xff]   ;;  %v9056_v44 = vld [vmem:[%s13650_s3 + $0x6a8] ss:$16 sps:$4 sm:$0xff]  }
 0x29d   :  { %4559 = vmatprep.subr.bf16.mxu1 %v9016_v29  ;;  %4446 = vmatprep.subr.bf16.mxu0 %v9019_v6  ;;  %v9059_v29 = vld [vmem:[%s13650_s3 + $0x6a0] ss:$16 sps:$4 sm:$0xff]   ;;  %v9064_v6 = vld [vmem:[%s13650_s3 + $0x6cc] ss:$16 sps:$4 sm:$0xff]  }
 0x2a0   :  { %4560 = vmatpush1.bf16.msra.mxu1 %v9014_v34  ;;  %4447 = vmatpush1.bf16.msra.mxu0 %v9017_v33  ;;  %v9067_v34 = vld [vmem:[%s13650_s3 + $0x6c4] ss:$16 sps:$4 sm:$0xff]   ;;  %v9062_v33 = vld [vmem:[%s13650_s3 + $0x6c8] ss:$16 sps:$4 sm:$0xff]  }
 0x2a1   :  { %4561 = vmatprep.subr.bf16.mxu1 %v9022_v28  ;;  %4448 = vmatprep.subr.bf16.mxu0 %v9025_v48  ;;  %v9065_v28 = vld [vmem:[%s13650_s3 + $0x6c0] ss:$16 sps:$4 sm:$0xff]   ;;  %v9070_v48 = vld [vmem:[%s13650_s3 + $0x6ec] ss:$16 sps:$4 sm:$0xff]  }
 0x2a2   :  { %3894 = vmatmul.mubr.bf16.gmra.mrb[100].mxu0 %v11584_v56  ;;  %4007 = vmatmul.mubr.bf16.gmra.mrb[100].mxu1 %v11584_v56 }
 0x2a3   :  { %7579 = vmatprep.mubr.msk.bf16.mxu0 %vm2768_vm3, %v11616_v59  ;;  %7587 = vmatprep.mubr.msk.bf16.mxu1 %vm2768_vm3, %v11616_v59 }
 0x2a4   :  { %4562 = vmatpush1.bf16.msra.mxu1 %v9020_v15  ;;  %4449 = vmatpush1.bf16.msra.mxu0 %v9023_v43  ;;  %v9073_v15 = vld [vmem:[%s13650_s3 + $0x6e4] ss:$16 sps:$4 sm:$0xff]   ;;  %v8516_v43 = vunpack.i.h.bf16 %v11681_v54  ;;  %v9074_v54 = vld [vmem:[%s13650_s3 + $0x708] ss:$16 sps:$4 sm:$0xff]  }
 0x2a5   :  { %4563 = vmatprep.subr.bf16.mxu1 %v9028_v22  ;;  %4450 = vmatprep.subr.bf16.mxu0 %v9031_v49  ;;  %v8511_v22 = vunpack.i.h.bf16 %v11662_v47  ;;  %v9068_v49 = vld [vmem:[%s13650_s3 + $0x6e8] ss:$16 sps:$4 sm:$0xff]   ;;  %v9082_v47 = vld [vmem:[%s13650_s3 + $0x724] ss:$16 sps:$4 sm:$0xff]  }
 0x2a8   :  { %4564 = vmatpush1.bf16.msra.mxu1 %v9026_v4  ;;  %4451 = vmatpush1.bf16.msra.mxu0 %v9029_v19  ;;  %v9071_v4 = vld [vmem:[%s13650_s3 + $0x6e0] ss:$16 sps:$4 sm:$0xff]   ;;  %v9076_v19 = vld [vmem:[%s13650_s3 + $0x70c] ss:$16 sps:$4 sm:$0xff]  }
 0x2a9   :  { %4565 = vmatprep.subr.bf16.mxu1 %v9034_v31  ;;  %4452 = vmatprep.subr.bf16.mxu0 %v9037_v57  ;;  %v9079_v31 = vld [vmem:[%s13650_s3 + $0x704] ss:$16 sps:$4 sm:$0xff]   ;;  %v2403_v57 = vsel %vm1597_vm2, %v8515_v30, %v8516_v43  ;;  %v9077_v30 = vld [vmem:[%s13650_s3 + $0x700] ss:$16 sps:$4 sm:$0xff]   ;;  %v9116_v43 = vld [vmem:[%s13650_s3 + $0x7e8] ss:$16 sps:$4 sm:$0xff]  }
 0x2aa   :  { %3904 = vmatmul.mubr.bf16.gmra.mrb[104].mxu0 %v11618_v7  ;;  %4017 = vmatmul.mubr.bf16.gmra.mrb[104].mxu1 %v11618_v7 }
 0x2ab   :  { %7580 = vmatprep.mubr.msk.bf16.mxu0 %vm2768_vm3, %v11660_v13  ;;  %7588 = vmatprep.mubr.msk.bf16.mxu1 %vm2768_vm3, %v11660_v13 }
 0x2ac   :  { %4566 = vmatpush1.bf16.msra.mxu1 %v9032_v45  ;;  %4453 = vmatpush1.bf16.msra.mxu0 %v9035_v62  ;;  %v2401_v45 = vsel %vm1597_vm2, %v8510_v26, %v8511_v22  ;;  %v2451_v62 = vmax.f32 %v11269_v42, %v2403_v57  ;;  %v9085_v26 = vld [vmem:[%s13650_s3 + $0x72c] ss:$16 sps:$4 sm:$0xff]   ;;  %v9083_v42 = vld [vmem:[%s13650_s3 + $0x728] ss:$16 sps:$4 sm:$0xff]   ;;  %v9119_v22 = vld [vmem:[%s13650_s3 + $0x7e0] ss:$16 sps:$4 sm:$0xff]  }
 0x2ad   :  { %4567 = vmatprep.subr.bf16.mxu1 %v9040_v16  ;;  %4454 = vmatprep.subr.bf16.mxu0 %v9043_v36  ;;  %v2449_v16 = vmax.f32 %v11249_v39, %v2401_v45  ;;  %v9080_v36 = vld [vmem:[%s13650_s3 + $0x720] ss:$16 sps:$4 sm:$0xff]   ;;  %v9091_v39 = vld [vmem:[%s13650_s3 + $0x74c] ss:$16 sps:$4 sm:$0xff]   ;;  %v9133_v45 = vld [vmem:[%s13650_s3 + $0x824] ss:$16 sps:$4 sm:$0xff]  }
 0x2ae   :  { %v9130_v57 = vld [vmem:[%s13650_s3 + $0x82c] ss:$16 sps:$4 sm:$0xff]  }
 0x2b0   :  { %4568 = vmatpush1.bf16.msra.mxu1 %v9038_v37  ;;  %4455 = vmatpush1.bf16.msra.mxu0 %v9041_v21  ;;  %v12180_v37 = vpack.c.bf16 %v2451_v62, %v2449_v16  ;;  %v9088_v21 = vld [vmem:[%s13650_s3 + $0x744] ss:$16 sps:$4 sm:$0xff]   ;;  %v9136_v62 = vld [vmem:[%s13650_s3 + $0x84c] ss:$16 sps:$4 sm:$0xff]   ;;  %v9137_v16 = vld [vmem:[%s13650_s3 + $0x840] ss:$16 sps:$4 sm:$0xff]  }
 0x2b1   :  { %4569 = vmatprep.subr.bf16.mxu1 %v9046_v53  ;;  %4456 = vmatprep.subr.bf16.mxu0 %v9049_v46  ;;  %v9086_v53 = vld [vmem:[%s13650_s3 + $0x740] ss:$16 sps:$4 sm:$0xff]   ;;  %v9089_v46 = vld [vmem:[%s13650_s3 + $0x748] ss:$16 sps:$4 sm:$0xff]  }
 0x2b2   :  { %3914 = vmatmul.mubr.bf16.gmra.mrb[108].mxu0 %v11652_v3  ;;  %4027 = vmatmul.mubr.bf16.gmra.mrb[108].mxu1 %v11652_v3 }
 0x2b3   :  { %7581 = vmatprep.mubr.msk.bf16.mxu0 %vm2768_vm3, %v11418_v2  ;;  %7589 = vmatprep.mubr.msk.bf16.mxu1 %vm2768_vm3, %v11418_v2 }
 0x2b4   :  { %4570 = vmatpush1.bf16.msra.mxu1 %v9044_v12  ;;  %4457 = vmatpush1.bf16.msra.mxu0 %v9047_v23  ;;  %v9094_v12 = vld [vmem:[%s13650_s3 + $0x764] ss:$16 sps:$4 sm:$0xff]   ;;  %v9097_v23 = vld [vmem:[%s13650_s3 + $0x76c] ss:$16 sps:$4 sm:$0xff]  }
 0x2b5   :  { %4571 = vmatprep.subr.bf16.mxu1 %v9052_v18  ;;  %4458 = vmatprep.subr.bf16.mxu0 %v9055_v0  ;;  %v9092_v18 = vld [vmem:[%s13650_s3 + $0x760] ss:$16 sps:$4 sm:$0xff]   ;;  %v9095_v0 = vld [vmem:[%s13650_s3 + $0x768] ss:$16 sps:$4 sm:$0xff]  }
 0x2b8   :  { %4572 = vmatpush1.bf16.msra.mxu1 %v9050_v63  ;;  %4459 = vmatpush1.bf16.msra.mxu0 %v9053_v52  ;;  %v9100_v63 = vld [vmem:[%s13650_s3 + $0x78c] ss:$16 sps:$4 sm:$0xff]   ;;  %v9103_v52 = vld [vmem:[%s13650_s3 + $0x784] ss:$16 sps:$4 sm:$0xff]  }
 0x2b9   :  { %4573 = vmatprep.subr.bf16.mxu1 %v9058_v1  ;;  %4460 = vmatprep.subr.bf16.mxu0 %v9061_v32  ;;  %v9098_v1 = vld [vmem:[%s13650_s3 + $0x788] ss:$16 sps:$4 sm:$0xff]   ;;  %v9101_v32 = vld [vmem:[%s13650_s3 + $0x780] ss:$16 sps:$4 sm:$0xff]  }
 0x2ba   :  { %3924 = vmatmul.mubr.bf16.gmra.mrb[112].mxu0 %v11428_v10  ;;  %4037 = vmatmul.mubr.bf16.gmra.mrb[112].mxu1 %v11428_v10 }
 0x2bb   :  { %7582 = vmatprep.mubr.msk.bf16.mxu0 %vm2768_vm3, %v11460_v38  ;;  %7590 = vmatprep.mubr.msk.bf16.mxu1 %vm2768_vm3, %v11460_v38 }
 0x2bc   :  { %4574 = vmatpush1.bf16.msra.mxu1 %v9056_v44  ;;  %4461 = vmatpush1.bf16.msra.mxu0 %v9059_v29  ;;  %v9106_v44 = vld [vmem:[%s13650_s3 + $0x7ac] ss:$16 sps:$4 sm:$0xff]   ;;  %v9104_v29 = vld [vmem:[%s13650_s3 + $0x7a8] ss:$16 sps:$4 sm:$0xff]  }
 0x2bd   :  { %4575 = vmatprep.subr.bf16.mxu1 %v9064_v6  ;;  %4462 = vmatprep.subr.bf16.mxu0 %v9067_v34  ;;  %v9107_v6 = vld [vmem:[%s13650_s3 + $0x7a0] ss:$16 sps:$4 sm:$0xff]   ;;  %v9115_v34 = vld [vmem:[%s13650_s3 + $0x7c4] ss:$16 sps:$4 sm:$0xff]  }
 0x2c0   :  { %4576 = vmatpush1.bf16.msra.mxu1 %v9062_v33  ;;  %4463 = vmatpush1.bf16.msra.mxu0 %v9065_v28  ;;  %v9110_v33 = vld [vmem:[%s13650_s3 + $0x7c8] ss:$16 sps:$4 sm:$0xff]   ;;  %v9113_v28 = vld [vmem:[%s13650_s3 + $0x7c0] ss:$16 sps:$4 sm:$0xff]  }
 0x2c1   :  { %4577 = vmatprep.subr.bf16.mxu1 %v9070_v48  ;;  %4464 = vmatprep.subr.bf16.mxu0 %v9073_v15  ;;  %v9118_v48 = vld [vmem:[%s13650_s3 + $0x7ec] ss:$16 sps:$4 sm:$0xff]   ;;  %v9121_v15 = vld [vmem:[%s13650_s3 + $0x7e4] ss:$16 sps:$4 sm:$0xff]  }
 0x2c2   :  { %3934 = vmatmul.mubr.bf16.gmra.mrb[116].mxu0 %v11470_v14  ;;  %4047 = vmatmul.mubr.bf16.gmra.mrb[116].mxu1 %v11470_v14 }
 0x2c3   :  { %7583 = vmatprep.mubr.msk.bf16.mxu0 %vm2768_vm3, %v11502_v41  ;;  %7591 = vmatprep.mubr.msk.bf16.mxu1 %vm2768_vm3, %v11502_v41 }
 0x2c4   :  { %4578 = vmatpush1.bf16.msra.mxu1 %v9068_v49  ;;  %4465 = vmatpush1.bf16.msra.mxu0 %v9071_v4  ;;  %v9124_v49 = vld [vmem:[%s13650_s3 + $0x80c] ss:$16 sps:$4 sm:$0xff]   ;;  %v9127_v4 = vld [vmem:[%s13650_s3 + $0x804] ss:$16 sps:$4 sm:$0xff]  }
 0x2c5   :  { %4579 = vmatprep.subr.bf16.mxu1 %v9076_v19  ;;  %4466 = vmatprep.subr.bf16.mxu0 %v9079_v31  ;;  %v9122_v19 = vld [vmem:[%s13650_s3 + $0x808] ss:$16 sps:$4 sm:$0xff]   ;;  %v9125_v31 = vld [vmem:[%s13650_s3 + $0x800] ss:$16 sps:$4 sm:$0xff]  }
 0x2c8   :  { %4580 = vmatpush1.bf16.msra.mxu1 %v9074_v54  ;;  %4467 = vmatpush1.bf16.msra.mxu0 %v9077_v30  ;;  %v9128_v54 = vld [vmem:[%s13650_s3 + $0x828] ss:$16 sps:$4 sm:$0xff]   ;;  %v9131_v30 = vld [vmem:[%s13650_s3 + $0x820] ss:$16 sps:$4 sm:$0xff]  }
 0x2c9   :  { %4468 = vmatprep.subr.bf16.mxu0 %v9082_v47  ;;  %4581 = vmatprep.subr.bf16.mxu1 %v9085_v26  ;;  %v9139_v47 = vld [vmem:[%s13650_s3 + $0x844] ss:$16 sps:$4 sm:$0xff]   ;;  %v9134_v26 = vld [vmem:[%s13650_s3 + $0x848] ss:$16 sps:$4 sm:$0xff]  }
 0x2ca   :  { %3944 = vmatmul.mubr.bf16.gmra.mrb[120].mxu0 %v11513_v60  ;;  %4057 = vmatmul.mubr.bf16.gmra.mrb[120].mxu1 %v11513_v60 }
 0x2cb   :  { %7584 = vmatprep.mubr.msk.bf16.mxu0 %vm2768_vm3, %v12180_v37  ;;  %7592 = vmatprep.mubr.msk.bf16.mxu1 %vm2768_vm3, %v12180_v37 }
 0x2cc   :  { %4469 = vmatpush1.bf16.msra.mxu0 %v9080_v36  ;;  %4582 = vmatpush1.bf16.msra.mxu1 %v9083_v42  ;;  %v9142_v36 = vld [vmem:[%s13650_s3 + $0x86c] ss:$16 sps:$4 sm:$0xff]   ;;  %v9145_v42 = vld [vmem:[%s13650_s3 + $0x864] ss:$16 sps:$4 sm:$0xff]  }
 0x2cd   :  { %4470 = vmatprep.subr.bf16.mxu0 %v9088_v21  ;;  %4583 = vmatprep.subr.bf16.mxu1 %v9091_v39  ;;  %v9140_v21 = vld [vmem:[%s13650_s3 + $0x868] ss:$16 sps:$4 sm:$0xff]   ;;  %v9143_v39 = vld [vmem:[%s13650_s3 + $0x860] ss:$16 sps:$4 sm:$0xff]  }
 0x2d0   :  { %4471 = vmatpush1.bf16.msra.mxu0 %v9086_v53  ;;  %4584 = vmatpush1.bf16.msra.mxu1 %v9089_v46  ;;  %v9148_v53 = vld [vmem:[%s13650_s3 + $0x88c] ss:$16 sps:$4 sm:$0xff]   ;;  %v9151_v46 = vld [vmem:[%s13650_s3 + $0x884] ss:$16 sps:$4 sm:$0xff]  }
 0x2d1   :  { %4472 = vmatprep.subr.bf16.mxu0 %v9094_v12  ;;  %4585 = vmatprep.subr.bf16.mxu1 %v9097_v23  ;;  %v9146_v12 = vld [vmem:[%s13650_s3 + $0x888] ss:$16 sps:$4 sm:$0xff]   ;;  %v9149_v23 = vld [vmem:[%s13650_s3 + $0x880] ss:$16 sps:$4 sm:$0xff]  }
 0x2d2   :  { %3954 = vmatmul.mubr.bf16.gmra.mrb[124].mxu0 %v11726_v50  ;;  %4067 = vmatmul.mubr.bf16.gmra.mrb[124].mxu1 %v11726_v50 }
 0x2d3   :  { %7653 = vmatprep.mubr.msk.bf16.mxu0 %vm2768_vm3, %v11418_v2  ;;  %7661 = vmatprep.mubr.msk.bf16.mxu1 %vm2768_vm3, %v11418_v2  ;;  %v9109_v2 = vld [vmem:[%s13650_s3 + $0x7a4] ss:$16 sps:$4 sm:$0xff]  }
 0x2d4   :  { %4473 = vmatpush1.bf16.msra.mxu0 %v9092_v18  ;;  %4586 = vmatpush1.bf16.msra.mxu1 %v9095_v0  ;;  %v9154_v18 = vld [vmem:[%s13650_s3 + $0x8ac] ss:$16 sps:$4 sm:$0xff]   ;;  %v9157_v0 = vld [vmem:[%s13650_s3 + $0x8a4] ss:$16 sps:$4 sm:$0xff]  }
 0x2d5   :  { %5150 = vmatprep.subr.bf16.mxu1 %v9100_v63  ;;  %5037 = vmatprep.subr.bf16.mxu0 %v9103_v52  ;;  %v9152_v63 = vld [vmem:[%s13650_s3 + $0x8a8] ss:$16 sps:$4 sm:$0xff]   ;;  %v9155_v52 = vld [vmem:[%s13650_s3 + $0x8a0] ss:$16 sps:$4 sm:$0xff]  }
 0x2da   :  { %4477 = vmatmul.mubr.bf16.vlgmr.msra.gmra.mrb[96].mxu0 %v11428_v10  ;;  %4590 = vmatmul.mubr.bf16.vlgmr.msra.gmra.mrb[96].mxu1 %v11428_v10  ;;  %v9112_v10 = vld [vmem:[%s13650_s3 + $0x7cc] ss:$16 sps:$4 sm:$0xff]  }
 0x2db   :  { %7654 = vmatprep.mubr.msk.bf16.mxu0 %vm2768_vm3, %v11460_v38  ;;  %7662 = vmatprep.mubr.msk.bf16.mxu1 %vm2768_vm3, %v11460_v38 }
 0x2dc   :  { %5151 = vmatpush1.bf16.msra.mxu1 %v9098_v1  ;;  %5038 = vmatpush1.bf16.msra.mxu0 %v9101_v32  ;;  %v9160_v1 = vld [vmem:[%s13650_s3 + $0x8cc] ss:$16 sps:$4 sm:$0xff]   ;;  %v9163_v32 = vld [vmem:[%s13650_s3 + $0x8c4] ss:$16 sps:$4 sm:$0xff]  }
 0x2dd   :  { %5152 = vmatprep.subr.bf16.mxu1 %v9106_v44  ;;  %5039 = vmatprep.subr.bf16.mxu0 %v9109_v2  ;;  %v8531_v44 = vunpack.i.h.bf16 %v11716_v27  ;;  %v8526_v2 = vunpack.i.h.bf16 %v11700_v61  ;;  %v9164_v27 = vld [vmem:[%s13650_s3 + $0x8e8] ss:$16 sps:$4 sm:$0xff]   ;;  %v9172_v61 = vld [vmem:[%s13650_s3 + $0x904] ss:$16 sps:$4 sm:$0xff]  }
 0x2e0   :  { %5153 = vmatpush1.bf16.msra.mxu1 %v9104_v29  ;;  %5040 = vmatpush1.bf16.msra.mxu0 %v9107_v6  ;;  %v9158_v29 = vld [vmem:[%s13650_s3 + $0x8c8] ss:$16 sps:$4 sm:$0xff]   ;;  %v9161_v6 = vld [vmem:[%s13650_s3 + $0x8c0] ss:$16 sps:$4 sm:$0xff]  }
 0x2e1   :  { %5154 = vmatprep.subr.bf16.mxu1 %v9112_v10  ;;  %5041 = vmatprep.subr.bf16.mxu0 %v9115_v34  ;;  %v9166_v10 = vld [vmem:[%s13650_s3 + $0x8ec] ss:$16 sps:$4 sm:$0xff]   ;;  %v9169_v34 = vld [vmem:[%s13650_s3 + $0x8e4] ss:$16 sps:$4 sm:$0xff]  }
 0x2e2   :  { %4487 = vmatmul.mubr.bf16.gmra.mrb[100].mxu0 %v11470_v14  ;;  %4600 = vmatmul.mubr.bf16.gmra.mrb[100].mxu1 %v11470_v14 }
 0x2e3   :  { %7655 = vmatprep.mubr.msk.bf16.mxu0 %vm2768_vm3, %v11502_v41  ;;  %7663 = vmatprep.mubr.msk.bf16.mxu1 %vm2768_vm3, %v11502_v41 }
 0x2e4   :  { %5155 = vmatpush1.bf16.msra.mxu1 %v9110_v33  ;;  %5042 = vmatpush1.bf16.msra.mxu0 %v9113_v28  ;;  %v1621_v33 = vsel %vm1597_vm2, %v8530_v5, %v8531_v44  ;;  %v1619_v28 = vsel %vm1597_vm2, %v8525_v58, %v8526_v2  ;;  %v9167_v5 = vld [vmem:[%s13650_s3 + $0x8e0] ss:$16 sps:$4 sm:$0xff]   ;;  %v9175_v58 = vld [vmem:[%s13650_s3 + $0x90c] ss:$16 sps:$4 sm:$0xff]   ;;  %v9238_v44 = vld [vmem:[%s13651_s5 + $0x294] ss:$16 sps:$4 sm:$0xff]  }
 0x2e5   :  { %5156 = vmatprep.subr.bf16.mxu1 %v9118_v48  ;;  %5043 = vmatprep.subr.bf16.mxu0 %v9121_v15  ;;  %v1669_v48 = vmax.f32 %v13928_v11, %v1621_v33  ;;  %v1667_v15 = vmax.f32 %v13927_v51, %v1619_v28  ;;  %v9173_v11 = vld [vmem:[%s13650_s3 + $0x908] ss:$16 sps:$4 sm:$0xff]   ;;  %v9181_v51 = vld [vmem:[%s13650_s3 + $0x92c] ss:$16 sps:$4 sm:$0xff]   ;;  %v9242_v33 = vld [vmem:[%s13651_s5 + $0x2b0] ss:$16 sps:$4 sm:$0xff]  }
 0x2e6   :  { %v9241_v2 = vld [vmem:[%s13651_s5 + $0x29c] ss:$16 sps:$4 sm:$0xff]   ;;  %v9250_v28 = vld [vmem:[%s13651_s5 + $0x2d4] ss:$16 sps:$4 sm:$0xff]  }
 0x2e8   :  { %5157 = vmatpush1.bf16.msra.mxu1 %v9116_v43  ;;  %5044 = vmatpush1.bf16.msra.mxu0 %v9119_v22  ;;  %v9170_v43 = vld [vmem:[%s13650_s3 + $0x900] ss:$16 sps:$4 sm:$0xff]   ;;  %v1681_v22 = vpack.c.bf16 %v1669_v48, %v1667_v15 }
 0x2e9   :  { %5158 = vmatprep.subr.bf16.mxu1 %v9124_v49  ;;  %5045 = vmatprep.subr.bf16.mxu0 %v9127_v4  ;;  %v9178_v49 = vld [vmem:[%s13650_s3 + $0x924] ss:$16 sps:$4 sm:$0xff]   ;;  %v9176_v4 = vld [vmem:[%s13650_s3 + $0x920] ss:$16 sps:$4 sm:$0xff]  }
 0x2ea   :  { %4497 = vmatmul.mubr.bf16.gmra.mrb[104].mxu0 %v11513_v60  ;;  %4610 = vmatmul.mubr.bf16.gmra.mrb[104].mxu1 %v11513_v60  ;;  %v9248_v48 = vld [vmem:[%s13651_s5 + $0x2d0] ss:$16 sps:$4 sm:$0xff]  }
 0x2eb   :  { %7656 = vmatprep.mubr.msk.bf16.mxu0 %vm2768_vm3, %v12180_v37  ;;  %7664 = vmatprep.mubr.msk.bf16.mxu1 %vm2768_vm3, %v12180_v37 }
 0x2ec   :  { %5159 = vmatpush1.bf16.msra.mxu1 %v9122_v19  ;;  %5046 = vmatpush1.bf16.msra.mxu0 %v9125_v31  ;;  %v9179_v19 = vld [vmem:[%s13650_s3 + $0x928] ss:$16 sps:$4 sm:$0xff]   ;;  %v9184_v31 = vld [vmem:[%s13650_s3 + $0x944] ss:$16 sps:$4 sm:$0xff]  }
 0x2ed   :  { %5160 = vmatprep.subr.bf16.mxu1 %v9130_v57  ;;  %5047 = vmatprep.subr.bf16.mxu0 %v9133_v45  ;;  %v9187_v57 = vld [vmem:[%s13650_s3 + $0x94c] ss:$16 sps:$4 sm:$0xff]   ;;  %v9182_v45 = vld [vmem:[%s13650_s3 + $0x940] ss:$16 sps:$4 sm:$0xff]  }
 0x2f0   :  { %5161 = vmatpush1.bf16.msra.mxu1 %v9128_v54  ;;  %5048 = vmatpush1.bf16.msra.mxu0 %v9131_v30  ;;  %v9185_v54 = vld [vmem:[%s13650_s3 + $0x948] ss:$16 sps:$4 sm:$0xff]   ;;  %v9214_v30 = vld [vmem:[%s13651_s5 + $0x1fc] ss:$16 sps:$4 sm:$0xff]  }
 0x2f1   :  { %5162 = vmatprep.subr.bf16.mxu1 %v9136_v62  ;;  %5049 = vmatprep.subr.bf16.mxu0 %v9139_v47  ;;  %v9203_v62 = vld [vmem:[%s13651_s5 + $0x1f0] ss:$16 sps:$4 sm:$0xff]   ;;  %v9211_v47 = vld [vmem:[%s13651_s5 + $0x214] ss:$16 sps:$4 sm:$0xff]  }
 0x2f2   :  { %4507 = vmatmul.mubr.bf16.gmra.mrb[108].mxu0 %v11726_v50  ;;  %4620 = vmatmul.mubr.bf16.gmra.mrb[108].mxu1 %v11726_v50 }
 0x2f3   :  { %7657 = vmatprep.mubr.msk.bf16.mxu0 %vm2768_vm3, %v11572_v40  ;;  %7665 = vmatprep.mubr.msk.bf16.mxu1 %vm2768_vm3, %v11572_v40 }
 0x2f4   :  { %5163 = vmatpush1.bf16.msra.mxu1 %v9134_v26  ;;  %5050 = vmatpush1.bf16.msra.mxu0 %v9137_v16  ;;  %v9212_v26 = vld [vmem:[%s13651_s5 + $0x1f8] ss:$16 sps:$4 sm:$0xff]   ;;  %v9220_v16 = vld [vmem:[%s13651_s5 + $0x21c] ss:$16 sps:$4 sm:$0xff]  }
 0x2f5   :  { %5164 = vmatprep.subr.bf16.mxu1 %v9142_v36  ;;  %5051 = vmatprep.subr.bf16.mxu0 %v9145_v42  ;;  %v9209_v36 = vld [vmem:[%s13651_s5 + $0x210] ss:$16 sps:$4 sm:$0xff]   ;;  %v9217_v42 = vld [vmem:[%s13651_s5 + $0x234] ss:$16 sps:$4 sm:$0xff]  }
 0x2f8   :  { %5165 = vmatpush1.bf16.msra.mxu1 %v9140_v21  ;;  %5052 = vmatpush1.bf16.msra.mxu0 %v9143_v39  ;;  %v9218_v21 = vld [vmem:[%s13651_s5 + $0x218] ss:$16 sps:$4 sm:$0xff]   ;;  %v9226_v39 = vld [vmem:[%s13651_s5 + $0x23c] ss:$16 sps:$4 sm:$0xff]  }
 0x2f9   :  { %5166 = vmatprep.subr.bf16.mxu1 %v9148_v53  ;;  %5053 = vmatprep.subr.bf16.mxu0 %v9151_v46  ;;  %v9215_v53 = vld [vmem:[%s13651_s5 + $0x230] ss:$16 sps:$4 sm:$0xff]   ;;  %v9223_v46 = vld [vmem:[%s13651_s5 + $0x254] ss:$16 sps:$4 sm:$0xff]  }
 0x2fa   :  { %4517 = vmatmul.mubr.bf16.gmra.mrb[112].mxu0 %v11584_v56  ;;  %4630 = vmatmul.mubr.bf16.gmra.mrb[112].mxu1 %v11584_v56 }
 0x2fb   :  { %7658 = vmatprep.mubr.msk.bf16.mxu0 %vm2768_vm3, %v11616_v59  ;;  %7666 = vmatprep.mubr.msk.bf16.mxu1 %vm2768_vm3, %v11616_v59 }
 0x2fc   :  { %5167 = vmatpush1.bf16.msra.mxu1 %v9146_v12  ;;  %5054 = vmatpush1.bf16.msra.mxu0 %v9149_v23  ;;  %v9224_v12 = vld [vmem:[%s13651_s5 + $0x238] ss:$16 sps:$4 sm:$0xff]   ;;  %v9232_v23 = vld [vmem:[%s13651_s5 + $0x25c] ss:$16 sps:$4 sm:$0xff]  }
 0x2fd   :  { %5168 = vmatprep.subr.bf16.mxu1 %v9154_v18  ;;  %5055 = vmatprep.subr.bf16.mxu0 %v9157_v0  ;;  %v9221_v18 = vld [vmem:[%s13651_s5 + $0x250] ss:$16 sps:$4 sm:$0xff]   ;;  %v9229_v0 = vld [vmem:[%s13651_s5 + $0x274] ss:$16 sps:$4 sm:$0xff]  }
 0x300   :  { %5169 = vmatpush1.bf16.msra.mxu1 %v9152_v63  ;;  %5056 = vmatpush1.bf16.msra.mxu0 %v9155_v52  ;;  %v9230_v63 = vld [vmem:[%s13651_s5 + $0x258] ss:$16 sps:$4 sm:$0xff]   ;;  %v9227_v52 = vld [vmem:[%s13651_s5 + $0x270] ss:$16 sps:$4 sm:$0xff]  }
 0x301   :  { %5170 = vmatprep.subr.bf16.mxu1 %v9160_v1  ;;  %5057 = vmatprep.subr.bf16.mxu0 %v9163_v32  ;;  %v9235_v1 = vld [vmem:[%s13651_s5 + $0x27c] ss:$16 sps:$4 sm:$0xff]   ;;  %v9233_v32 = vld [vmem:[%s13651_s5 + $0x278] ss:$16 sps:$4 sm:$0xff]  }
 0x302   :  { %4527 = vmatmul.mubr.bf16.gmra.mrb[116].mxu0 %v11618_v7  ;;  %4640 = vmatmul.mubr.bf16.gmra.mrb[116].mxu1 %v11618_v7 }
 0x303   :  { %7659 = vmatprep.mubr.msk.bf16.mxu0 %vm2768_vm3, %v11660_v13  ;;  %7667 = vmatprep.mubr.msk.bf16.mxu1 %vm2768_vm3, %v11660_v13 }
 0x304   :  { %5171 = vmatpush1.bf16.msra.mxu1 %v9158_v29  ;;  %5058 = vmatpush1.bf16.msra.mxu0 %v9161_v6  ;;  %v9236_v29 = vld [vmem:[%s13651_s5 + $0x290] ss:$16 sps:$4 sm:$0xff]   ;;  %v9244_v6 = vld [vmem:[%s13651_s5 + $0x2b4] ss:$16 sps:$4 sm:$0xff]  }
 0x305   :  { %5172 = vmatprep.subr.bf16.mxu1 %v9166_v10  ;;  %5059 = vmatprep.subr.bf16.mxu0 %v9169_v34  ;;  %v9239_v10 = vld [vmem:[%s13651_s5 + $0x298] ss:$16 sps:$4 sm:$0xff]   ;;  %v9247_v34 = vld [vmem:[%s13651_s5 + $0x2bc] ss:$16 sps:$4 sm:$0xff]  }
 0x308   :  { %5173 = vmatpush1.bf16.msra.mxu1 %v9164_v27  ;;  %5060 = vmatpush1.bf16.msra.mxu0 %v9167_v5  ;;  %v9245_v27 = vld [vmem:[%s13651_s5 + $0x2b8] ss:$16 sps:$4 sm:$0xff]   ;;  %v9253_v5 = vld [vmem:[%s13651_s5 + $0x2dc] ss:$16 sps:$4 sm:$0xff]  }
 0x309   :  { %5061 = vmatprep.subr.bf16.mxu0 %v9172_v61  ;;  %5174 = vmatprep.subr.bf16.mxu1 %v9175_v58  ;;  %v9251_v61 = vld [vmem:[%s13651_s5 + $0x2d8] ss:$16 sps:$4 sm:$0xff]  }
 0x30a   :  { %4537 = vmatmul.mubr.bf16.gmra.mrb[120].mxu0 %v11652_v3  ;;  %4650 = vmatmul.mubr.bf16.gmra.mrb[120].mxu1 %v11652_v3 }
 0x30b   :  { %7660 = vmatprep.mubr.msk.bf16.mxu0 %vm2768_vm3, %v1681_v22  ;;  %7668 = vmatprep.mubr.msk.bf16.mxu1 %vm2768_vm3, %v1681_v22 }
 0x30c   :  { %5062 = vmatpush1.bf16.msra.mxu0 %v9170_v43  ;;  %5175 = vmatpush1.bf16.msra.mxu1 %v9173_v11 }
 0x30d   :  { %5063 = vmatprep.subr.bf16.mxu0 %v9178_v49  ;;  %5176 = vmatprep.subr.bf16.mxu1 %v9181_v51 }
 0x310   :  { %5064 = vmatpush1.bf16.msra.mxu0 %v9176_v4  ;;  %5177 = vmatpush1.bf16.msra.mxu1 %v9179_v19 }
 0x311   :  { %5065 = vmatprep.subr.bf16.mxu0 %v9184_v31  ;;  %5178 = vmatprep.subr.bf16.mxu1 %v9187_v57 }
 0x312   :  { %4547 = vmatmul.mubr.bf16.gmra.mrb[124].mxu0 %v11756_v35  ;;  %4660 = vmatmul.mubr.bf16.gmra.mrb[124].mxu1 %v11756_v35 }
 0x313   :  { %7729 = vmatprep.mubr.msk.bf16.mxu0 %vm2768_vm3, %v11572_v40  ;;  %7737 = vmatprep.mubr.msk.bf16.mxu1 %vm2768_vm3, %v11572_v40  ;;  %v8546_v40 = vunpack.i.h.bf16 %v11742_v17  ;;  %v9200_v17 = vld [vmem:[%s13651_s5 + $0x1b8] ss:$16 sps:$4 sm:$0xff]  }
 0x314   :  { %5066 = vmatpush1.bf16.msra.mxu0 %v9182_v45  ;;  %5179 = vmatpush1.bf16.msra.mxu1 %v9185_v54 }
 0x31a   :  { %5070 = vmatmul.mubr.bf16.vlgmr.msra.gmra.mrb[96].mxu0 %v11584_v56  ;;  %5183 = vmatmul.mubr.bf16.vlgmr.msra.gmra.mrb[96].mxu1 %v11584_v56  ;;  %v8541_v56 = vunpack.i.h.bf16 %v11732_v24  ;;  %v9199_v24 = vld [vmem:[%s13651_s5 + $0x1d4] ss:$16 sps:$4 sm:$0xff]  }
 0x31b   :  { %7730 = vmatprep.mubr.msk.bf16.mxu0 %vm2768_vm3, %v11616_v59  ;;  %7738 = vmatprep.mubr.msk.bf16.mxu1 %vm2768_vm3, %v11616_v59  ;;  %v2407_v59 = vsel %vm1597_vm2, %v8545_v8, %v8546_v40  ;;  %v9205_v8 = vld [vmem:[%s13651_s5 + $0x1f4] ss:$16 sps:$4 sm:$0xff]  }
 0x322   :  { %5080 = vmatmul.mubr.bf16.gmra.mrb[100].mxu0 %v11618_v7  ;;  %5193 = vmatmul.mubr.bf16.gmra.mrb[100].mxu1 %v11618_v7 }
 0x323   :  { %7731 = vmatprep.mubr.msk.bf16.mxu0 %vm2768_vm3, %v11660_v13  ;;  %7739 = vmatprep.mubr.msk.bf16.mxu1 %vm2768_vm3, %v11660_v13  ;;  %v9196_v13 = vld [vmem:[%s13651_s5 + $0x19c] ss:$16 sps:$4 sm:$0xff]  }
 0x324   :  { %5883 = vmatprep.subr.bf16.mxu1 %v9196_v13 }
 0x32a   :  { %5090 = vmatmul.mubr.bf16.gmra.mrb[104].mxu0 %v11652_v3  ;;  %5203 = vmatmul.mubr.bf16.gmra.mrb[104].mxu1 %v11652_v3  ;;  %v9194_v3 = vld [vmem:[%s13651_s5 + $0x198] ss:$16 sps:$4 sm:$0xff]  }
 0x32b   :  { %7732 = vmatprep.mubr.msk.bf16.mxu0 %vm2768_vm3, %v1681_v22  ;;  %7740 = vmatprep.mubr.msk.bf16.mxu1 %vm2768_vm3, %v1681_v22 }
 0x32c   :  { %5884 = vmatpush1.bf16.msra.mxu1 %v9194_v3 }
 0x332   :  { %5100 = vmatmul.mubr.bf16.gmra.mrb[108].mxu0 %v11756_v35  ;;  %5213 = vmatmul.mubr.bf16.gmra.mrb[108].mxu1 %v11756_v35  ;;  %v9202_v35 = vld [vmem:[%s13651_s5 + $0x1bc] ss:$16 sps:$4 sm:$0xff]  }
 0x333   :  { %7733 = vmatprep.mubr.msk.bf16.mxu0 %vm2768_vm3, %v11460_v38  ;;  %7741 = vmatprep.mubr.msk.bf16.mxu1 %vm2768_vm3, %v11460_v38  ;;  %v2405_v38 = vsel %vm1597_vm2, %v8540_v20, %v8541_v56  ;;  %v9197_v20 = vld [vmem:[%s13651_s5 + $0x1d0] ss:$16 sps:$4 sm:$0xff]  }
 0x334   :  { %5885 = vmatprep.subr.bf16.mxu1 %v9202_v35 }
 0x335   :  { %5886 = vmatpush1.bf16.msra.mxu1 %v9200_v17 }
 0x33a   :  { %5110 = vmatmul.mubr.bf16.gmra.mrb[112].mxu0 %v11470_v14  ;;  %5223 = vmatmul.mubr.bf16.gmra.mrb[112].mxu1 %v11470_v14  ;;  %v2455_v14 = vmax.f32 %v11313_v9, %v2407_v59  ;;  %v9193_v9 = vld [vmem:[%s13651_s5 + $0x1b4] ss:$16 sps:$4 sm:$0xff]  }
 0x33b   :  { %7734 = vmatprep.mubr.msk.bf16.mxu0 %vm2768_vm3, %v11502_v41  ;;  %7742 = vmatprep.mubr.msk.bf16.mxu1 %vm2768_vm3, %v11502_v41  ;;  %v2453_v41 = vmax.f32 %v11303_v55, %v2405_v38  ;;  %v9190_v55 = vld [vmem:[%s13651_s5 + $0x194] ss:$16 sps:$4 sm:$0xff]  }
 0x33c   :  { %5840 = vmatprep.subr.bf16.mxu0 %v9190_v55 }
 0x33d   :  { %v2467_v7 = vpack.c.bf16 %v2455_v14, %v2453_v41 }
 0x342   :  { %5120 = vmatmul.mubr.bf16.gmra.mrb[116].mxu0 %v11513_v60  ;;  %5233 = vmatmul.mubr.bf16.gmra.mrb[116].mxu1 %v11513_v60  ;;  %v9188_v60 = vld [vmem:[%s13651_s5 + $0x190] ss:$16 sps:$4 sm:$0xff]  }
 0x343   :  { %7735 = vmatprep.mubr.msk.bf16.mxu0 %vm2768_vm3, %v12180_v37  ;;  %7743 = vmatprep.mubr.msk.bf16.mxu1 %vm2768_vm3, %v12180_v37  ;;  %v9206_v37 = vld [vmem:[%s13651_s5 + $0x1d8] ss:$16 sps:$4 sm:$0xff]  }
 0x344   :  { %5841 = vmatpush1.bf16.msra.mxu0 %v9188_v60 }
 0x345   :  { %5842 = vmatprep.subr.bf16.mxu0 %v9193_v9 }
 0x34a   :  { %5130 = vmatmul.mubr.bf16.gmra.mrb[120].mxu0 %v11726_v50  ;;  %5243 = vmatmul.mubr.bf16.gmra.mrb[120].mxu1 %v11726_v50  ;;  %v9191_v50 = vld [vmem:[%s13651_s5 + $0x1b0] ss:$16 sps:$4 sm:$0xff]  }
 0x34b   :  { %7736 = vmatprep.mubr.msk.bf16.mxu0 %vm2768_vm3, %v2467_v7  ;;  %7744 = vmatprep.mubr.msk.bf16.mxu1 %vm2768_vm3, %v2467_v7 }
 0x34c   :  { %5843 = vmatpush1.bf16.msra.mxu0 %v9191_v50 }
 0x34d   :  { %5844 = vmatprep.subr.bf16.mxu0 %v9199_v24 }
 0x350   :  { %5845 = vmatpush1.bf16.msra.mxu0 %v9197_v20 }
 0x351   :  { %5846 = vmatprep.subr.bf16.mxu0 %v9205_v8 }
 0x352   :  { %5140 = vmatmul.mubr.bf16.gmra.mrb[124].mxu0 %v11784_v25  ;;  %5253 = vmatmul.mubr.bf16.gmra.mrb[124].mxu1 %v11784_v25  ;;  %v9208_v25 = vld [vmem:[%s13651_s5 + $0x1dc] ss:$16 sps:$4 sm:$0xff]  }
 0x353   :  { %5887 = vmatprep.subr.bf16.mxu1 %v9208_v25 }
 0x354   :  { %5888 = vmatpush1.bf16.msra.mxu1 %v9206_v37  ;;  %5847 = vmatpush1.bf16.msra.mxu0 %v9203_v62  ;;  %v418_v37 = vld [vmem:[%s13652_s4] sm:$0xf] }
 0x355   :  { %5889 = vmatprep.subr.bf16.mxu1 %v9214_v30  ;;  %5848 = vmatprep.subr.bf16.mxu0 %v9211_v47  ;;  %v13941_v30 = vld [vmem:[#allocation3_spill] sm:$0xff]  ;;  %v13942_v47 = vld [vmem:[#allocation2_spill] sm:$0xff] }
 0x356   :  { %v12692_v62 = vrot.slane %v418_v37, %v13941_v30 }
 0x358   :  { %5890 = vmatpush1.bf16.msra.mxu1 %v9212_v26  ;;  %5849 = vmatpush1.bf16.msra.mxu0 %v9209_v36  ;;  %v12695_v26 = vrot.slane %v418_v37, %v13942_v47 }
 0x359   :  { %5891 = vmatprep.subr.bf16.mxu1 %v9220_v16  ;;  %5850 = vmatprep.subr.bf16.mxu0 %v9217_v42  ;;  %v13943_v42 = vld [vmem:[#allocation4_spill] sm:$0xff] }
 0x35c   :  { %5892 = vmatpush1.bf16.msra.mxu1 %v9218_v21  ;;  %5851 = vmatpush1.bf16.msra.mxu0 %v9215_v53  ;;  %v12698_v21 = vrot.slane %v418_v37, %v13943_v42 }
 0x35d   :  { %5893 = vmatprep.subr.bf16.mxu1 %v9226_v39  ;;  %5852 = vmatprep.subr.bf16.mxu0 %v9223_v46 }
 0x360   :  { %5894 = vmatpush1.bf16.msra.mxu1 %v9224_v12  ;;  %5853 = vmatpush1.bf16.msra.mxu0 %v9221_v18 }
 0x361   :  { %5895 = vmatprep.subr.bf16.mxu1 %v9232_v23  ;;  %5854 = vmatprep.subr.bf16.mxu0 %v9229_v0 }
 0x364   :  { %5896 = vmatpush1.bf16.msra.mxu1 %v9230_v63  ;;  %5855 = vmatpush1.bf16.msra.mxu0 %v9227_v52 }
 0x365   :  { %5897 = vmatprep.subr.bf16.mxu1 %v9235_v1  ;;  %5856 = vmatprep.subr.bf16.mxu0 %v9238_v44 }
 0x368   :  { %5898 = vmatpush1.bf16.msra.mxu1 %v9233_v32  ;;  %5857 = vmatpush1.bf16.msra.mxu0 %v9236_v29 }
 0x369   :  { %5899 = vmatprep.subr.bf16.mxu1 %v9241_v2  ;;  %5858 = vmatprep.subr.bf16.mxu0 %v9244_v6 }
 0x36c   :  { %5900 = vmatpush1.bf16.msra.mxu1 %v9239_v10  ;;  %5859 = vmatpush1.bf16.msra.mxu0 %v9242_v33 }
 0x36d   :  { %5901 = vmatprep.subr.bf16.mxu1 %v9247_v34  ;;  %5860 = vmatprep.subr.bf16.mxu0 %v9250_v28 }
 0x370   :  { %5902 = vmatpush1.bf16.msra.mxu1 %v9245_v27  ;;  %5861 = vmatpush1.bf16.msra.mxu0 %v9248_v48  ;;  %v9259_v48 = vld [vmem:[%s13651_s5 + $0x2fc] ss:$16 sps:$4 sm:$0xff]  }
 0x371   :  { %5903 = vmatprep.subr.bf16.mxu1 %v9253_v5  ;;  %v9256_v5 = vld [vmem:[%s13651_s5 + $0x2f4] ss:$16 sps:$4 sm:$0xff]  }
 0x372   :  { %5862 = vmatprep.subr.bf16.mxu0 %v9256_v5 }
 0x374   :  { %5904 = vmatpush1.bf16.msra.mxu1 %v9251_v61 }
 0x375   :  { %5905 = vmatprep.subr.bf16.mxu1 %v9259_v48 }
 0x3ed   :  { %v5071_v58 = vpop.f32.mrb[96].mxu0  ;;  %v5184_v15 = vpop.f32.mrb[96].mxu1 }
 0x3ee   :  { %v12636_v43 = vpop.f32.mrb[97].mxu0  ;;  %v5186_v11 = vpop.f32.mrb[97].mxu1 }
 0x3ef   :  { %v5075_v22 = vpop.f32.mrb[98].mxu0  ;;  %v5188_v49 = vpop.f32.mrb[98].mxu1 }
 0x3f0   :  { %v12638_v51 = vpop.f32.mrb[99].mxu0  ;;  %v5190_v4 = vpop.f32.mrb[99].mxu1 }
 0x3f5   :  { %v12640_v19 = vpop.f32.mrb[100].mxu0  ;;  %v12642_v31 = vpop.f32.mrb[100].mxu1 }
 0x3f6   :  { %v12644_v57 = vpop.f32.mrb[101].mxu0  ;;  %v12646_v45 = vpop.f32.mrb[101].mxu1 }
 0x3f7   :  { %v12648_v54 = vpop.f32.mrb[102].mxu0  ;;  %v12650_v40 = vpop.f32.mrb[102].mxu1 }
 0x3f8   :  { %v12652_v56 = vpop.f32.mrb[103].mxu0  ;;  %v12654_v59 = vpop.f32.mrb[103].mxu1 }
 0x3fd   :  { %v12656_v38 = vpop.f32.mrb[104].mxu0  ;;  %v12658_v14 = vpop.f32.mrb[104].mxu1 }
 0x3fe   :  { %v12660_v41 = vpop.f32.mrb[105].mxu0  ;;  %v12662_v7 = vpop.f32.mrb[105].mxu1 }
 0x3ff   :  { %v12664_v60 = vpop.f32.mrb[106].mxu0  ;;  %v12666_v55 = vpop.f32.mrb[106].mxu1 }
 0x400   :  { %v12668_v9 = vpop.f32.mrb[107].mxu0  ;;  %v12670_v3 = vpop.f32.mrb[107].mxu1 }
 0x405   :  { %v12672_v13 = vpop.f32.mrb[108].mxu0  ;;  %v12674_v50 = vpop.f32.mrb[108].mxu1 }
 0x406   :  { %v12676_v24 = vpop.f32.mrb[109].mxu0  ;;  %v12678_v17 = vpop.f32.mrb[109].mxu1 }
 0x407   :  { %v12680_v35 = vpop.f32.mrb[110].mxu0  ;;  %v12682_v20 = vpop.f32.mrb[110].mxu1 }
 0x408   :  { %v12684_v8 = vpop.f32.mrb[111].mxu0  ;;  %v12686_v25 = vpop.f32.mrb[111].mxu1 }
 0x40d   :  { %v5111_v16 = vpop.f32.mrb[112].mxu0  ;;  %v5224_v36 = vpop.f32.mrb[112].mxu1 }
 0x40e   :  { %v5327_v39 = vmax.f32 %v5071_v58, %v5111_v16  ;;  %v5329_v53 = vmax.f32 %v5184_v15, %v5224_v36  ;;  %v12700_v46 = vpop.f32.mrb[113].mxu0  ;;  %v5226_v12 = vpop.f32.mrb[113].mxu1  ;;  %v9254_v15 = vld [vmem:[%s13651_s5 + $0x2f0] ss:$16 sps:$4 sm:$0xff]   ;;  %v13944_v36 = vld [vmem:[#allocation5_spill] sm:$0xff] }
 0x40f   :  { %v5328_v23 = vmax.f32 %v12636_v43, %v12700_v46  ;;  %v5330_v18 = vmax.f32 %v5186_v11, %v5226_v12  ;;  %v5115_v0 = vpop.f32.mrb[114].mxu0  ;;  %v5228_v63 = vpop.f32.mrb[114].mxu1  ;;  %v9257_v43 = vld [vmem:[%s13651_s5 + $0x2f8] ss:$16 sps:$4 sm:$0xff]   ;;  %5863 = vmatpush1.bf16.msra.mxu0 %v9254_v15  ;;  %v517_v16 = vld [vmem:[%s13651_s5 + $0x310] sm:$0xff] }
 0x410   :  { %v12705_v52 = vadd.f32 %v12692_v62, %v5327_v39  ;;  %v5382_v1 = vadd.f32 %v12695_v26, %v5329_v53  ;;  %v5331_v32 = vmax.f32 %v5075_v22, %v5115_v0  ;;  %v5333_v44 = vmax.f32 %v5188_v49, %v5228_v63  ;;  %v5117_v2 = vpop.f32.mrb[115].mxu0  ;;  %v5230_v29 = vpop.f32.mrb[115].mxu1  ;;  %5906 = vmatpush1.bf16.msra.mxu1 %v9257_v43  ;;  %v12740_v0 = vld [vmem:[%s13651_s5 + $0x318] sm:$0xff] }
 0x411   :  { %v5383_v6 = vadd.f32 %v12698_v21, %v5330_v18  ;;  %v5332_v10 = vmax.f32 %v12638_v51, %v5117_v2  ;;  %v5334_v34 = vmax.f32 %v5190_v4, %v5230_v29  ;;  %v12733_v39 = vrot.slane %v418_v37, %v13944_v36 }
 0x412   :  { %v5414_v33 = vmax.f32 %v5382_v1, 0.0  ;;  %v12711_v28 = vadd.f32 %v12692_v62, %v5331_v32  ;;  %v5386_v27 = vadd.f32 %v12695_v26, %v5333_v44  ;;  %v7794_v37 = vcombine.high %v517_v16, %v517_v16 }
 0x413   :  { %v5415_v61 = vmax.f32 %v5383_v6, 0.0  ;;  %v5387_v58 = vadd.f32 %v12698_v21, %v5334_v34  ;;  %v7796_v5 = vcombine.high %v12740_v0, %v12740_v0 }
 0x414   :  { %v5418_v11 = vmax.f32 %v5386_v27, 0.0  ;;  %7797 = vmatprep.subr.msk.bf16.mxu0 %vm5827_vm4, %v7794_v37 }
 0x415   :  { %v5419_v22 = vmax.f32 %v5387_v58, 0.0  ;;  %v5121_v49 = vpop.f32.mrb[116].mxu0  ;;  %v5234_v51 = vpop.f32.mrb[116].mxu1  ;;  %v12727_v4 = vpack.i.bf16 %v5415_v61, %v5414_v33  ;;  %7799 = vmatprep.subr.msk.bf16.mxu1 %vm5827_vm4, %v7796_v5 }
 0x416   :  { %v5335_v53 = vmax.f32 %v12640_v19, %v5121_v49  ;;  %v5337_v46 = vmax.f32 %v12642_v31, %v5234_v51  ;;  %v5123_v12 = vpop.f32.mrb[117].mxu0  ;;  %v5236_v18 = vpop.f32.mrb[117].mxu1 }
 0x417   :  { %v5336_v63 = vmax.f32 %v12644_v57, %v5123_v12  ;;  %v5338_v1 = vmax.f32 %v12646_v45, %v5236_v18  ;;  %v5125_v32 = vpop.f32.mrb[118].mxu0  ;;  %v5238_v44 = vpop.f32.mrb[118].mxu1  ;;  %v12744_v2 = vpack.i.bf16 %v5419_v22, %v5418_v11  ;;  %v7793_v11 = vcombine.low %v517_v16, %v517_v16 }
 0x418   :  { %v12747_v19 = vadd.f32 %v12692_v62, %v5335_v53  ;;  %v5390_v31 = vadd.f32 %v12695_v26, %v5337_v46  ;;  %v5339_v29 = vmax.f32 %v12648_v54, %v5125_v32  ;;  %v5341_v6 = vmax.f32 %v12650_v40, %v5238_v44  ;;  %v5127_v34 = vpop.f32.mrb[119].mxu0  ;;  %v5240_v33 = vpop.f32.mrb[119].mxu1  ;;  %v9266_v32 = vld [vmem:[%s13651_s5 + $0x4] ss:$16 sps:$4 sm:$0xff]  }
 0x419   :  { %v5391_v57 = vadd.f32 %v12698_v21, %v5338_v1  ;;  %v5340_v45 = vmax.f32 %v12652_v56, %v5127_v34  ;;  %v5342_v27 = vmax.f32 %v12654_v59, %v5240_v33  ;;  %v12758_v61 = vadd.f32 %v12733_v39, %v5336_v63 }
 0x41a   :  { %v5422_v48 = vmax.f32 %v5390_v31, 0.0  ;;  %v12761_v58 = vadd.f32 %v12692_v62, %v5339_v29  ;;  %v5394_v54 = vadd.f32 %v12695_v26, %v5341_v6  ;;  %v12769_v59 = vadd.f32 %v12733_v39, %v5328_v23 }
 0x41b   :  { %v5423_v40 = vmax.f32 %v5391_v57, 0.0  ;;  %v12765_v15 = vadd.f32 %v12733_v39, %v5340_v45  ;;  %v5395_v56 = vadd.f32 %v12698_v21, %v5342_v27  ;;  %v12772_v22 = vadd.f32 %v12733_v39, %v5332_v10 }
 0x41c   :  { %v5426_v43 = vmax.f32 %v5394_v54, 0.0  ;;  %v5421_v18 = vmax.f32 %v12758_v61, 0.0  ;;  %v5829_v10 = vsel %vm5827_vm4, %v7793_v11, 0 }
 0x41d   :  { %v5425_v49 = vmax.f32 %v12765_v15, 0.0  ;;  %v5427_v51 = vmax.f32 %v5395_v56, 0.0  ;;  %v5131_v53 = vpop.f32.mrb[120].mxu0  ;;  %v5244_v46 = vpop.f32.mrb[120].mxu1  ;;  %v8552_v12 = vpack.i.bf16 %v5423_v40, %v5422_v48  ;;  %5865 = vmatpush1.bf16.msra.mxu0 %v5829_v10  ;;  %v5413_v56 = vmax.f32 %v12769_v59, 0.0 }
 0x41e   :  { %v5343_v23 = vmax.f32 %v12656_v38, %v5131_v53  ;;  %v5345_v63 = vmax.f32 %v12658_v14, %v5244_v46  ;;  %v5133_v16 = vpop.f32.mrb[121].mxu0  ;;  %v5246_v1 = vpop.f32.mrb[121].mxu1  ;;  %v7795_v14 = vcombine.low %v12740_v0, %v12740_v0  ;;  %6191 = vmatprep.subr.bf16.mxu0 %v9266_v32  ;;  %v9264_v15 = vld [vmem:[%s13651_s5] ss:$16 sps:$4 sm:$0xff]  }
 0x41f   :  { %v5344_v44 = vmax.f32 %v12660_v41, %v5133_v16  ;;  %v5346_v37 = vmax.f32 %v12662_v7, %v5246_v1  ;;  %8553 = vrot.lane.b32.xlu0 %v8552_v12, %s9501_s28  ;;  %v5135_v31 = vpop.f32.mrb[122].mxu0  ;;  %v5248_v29 = vpop.f32.mrb[122].mxu1  ;;  %v8557_v38 = vpack.i.bf16 %v5427_v51, %v5426_v43  ;;  %v8562_v0 = vpack.i.bf16 %v5425_v49, %v5421_v18 }
 0x420   :  { %v12790_v6 = vadd.f32 %v12692_v62, %v5343_v23  ;;  %v5398_v34 = vadd.f32 %v12695_v26, %v5345_v63  ;;  %v5347_v33 = vmax.f32 %v12664_v60, %v5135_v31  ;;  %v5349_v41 = vmax.f32 %v12666_v55, %v5248_v29  ;;  %v5137_v57 = vpop.f32.mrb[123].mxu0  ;;  %v5250_v7 = vpop.f32.mrb[123].mxu1 }
 0x421   :  { %v5399_v45 = vadd.f32 %v12698_v21, %v5346_v37  ;;  %v5348_v27 = vmax.f32 %v12668_v9, %v5137_v57  ;;  %v5350_v5 = vmax.f32 %v12670_v3, %v5250_v7  ;;  %8558 = vrot.lane.b32.xlu1 %v8557_v38, %s9501_s28  ;;  %v5417_v60 = vmax.f32 %v12772_v22, 0.0  ;;  %v9269_v9 = vld [vmem:[%s13651_s5 + $0xc] ss:$16 sps:$4 sm:$0xff]  }
 0x422   :  { %v5430_v48 = vmax.f32 %v5398_v34, 0.0  ;;  %v12805_v55 = vadd.f32 %v12692_v62, %v5347_v33  ;;  %v5402_v54 = vadd.f32 %v12695_v26, %v5349_v41  ;;  %v5835_v11 = vsel %vm5827_vm4, %v7795_v14, 0 }
 0x423   :  { %v5431_v3 = vmax.f32 %v5399_v45, 0.0  ;;  %v5403_v40 = vadd.f32 %v12698_v21, %v5350_v5  ;;  %8563 = vrot.lane.b32.xlu0 %v8562_v0, %s9501_s28  ;;  %v12816_v51 = vadd.f32 %v12733_v39, %v5348_v27  ;;  %5908 = vmatpush1.bf16.msra.mxu1 %v5835_v11  ;;  %v8577_v32 = vpack.i.bf16 %v5417_v60, %v5413_v56 }
 0x424   :  { %v5434_v43 = vmax.f32 %v5402_v54, 0.0  ;;  %6234 = vmatprep.subr.bf16.mxu1 %v9269_v9  ;;  %v12827_v37 = vadd.f32 %v12733_v39, %v5344_v44 }
 0x425   :  { %v5435_v53 = vmax.f32 %v5403_v40, 0.0  ;;  %8568 = vrot.lane.b32.xlu1 %v12727_v4, %s9501_s28  ;;  %v5141_v46 = vpop.f32.mrb[124].mxu0  ;;  %v5254_v12 = vpop.f32.mrb[124].mxu1  ;;  %v8582_v23 = vpack.i.bf16 %v5431_v3, %v5430_v48 }
 0x426   :  { %v5351_v63 = vmax.f32 %v12672_v13, %v5141_v46  ;;  %v5353_v16 = vmax.f32 %v12674_v50, %v5254_v12  ;;  %v5143_v1 = vpop.f32.mrb[125].mxu0  ;;  %v5256_v10 = vpop.f32.mrb[125].mxu1 }
 0x427   :  { %v5352_v4 = vmax.f32 %v12676_v24, %v5143_v1  ;;  %v5354_v31 = vmax.f32 %v12678_v17, %v5256_v10  ;;  %v5258_v29 = vpop.f32.mrb[126].mxu1  ;;  %8573 = vrot.lane.b32.xlu0 %v12744_v2, %s9501_s28  ;;  %v5145_v13 = vpop.f32.mrb[126].mxu0  ;;  %v8587_v50 = vpack.i.bf16 %v5435_v53, %v5434_v43  ;;  %v5433_v24 = vmax.f32 %v12816_v51, 0.0  ;;  %v9348_v51 = vld [vmem:[%s13651_s5 + $0x344] ss:$16 sps:$4 sm:$0xff]  }
 0x428   :  { %v12834_v38 = vadd.f32 %v12692_v62, %v5351_v63  ;;  %v5406_v14 = vadd.f32 %v12695_v26, %v5353_v16  ;;  %v5357_v34 = vmax.f32 %v12682_v20, %v5258_v29  ;;  %v5355_v44 = vmax.f32 %v12680_v35, %v5145_v13  ;;  %v5147_v33 = vpop.f32.mrb[127].mxu0  ;;  %v5260_v41 = vpop.f32.mrb[127].mxu1 }
 0x429   :  { %v5407_v17 = vadd.f32 %v12698_v21, %v5354_v31  ;;  %v5356_v57 = vmax.f32 %v12684_v8, %v5147_v33  ;;  %v5358_v2 = vmax.f32 %v12686_v25, %v5260_v41  ;;  %8578 = vrot.lane.b32.xlu1 %v8577_v32, %s9501_s28  ;;  %v5429_v35 = vmax.f32 %v12827_v37, 0.0  ;;  %v9351_v37 = vld [vmem:[%s13651_s5 + $0x34c] ss:$16 sps:$4 sm:$0xff]  }
 0x42a   :  { %v5438_v7 = vmax.f32 %v5406_v14, 0.0  ;;  %v5410_v45 = vadd.f32 %v12695_v26, %v5357_v34  ;;  %v12846_v27 = vadd.f32 %v12692_v62, %v5355_v44  ;;  %v12855_v25 = vadd.f32 %v12733_v39, %v5352_v4 }
 0x42b   :  { %v5439_v20 = vmax.f32 %v5407_v17, 0.0  ;;  %v12850_v5 = vadd.f32 %v12733_v39, %v5356_v57  ;;  %v5411_v0 = vadd.f32 %v12698_v21, %v5358_v2  ;;  %8583 = vrot.lane.b32.xlu0 %v8582_v23, %s9501_s28  ;;  %v8592_v62 = vpack.i.bf16 %v5433_v24, %v5429_v35  ;;  %v9272_v2 = vld [vmem:[%s13651_s5 + $0x24] ss:$16 sps:$4 sm:$0xff]  }
 0x42c   :  { %v5442_v8 = vmax.f32 %v5410_v45, 0.0  ;;  %v5437_v9 = vmax.f32 %v12855_v25, 0.0  ;;  %v5420_v63 = vmax.f32 %v12747_v19, 0.0  ;;  %v5424_v32 = vmax.f32 %v12761_v58, 0.0  ;;  %v9422_v25 = vld [vmem:[%s13651_s5 + $0x4d0] ss:$16 sps:$4 sm:$0xff]  }
 0x42d   :  { %v5443_v48 = vmax.f32 %v5411_v0, 0.0  ;;  %8588 = vrot.lane.b32.xlu1 %v8587_v50, %s9501_s28  ;;  %v8597_v26 = vpack.i.bf16 %v5439_v20, %v5438_v7  ;;  %v5441_v54 = vmax.f32 %v12850_v5, 0.0  ;;  %v9275_v7 = vld [vmem:[%s13651_s5 + $0x2c] ss:$16 sps:$4 sm:$0xff]   ;;  %v9424_v5 = vld [vmem:[%s13651_s5 + $0x4d4] ss:$16 sps:$4 sm:$0xff]  }
 0x42f   :  { %8593 = vrot.lane.b32.xlu0 %v8592_v62, %s9501_s28  ;;  %v8602_v21 = vpack.i.bf16 %v5443_v48, %v5442_v8  ;;  %v8607_v39 = vpack.i.bf16 %v5441_v54, %v5437_v9  ;;  %v5412_v8 = vmax.f32 %v12705_v52, 0.0  ;;  %v5416_v48 = vmax.f32 %v12711_v28, 0.0  ;;  %v9270_v52 = vld [vmem:[%s13651_s5 + $0x20] ss:$16 sps:$4 sm:$0xff]   ;;  %v9273_v28 = vld [vmem:[%s13651_s5 + $0x28] ss:$16 sps:$4 sm:$0xff]  }
 0x431   :  { %8598 = vrot.lane.b32.xlu1 %v8597_v26, %s9501_s28 }
 0x433   :  { %8603 = vrot.lane.b32.xlu0 %v8602_v21, %s9501_s28 }
 0x435   :  { %8608 = vrot.lane.b32.xlu1 %v8607_v39, %s9501_s28 }
 0x491   :  { %v8554_v3 = vpop.permute.xlu0 %8553 }
 0x492   :  { %v8556_v40 = vunpack.i.h.bf16 %v8554_v3  ;;  %v8555_v43 = vunpack.i.l.bf16 %v8554_v3 }
 0x493   :  { %v8559_v11 = vpop.permute.xlu1 %8558 }
 0x494   :  { %v5522_v53 = vsel %vm5516_vm5, %v8555_v43, %v8556_v40  ;;  %v8561_v46 = vunpack.i.h.bf16 %v8559_v11  ;;  %v8560_v12 = vunpack.i.l.bf16 %v8559_v11  ;;  %v9278_v40 = vld [vmem:[%s13651_s5 + $0x44] ss:$16 sps:$4 sm:$0xff]  }
 0x495   :  { %v8564_v23 = vpop.permute.xlu0 %8563  ;;  %v5554_v4 = vmax.f32 %v5421_v18, %v5522_v53 }
 0x496   :  { %v5524_v16 = vsel %vm5516_vm5, %v8560_v12, %v8561_v46  ;;  %v8566_v1 = vunpack.i.h.bf16 %v8564_v23  ;;  %v8565_v10 = vunpack.i.l.bf16 %v8564_v23 }
 0x497   :  { %v5556_v31 = vmax.f32 %v5425_v49, %v5524_v16  ;;  %v8569_v29 = vpop.permute.xlu1 %8568  ;;  %v9267_v49 = vld [vmem:[%s13651_s5 + $0x8] ss:$16 sps:$4 sm:$0xff]   ;;  %v9276_v16 = vld [vmem:[%s13651_s5 + $0x40] ss:$16 sps:$4 sm:$0xff]  }
 0x498   :  { %v5523_v13 = vsel %vm5516_vm5, %v8566_v1, %v8560_v12  ;;  %v5521_v50 = vsel %vm5516_vm5, %v8565_v10, %v8555_v43  ;;  %v8571_v14 = vunpack.i.h.bf16 %v8569_v29  ;;  %v8570_v19 = vunpack.i.l.bf16 %v8569_v29  ;;  %v9281_v43 = vld [vmem:[%s13651_s5 + $0x4c] ss:$16 sps:$4 sm:$0xff]   ;;  %v9279_v1 = vld [vmem:[%s13651_s5 + $0x48] ss:$16 sps:$4 sm:$0xff]  }
 0x499   :  { %v5555_v34 = vmax.f32 %v5424_v32, %v5523_v13  ;;  %v5553_v44 = vmax.f32 %v5420_v63, %v5521_v50  ;;  %v8574_v33 = vpop.permute.xlu0 %8573  ;;  %v5568_v41 = vpack.c.bf16 %v5556_v31, %v5554_v4  ;;  %v5428_v10 = vmax.f32 %v12790_v6, 0.0  ;;  %v9284_v31 = vld [vmem:[%s13651_s5 + $0x64] ss:$16 sps:$4 sm:$0xff]   ;;  %v9287_v29 = vld [vmem:[%s13651_s5 + $0x6c] ss:$16 sps:$4 sm:$0xff]  }
 0x49a   :  { %v5518_v58 = vsel %vm5516_vm5, %v8570_v19, %v8571_v14  ;;  %v8576_v17 = vunpack.i.h.bf16 %v8574_v33  ;;  %v8575_v61 = vunpack.i.l.bf16 %v8574_v33  ;;  %v5432_v32 = vmax.f32 %v12805_v55, 0.0  ;;  %v9290_v33 = vld [vmem:[%s13651_s5 + $0x84] ss:$16 sps:$4 sm:$0xff]  }
 0x49b   :  { %v5567_v18 = vpack.c.bf16 %v5555_v34, %v5553_v44  ;;  %v8579_v57 = vpop.permute.xlu1 %8578  ;;  %7798 = vmatprep.mubr.msk.bf16.mxu0 %vm5823_vm6, %v5568_v41  ;;  %7800 = vmatprep.mubr.msk.bf16.mxu1 %vm5823_vm6, %v5568_v41  ;;  %v5550_v62 = vmax.f32 %v5413_v56, %v5518_v58  ;;  %v9285_v34 = vld [vmem:[%s13651_s5 + $0x68] ss:$16 sps:$4 sm:$0xff]   ;;  %v9293_v41 = vld [vmem:[%s13651_s5 + $0x8c] ss:$16 sps:$4 sm:$0xff]  }
 0x49c   :  { %v5520_v45 = vsel %vm5516_vm5, %v8575_v61, %v8576_v17  ;;  %v8581_v20 = vunpack.i.h.bf16 %v8579_v57  ;;  %v8580_v0 = vunpack.i.l.bf16 %v8579_v57  ;;  %v5440_v57 = vmax.f32 %v12846_v27, 0.0 }
 0x49d   :  { %v5552_v26 = vmax.f32 %v5417_v60, %v5520_v45  ;;  %v12904_v21 = vpop.permute.xlu0 %8583  ;;  %5873 = vmatmul.mubr.bf16.vlgmr.msra.gmra.mrb[128].mxu0 %v5567_v18  ;;  %5916 = vmatmul.mubr.bf16.vlgmr.msra.gmra.mrb[128].mxu1 %v5567_v18  ;;  %v5436_v18 = vmax.f32 %v12834_v38, 0.0  ;;  %v9288_v45 = vld [vmem:[%s13651_s5 + $0x80] ss:$16 sps:$4 sm:$0xff]   ;;  %v9291_v38 = vld [vmem:[%s13651_s5 + $0x88] ss:$16 sps:$4 sm:$0xff]  }
 0x49e   :  { %v5517_v39 = vsel %vm5516_vm5, %v8580_v0, %v8570_v19  ;;  %v5519_v3 = vsel %vm5516_vm5, %v8581_v20, %v8575_v61  ;;  %6192 = vmatpush1.bf16.msra.mxu0 %v9264_v15  ;;  %6235 = vmatpush1.bf16.msra.mxu1 %v9267_v49  ;;  %v8585_v46 = vunpack.i.l.bf16 %v12904_v21  ;;  %v9282_v19 = vld [vmem:[%s13651_s5 + $0x60] ss:$16 sps:$4 sm:$0xff]   ;;  %v9296_v0 = vld [vmem:[%s13651_s5 + $0xa4] ss:$16 sps:$4 sm:$0xff]  }
 0x49f   :  { %v5549_v59 = vmax.f32 %v5412_v8, %v5517_v39  ;;  %v5551_v22 = vmax.f32 %v5416_v48, %v5519_v3  ;;  %v12914_v60 = vpop.permute.xlu1 %8588  ;;  %6193 = vmatprep.subr.bf16.mxu0 %v9272_v2  ;;  %6236 = vmatprep.subr.bf16.mxu1 %v9275_v7  ;;  %v5566_v56 = vpack.c.bf16 %v5552_v26, %v5550_v62  ;;  %v9299_v8 = vld [vmem:[%s13651_s5 + $0xac] ss:$16 sps:$4 sm:$0xff]   ;;  %v9294_v62 = vld [vmem:[%s13651_s5 + $0xa0] ss:$16 sps:$4 sm:$0xff]   ;;  %v9297_v26 = vld [vmem:[%s13651_s5 + $0xa8] ss:$16 sps:$4 sm:$0xff]  }
 0x4a0   :  { %v8590_v12 = vunpack.i.l.bf16 %v12914_v60  ;;  %v9302_v39 = vld [vmem:[%s13651_s5 + $0xc4] ss:$16 sps:$4 sm:$0xff]   ;;  %v9305_v3 = vld [vmem:[%s13651_s5 + $0xcc] ss:$16 sps:$4 sm:$0xff]  }
 0x4a1   :  { %7854 = vmatprep.mubr.msk.bf16.mxu0 %vm5823_vm6, %v5566_v56  ;;  %7856 = vmatprep.mubr.msk.bf16.mxu1 %vm5823_vm6, %v5566_v56  ;;  %v8594_v11 = vpop.permute.xlu0 %8593  ;;  %v12924_v53 = vpack.c.bf16 %v5551_v22, %v5549_v59  ;;  %v9308_v59 = vld [vmem:[%s13651_s5 + $0xe4] ss:$16 sps:$4 sm:$0xff]   ;;  %v9311_v22 = vld [vmem:[%s13651_s5 + $0xec] ss:$16 sps:$4 sm:$0xff]   ;;  %v9306_v56 = vld [vmem:[%s13651_s5 + $0xe0] ss:$16 sps:$4 sm:$0xff]  }
 0x4a2   :  { %6194 = vmatpush1.bf16.msra.mxu0 %v9270_v52  ;;  %6237 = vmatpush1.bf16.msra.mxu1 %v9273_v28  ;;  %v8596_v23 = vunpack.i.h.bf16 %v8594_v11  ;;  %v8595_v63 = vunpack.i.l.bf16 %v8594_v11  ;;  %v9300_v52 = vld [vmem:[%s13651_s5 + $0xc0] ss:$16 sps:$4 sm:$0xff]   ;;  %v9303_v28 = vld [vmem:[%s13651_s5 + $0xc8] ss:$16 sps:$4 sm:$0xff]   ;;  %v9317_v11 = vld [vmem:[%s13651_s5 + $0x10c] ss:$16 sps:$4 sm:$0xff]  }
 0x4a3   :  { %v12936_v4 = vpop.permute.xlu1 %8598  ;;  %6195 = vmatprep.subr.bf16.mxu0 %v9278_v40  ;;  %6238 = vmatprep.subr.bf16.mxu1 %v9281_v43  ;;  %v9309_v40 = vld [vmem:[%s13651_s5 + $0xe8] ss:$16 sps:$4 sm:$0xff]   ;;  %v9314_v43 = vld [vmem:[%s13651_s5 + $0x104] ss:$16 sps:$4 sm:$0xff]  }
 0x4a4   :  { %v5527_v13 = vsel %vm5516_vm5, %v8596_v23, %v8590_v12  ;;  %v5525_v6 = vsel %vm5516_vm5, %v8595_v63, %v8585_v46  ;;  %v8600_v17 = vunpack.i.l.bf16 %v12936_v4  ;;  %v9312_v23 = vld [vmem:[%s13651_s5 + $0x100] ss:$16 sps:$4 sm:$0xff]   ;;  %v9315_v63 = vld [vmem:[%s13651_s5 + $0x108] ss:$16 sps:$4 sm:$0xff]  }
 0x4a5   :  { %v5559_v55 = vmax.f32 %v5432_v32, %v5527_v13  ;;  %v5557_v50 = vmax.f32 %v5428_v10, %v5525_v6  ;;  %v12950_v14 = vpop.permute.xlu0 %8603  ;;  %v9318_v10 = vld [vmem:[%s13651_s5 + $0x120] ss:$16 sps:$4 sm:$0xff]   ;;  %v9321_v32 = vld [vmem:[%s13651_s5 + $0x128] ss:$16 sps:$4 sm:$0xff]  }
 0x4a6   :  { %6196 = vmatpush1.bf16.msra.mxu0 %v9276_v16  ;;  %6239 = vmatpush1.bf16.msra.mxu1 %v9279_v1  ;;  %v8605_v61 = vunpack.i.l.bf16 %v12950_v14  ;;  %v9320_v16 = vld [vmem:[%s13651_s5 + $0x124] ss:$16 sps:$4 sm:$0xff]   ;;  %v9323_v1 = vld [vmem:[%s13651_s5 + $0x12c] ss:$16 sps:$4 sm:$0xff]   ;;  %v9324_v13 = vld [vmem:[%s13651_s5 + $0x140] ss:$16 sps:$4 sm:$0xff]  }
 0x4a7   :  { %v8609_v44 = vpop.permute.xlu1 %8608  ;;  %6197 = vmatprep.subr.bf16.mxu0 %v9284_v31  ;;  %6240 = vmatprep.subr.bf16.mxu1 %v9287_v29  ;;  %v12964_v58 = vpack.c.bf16 %v5559_v55, %v5557_v50  ;;  %v9326_v31 = vld [vmem:[%s13651_s5 + $0x144] ss:$16 sps:$4 sm:$0xff]   ;;  %v9329_v29 = vld [vmem:[%s13651_s5 + $0x14c] ss:$16 sps:$4 sm:$0xff]   ;;  %v9327_v6 = vld [vmem:[%s13651_s5 + $0x148] ss:$16 sps:$4 sm:$0xff]  }
 0x4a8   :  { %v8611_v15 = vunpack.i.h.bf16 %v8609_v44  ;;  %v8610_v49 = vunpack.i.l.bf16 %v8609_v44  ;;  %v9332_v55 = vld [vmem:[%s13651_s5 + $0x164] ss:$16 sps:$4 sm:$0xff]   ;;  %v9335_v50 = vld [vmem:[%s13651_s5 + $0x16c] ss:$16 sps:$4 sm:$0xff]   ;;  %v8591_v44 = vunpack.i.h.bf16 %v12914_v60 }
 0x4a9   :  { %v9342_v60 = vld [vmem:[%s13651_s5 + $0x324] ss:$16 sps:$4 sm:$0xff]  }
 0x4aa   :  { %v5531_v2 = vsel %vm5516_vm5, %v8611_v15, %v8605_v61  ;;  %v5529_v7 = vsel %vm5516_vm5, %v8610_v49, %v8600_v17  ;;  %6198 = vmatpush1.bf16.msra.mxu0 %v9282_v19  ;;  %6241 = vmatpush1.bf16.msra.mxu1 %v9285_v34  ;;  %v467_v19 = vld [vmem:[%s13651_s5 + $0x180] sm:$0xff]  ;;  %v468_v34 = vld [vmem:[%s13651_s5 + $0x188] sm:$0xff]  ;;  %v8586_v49 = vunpack.i.h.bf16 %v12904_v21 }
 0x4ab   :  { %v5563_v20 = vmax.f32 %v5440_v57, %v5531_v2  ;;  %v5561_v27 = vmax.f32 %v5436_v18, %v5529_v7  ;;  %6199 = vmatprep.subr.bf16.mxu0 %v9290_v33  ;;  %6242 = vmatprep.subr.bf16.mxu1 %v9293_v41  ;;  %v9330_v33 = vld [vmem:[%s13651_s5 + $0x160] ss:$16 sps:$4 sm:$0xff]   ;;  %v9333_v41 = vld [vmem:[%s13651_s5 + $0x168] ss:$16 sps:$4 sm:$0xff]   ;;  %v7850_v15 = vcombine.high %v467_v19, %v467_v19 }
 0x4ac   :  { %v7852_v18 = vcombine.high %v468_v34, %v468_v34  ;;  %v7849_v57 = vcombine.low %v467_v19, %v467_v19  ;;  %v7851_v2 = vcombine.low %v468_v34, %v468_v34  ;;  %v5528_v7 = vsel %vm5516_vm5, %v8590_v12, %v8591_v44  ;;  %v9345_v12 = vld [vmem:[%s13651_s5 + $0x32c] ss:$16 sps:$4 sm:$0xff]   ;;  %v9388_v34 = vld [vmem:[%s13651_s5 + $0x420] ss:$16 sps:$4 sm:$0xff]   ;;  %v9391_v44 = vld [vmem:[%s13651_s5 + $0x428] ss:$16 sps:$4 sm:$0xff]  }
 0x4ad   :  { %v12988_v48 = vpack.c.bf16 %v5563_v20, %v5561_v27  ;;  %v5560_v21 = vmax.f32 %v5433_v24, %v5528_v7  ;;  %v9340_v27 = vld [vmem:[%s13651_s5 + $0x320] ss:$16 sps:$4 sm:$0xff]   ;;  %v9393_v19 = vld [vmem:[%s13651_s5 + $0x42c] ss:$16 sps:$4 sm:$0xff]   ;;  %v9403_v7 = vld [vmem:[%s13651_s5 + $0x468] ss:$16 sps:$4 sm:$0xff]  }
 0x4ae   :  { %6200 = vmatpush1.bf16.msra.mxu0 %v9288_v45  ;;  %6243 = vmatpush1.bf16.msra.mxu1 %v9291_v38  ;;  %v5526_v45 = vsel %vm5516_vm5, %v8585_v46, %v8586_v49  ;;  %v6180_v38 = vsel %vm5827_vm4, %v7849_v57, 0  ;;  %v6186_v20 = vsel %vm5827_vm4, %v7851_v2, 0  ;;  %v9346_v24 = vld [vmem:[%s13651_s5 + $0x340] ss:$16 sps:$4 sm:$0xff]   ;;  %v9397_v49 = vld [vmem:[%s13651_s5 + $0x448] ss:$16 sps:$4 sm:$0xff]  }
 0x4af   :  { %6201 = vmatprep.subr.bf16.mxu0 %v9296_v0  ;;  %6244 = vmatprep.subr.bf16.mxu1 %v9299_v8  ;;  %v5558_v46 = vmax.f32 %v5429_v35, %v5526_v45  ;;  %v9343_v0 = vld [vmem:[%s13651_s5 + $0x328] ss:$16 sps:$4 sm:$0xff]   ;;  %v9405_v57 = vld [vmem:[%s13651_s5 + $0x46c] ss:$16 sps:$4 sm:$0xff]   ;;  %v9400_v2 = vld [vmem:[%s13651_s5 + $0x460] ss:$16 sps:$4 sm:$0xff]  }
 0x4b0   :  { %v9349_v35 = vld [vmem:[%s13651_s5 + $0x348] ss:$16 sps:$4 sm:$0xff]   ;;  %v9408_v45 = vld [vmem:[%s13651_s5 + $0x484] ss:$16 sps:$4 sm:$0xff]  }
 0x4b1   :  { %v5570_v8 = vpack.c.bf16 %v5560_v21, %v5558_v46  ;;  %v9406_v21 = vld [vmem:[%s13651_s5 + $0x480] ss:$16 sps:$4 sm:$0xff]   ;;  %v9409_v46 = vld [vmem:[%s13651_s5 + $0x488] ss:$16 sps:$4 sm:$0xff]  }
 0x4b2   :  { %6202 = vmatpush1.bf16.msra.mxu0 %v9294_v62  ;;  %6245 = vmatpush1.bf16.msra.mxu1 %v9297_v26  ;;  %v9354_v62 = vld [vmem:[%s13651_s5 + $0x364] ss:$16 sps:$4 sm:$0xff]   ;;  %v9352_v26 = vld [vmem:[%s13651_s5 + $0x360] ss:$16 sps:$4 sm:$0xff]  }
 0x4b3   :  { %6203 = vmatprep.subr.bf16.mxu0 %v9302_v39  ;;  %6246 = vmatprep.subr.bf16.mxu1 %v9305_v3  ;;  %v9355_v39 = vld [vmem:[%s13651_s5 + $0x368] ss:$16 sps:$4 sm:$0xff]   ;;  %v9360_v3 = vld [vmem:[%s13651_s5 + $0x384] ss:$16 sps:$4 sm:$0xff]  }
 0x4b6   :  { %6204 = vmatpush1.bf16.msra.mxu0 %v9300_v52  ;;  %6247 = vmatpush1.bf16.msra.mxu1 %v9303_v28  ;;  %v9363_v52 = vld [vmem:[%s13651_s5 + $0x38c] ss:$16 sps:$4 sm:$0xff]   ;;  %v9358_v28 = vld [vmem:[%s13651_s5 + $0x380] ss:$16 sps:$4 sm:$0xff]  }
 0x4b7   :  { %6205 = vmatprep.subr.bf16.mxu0 %v9308_v59  ;;  %6248 = vmatprep.subr.bf16.mxu1 %v9311_v22  ;;  %v9361_v59 = vld [vmem:[%s13651_s5 + $0x388] ss:$16 sps:$4 sm:$0xff]   ;;  %v9366_v22 = vld [vmem:[%s13651_s5 + $0x3a4] ss:$16 sps:$4 sm:$0xff]  }
 0x4ba   :  { %6206 = vmatpush1.bf16.msra.mxu0 %v9306_v56  ;;  %6249 = vmatpush1.bf16.msra.mxu1 %v9309_v40  ;;  %v9369_v56 = vld [vmem:[%s13651_s5 + $0x3ac] ss:$16 sps:$4 sm:$0xff]   ;;  %v9364_v40 = vld [vmem:[%s13651_s5 + $0x3a0] ss:$16 sps:$4 sm:$0xff]  }
 0x4bb   :  { %6207 = vmatprep.subr.bf16.mxu0 %v9314_v43  ;;  %6250 = vmatprep.subr.bf16.mxu1 %v9317_v11  ;;  %v9367_v43 = vld [vmem:[%s13651_s5 + $0x3a8] ss:$16 sps:$4 sm:$0xff]   ;;  %v9372_v11 = vld [vmem:[%s13651_s5 + $0x3c4] ss:$16 sps:$4 sm:$0xff]  }
 0x4be   :  { %6208 = vmatpush1.bf16.msra.mxu0 %v9312_v23  ;;  %6251 = vmatpush1.bf16.msra.mxu1 %v9315_v63  ;;  %v9375_v23 = vld [vmem:[%s13651_s5 + $0x3cc] ss:$16 sps:$4 sm:$0xff]   ;;  %v9370_v63 = vld [vmem:[%s13651_s5 + $0x3c0] ss:$16 sps:$4 sm:$0xff]  }
 0x4bf   :  { %6209 = vmatprep.subr.bf16.mxu0 %v9320_v16  ;;  %6252 = vmatprep.subr.bf16.mxu1 %v9323_v1  ;;  %v9373_v16 = vld [vmem:[%s13651_s5 + $0x3c8] ss:$16 sps:$4 sm:$0xff]   ;;  %v9378_v1 = vld [vmem:[%s13651_s5 + $0x3e4] ss:$16 sps:$4 sm:$0xff]  }
 0x4c2   :  { %6210 = vmatpush1.bf16.msra.mxu0 %v9318_v10  ;;  %6253 = vmatpush1.bf16.msra.mxu1 %v9321_v32  ;;  %v9381_v10 = vld [vmem:[%s13651_s5 + $0x3ec] ss:$16 sps:$4 sm:$0xff]   ;;  %v9376_v32 = vld [vmem:[%s13651_s5 + $0x3e0] ss:$16 sps:$4 sm:$0xff]  }
 0x4c3   :  { %6211 = vmatprep.subr.bf16.mxu0 %v9326_v31  ;;  %6254 = vmatprep.subr.bf16.mxu1 %v9329_v29  ;;  %v9379_v31 = vld [vmem:[%s13651_s5 + $0x3e8] ss:$16 sps:$4 sm:$0xff]   ;;  %v9384_v29 = vld [vmem:[%s13651_s5 + $0x404] ss:$16 sps:$4 sm:$0xff]  }
 0x4c6   :  { %6212 = vmatpush1.bf16.msra.mxu0 %v9324_v13  ;;  %6255 = vmatpush1.bf16.msra.mxu1 %v9327_v6  ;;  %v9387_v13 = vld [vmem:[%s13651_s5 + $0x40c] ss:$16 sps:$4 sm:$0xff]   ;;  %v9382_v6 = vld [vmem:[%s13651_s5 + $0x400] ss:$16 sps:$4 sm:$0xff]  }
 0x4c7   :  { %6213 = vmatprep.subr.bf16.mxu0 %v9332_v55  ;;  %6256 = vmatprep.subr.bf16.mxu1 %v9335_v50  ;;  %v9385_v55 = vld [vmem:[%s13651_s5 + $0x408] ss:$16 sps:$4 sm:$0xff]   ;;  %v9390_v50 = vld [vmem:[%s13651_s5 + $0x424] ss:$16 sps:$4 sm:$0xff]  }
 0x4ca   :  { %6214 = vmatpush1.bf16.msra.mxu0 %v9330_v33  ;;  %6257 = vmatpush1.bf16.msra.mxu1 %v9333_v41  ;;  %v9396_v33 = vld [vmem:[%s13651_s5 + $0x444] ss:$16 sps:$4 sm:$0xff]   ;;  %v9399_v41 = vld [vmem:[%s13651_s5 + $0x44c] ss:$16 sps:$4 sm:$0xff]  }
 0x4cb   :  { %7853 = vmatprep.subr.msk.bf16.mxu0 %vm5827_vm4, %v7850_v15  ;;  %7855 = vmatprep.subr.msk.bf16.mxu1 %vm5827_vm4, %v7852_v18  ;;  %v9394_v15 = vld [vmem:[%s13651_s5 + $0x440] ss:$16 sps:$4 sm:$0xff]   ;;  %v9402_v18 = vld [vmem:[%s13651_s5 + $0x464] ss:$16 sps:$4 sm:$0xff]  }
 0x4ce   :  { %6216 = vmatpush1.bf16.msra.mxu0 %v6180_v38  ;;  %6259 = vmatpush1.bf16.msra.mxu1 %v6186_v20  ;;  %v9411_v38 = vld [vmem:[%s13651_s5 + $0x48c] ss:$16 sps:$4 sm:$0xff]   ;;  %v567_v20 = vld [vmem:[%s13651_s5 + $0x4a0] sm:$0xff] }
 0x4cf   :  { %6542 = vmatprep.subr.bf16.mxu0 %v9342_v60  ;;  %6585 = vmatprep.subr.bf16.mxu1 %v9345_v12  ;;  %v568_v60 = vld [vmem:[%s13651_s5 + $0x4a8] sm:$0xff]  ;;  %v8606_v12 = vunpack.i.h.bf16 %v12950_v14 }
 0x4d1   :  { %6224 = vmatmul.mubr.bf16.vlgmr.msra.gmra.mrb[128].mxu0 %v12924_v53  ;;  %6267 = vmatmul.mubr.bf16.vlgmr.msra.gmra.mrb[128].mxu1 %v12924_v53  ;;  %v9357_v53 = vld [vmem:[%s13651_s5 + $0x36c] ss:$16 sps:$4 sm:$0xff]  }
 0x4d2   :  { %6543 = vmatpush1.bf16.msra.mxu0 %v9340_v27  ;;  %7910 = vmatprep.mubr.msk.bf16.mxu0 %vm5823_vm6, %v5570_v8  ;;  %v7906_v27 = vcombine.high %v567_v20, %v567_v20 }
 0x4d3   :  { %6586 = vmatpush1.bf16.msra.mxu1 %v9343_v0  ;;  %7912 = vmatprep.mubr.msk.bf16.mxu1 %vm5823_vm6, %v5570_v8  ;;  %v7905_v0 = vcombine.low %v567_v20, %v567_v20  ;;  %v8601_v8 = vunpack.i.h.bf16 %v12936_v4  ;;  %v9476_v20 = vld [vmem:[%s13651_s5 + $0x5f0] ss:$16 sps:$4 sm:$0xff]  }
 0x4d4   :  { %6544 = vmatprep.subr.bf16.mxu0 %v9348_v51  ;;  %6587 = vmatprep.subr.bf16.mxu1 %v9351_v37  ;;  %v7908_v51 = vcombine.high %v568_v60, %v568_v60  ;;  %v7907_v37 = vcombine.low %v568_v60, %v568_v60  ;;  %v9479_v60 = vld [vmem:[%s13651_s5 + $0x5f8] ss:$16 sps:$4 sm:$0xff]  }
 0x4d6   :  { %6545 = vmatpush1.bf16.msra.mxu0 %v9346_v24  ;;  %v5532_v24 = vsel %vm5516_vm5, %v8605_v61, %v8606_v12  ;;  %v6537_v14 = vsel %vm5827_vm4, %v7907_v37, 0  ;;  %v9421_v61 = vld [vmem:[%s13651_s5 + $0x4bc] ss:$16 sps:$4 sm:$0xff]   ;;  %v9484_v12 = vld [vmem:[%s13651_s5 + $0x614] ss:$16 sps:$4 sm:$0xff]  }
 0x4d7   :  { %6588 = vmatpush1.bf16.msra.mxu1 %v9349_v35  ;;  %6546 = vmatprep.subr.bf16.mxu0 %v9354_v62  ;;  %v6531_v35 = vsel %vm5827_vm4, %v7905_v0, 0  ;;  %v9418_v62 = vld [vmem:[%s13651_s5 + $0x4b4] ss:$16 sps:$4 sm:$0xff]   ;;  %v9482_v0 = vld [vmem:[%s13651_s5 + $0x610] ss:$16 sps:$4 sm:$0xff]  }
 0x4d8   :  { %6589 = vmatprep.subr.bf16.mxu1 %v9357_v53  ;;  %v5530_v53 = vsel %vm5516_vm5, %v8600_v17, %v8601_v8  ;;  %v9419_v17 = vld [vmem:[%s13651_s5 + $0x4b8] ss:$16 sps:$4 sm:$0xff]  }
 0x4d9   :  { %v5562_v4 = vmax.f32 %v5437_v9, %v5530_v53  ;;  %v9425_v9 = vld [vmem:[%s13651_s5 + $0x4d8] ss:$16 sps:$4 sm:$0xff]  }
 0x4da   :  { %6547 = vmatpush1.bf16.msra.mxu0 %v9352_v26  ;;  %v5564_v26 = vmax.f32 %v5441_v54, %v5532_v24  ;;  %v9485_v8 = vld [vmem:[%s13651_s5 + $0x618] ss:$16 sps:$4 sm:$0xff]  }
 0x4db   :  { %6590 = vmatpush1.bf16.msra.mxu1 %v9355_v39  ;;  %6548 = vmatprep.subr.bf16.mxu0 %v9360_v3  ;;  %v9416_v39 = vld [vmem:[%s13651_s5 + $0x4b0] ss:$16 sps:$4 sm:$0xff]   ;;  %v9427_v3 = vld [vmem:[%s13651_s5 + $0x4dc] ss:$16 sps:$4 sm:$0xff]  }
 0x4dc   :  { %6591 = vmatprep.subr.bf16.mxu1 %v9363_v52  ;;  %v5572_v54 = vpack.c.bf16 %v5564_v26, %v5562_v4  ;;  %v9430_v52 = vld [vmem:[%s13651_s5 + $0x4f4] ss:$16 sps:$4 sm:$0xff]   ;;  %v637_v53 = vld [vmem:[%s13653_s7 + $0x88] sm:$0xff] }
 0x4dd   :  { %v621_v4 = vld [vmem:[%s13653_s7 + $0x8] sm:$0xff] }
 0x4de   :  { %6549 = vmatpush1.bf16.msra.mxu0 %v9358_v28  ;;  %v9428_v28 = vld [vmem:[%s13651_s5 + $0x4f0] ss:$16 sps:$4 sm:$0xff]  }
 0x4df   :  { %6592 = vmatpush1.bf16.msra.mxu1 %v9361_v59  ;;  %6550 = vmatprep.subr.bf16.mxu0 %v9366_v22  ;;  %v9431_v59 = vld [vmem:[%s13651_s5 + $0x4f8] ss:$16 sps:$4 sm:$0xff]   ;;  %v9436_v22 = vld [vmem:[%s13651_s5 + $0x514] ss:$16 sps:$4 sm:$0xff]  }
 0x4e0   :  { %6593 = vmatprep.subr.bf16.mxu1 %v9369_v56  ;;  %v9439_v56 = vld [vmem:[%s13651_s5 + $0x51c] ss:$16 sps:$4 sm:$0xff]  }
 0x4e2   :  { %6551 = vmatpush1.bf16.msra.mxu0 %v9364_v40  ;;  %v9434_v40 = vld [vmem:[%s13651_s5 + $0x510] ss:$16 sps:$4 sm:$0xff]  }
 0x4e3   :  { %6594 = vmatpush1.bf16.msra.mxu1 %v9367_v43  ;;  %6552 = vmatprep.subr.bf16.mxu0 %v9372_v11  ;;  %v9437_v43 = vld [vmem:[%s13651_s5 + $0x518] ss:$16 sps:$4 sm:$0xff]   ;;  %v9442_v11 = vld [vmem:[%s13651_s5 + $0x534] ss:$16 sps:$4 sm:$0xff]  }
 0x4e4   :  { %6595 = vmatprep.subr.bf16.mxu1 %v9375_v23  ;;  %v9445_v23 = vld [vmem:[%s13651_s5 + $0x53c] ss:$16 sps:$4 sm:$0xff]  }
 0x4e6   :  { %6553 = vmatpush1.bf16.msra.mxu0 %v9370_v63  ;;  %v9440_v63 = vld [vmem:[%s13651_s5 + $0x530] ss:$16 sps:$4 sm:$0xff]  }
 0x4e7   :  { %6596 = vmatpush1.bf16.msra.mxu1 %v9373_v16  ;;  %6554 = vmatprep.subr.bf16.mxu0 %v9378_v1  ;;  %v9443_v16 = vld [vmem:[%s13651_s5 + $0x538] ss:$16 sps:$4 sm:$0xff]   ;;  %v9448_v1 = vld [vmem:[%s13651_s5 + $0x554] ss:$16 sps:$4 sm:$0xff]  }
 0x4e8   :  { %6597 = vmatprep.subr.bf16.mxu1 %v9381_v10  ;;  %v9451_v10 = vld [vmem:[%s13651_s5 + $0x55c] ss:$16 sps:$4 sm:$0xff]  }
 0x4ea   :  { %6555 = vmatpush1.bf16.msra.mxu0 %v9376_v32  ;;  %v9446_v32 = vld [vmem:[%s13651_s5 + $0x550] ss:$16 sps:$4 sm:$0xff]  }
 0x4eb   :  { %6598 = vmatpush1.bf16.msra.mxu1 %v9379_v31  ;;  %6556 = vmatprep.subr.bf16.mxu0 %v9384_v29  ;;  %v9449_v31 = vld [vmem:[%s13651_s5 + $0x558] ss:$16 sps:$4 sm:$0xff]   ;;  %v9454_v29 = vld [vmem:[%s13651_s5 + $0x574] ss:$16 sps:$4 sm:$0xff]  }
 0x4ec   :  { %6599 = vmatprep.subr.bf16.mxu1 %v9387_v13  ;;  %v9457_v13 = vld [vmem:[%s13651_s5 + $0x57c] ss:$16 sps:$4 sm:$0xff]  }
 0x4ee   :  { %6557 = vmatpush1.bf16.msra.mxu0 %v9382_v6  ;;  %v9452_v6 = vld [vmem:[%s13651_s5 + $0x570] ss:$16 sps:$4 sm:$0xff]  }
 0x4ef   :  { %6600 = vmatpush1.bf16.msra.mxu1 %v9385_v55  ;;  %6558 = vmatprep.subr.bf16.mxu0 %v9390_v50  ;;  %v9455_v55 = vld [vmem:[%s13651_s5 + $0x578] ss:$16 sps:$4 sm:$0xff]   ;;  %v9460_v50 = vld [vmem:[%s13651_s5 + $0x594] ss:$16 sps:$4 sm:$0xff]  }
 0x4f0   :  { %6601 = vmatprep.subr.bf16.mxu1 %v9393_v19  ;;  %v9463_v19 = vld [vmem:[%s13651_s5 + $0x59c] ss:$16 sps:$4 sm:$0xff]  }
 0x4f2   :  { %6559 = vmatpush1.bf16.msra.mxu0 %v9388_v34  ;;  %v9458_v34 = vld [vmem:[%s13651_s5 + $0x590] ss:$16 sps:$4 sm:$0xff]  }
 0x4f3   :  { %6602 = vmatpush1.bf16.msra.mxu1 %v9391_v44  ;;  %6560 = vmatprep.subr.bf16.mxu0 %v9396_v33  ;;  %v9461_v44 = vld [vmem:[%s13651_s5 + $0x598] ss:$16 sps:$4 sm:$0xff]   ;;  %v9466_v33 = vld [vmem:[%s13651_s5 + $0x5b4] ss:$16 sps:$4 sm:$0xff]  }
 0x4f4   :  { %6603 = vmatprep.subr.bf16.mxu1 %v9399_v41  ;;  %v9469_v41 = vld [vmem:[%s13651_s5 + $0x5bc] ss:$16 sps:$4 sm:$0xff]  }
 0x4f6   :  { %6561 = vmatpush1.bf16.msra.mxu0 %v9394_v15  ;;  %v9464_v15 = vld [vmem:[%s13651_s5 + $0x5b0] ss:$16 sps:$4 sm:$0xff]  }
 0x4f7   :  { %6604 = vmatpush1.bf16.msra.mxu1 %v9397_v49  ;;  %6562 = vmatprep.subr.bf16.mxu0 %v9402_v18  ;;  %v9467_v49 = vld [vmem:[%s13651_s5 + $0x5b8] ss:$16 sps:$4 sm:$0xff]   ;;  %v9472_v18 = vld [vmem:[%s13651_s5 + $0x5d4] ss:$16 sps:$4 sm:$0xff]  }
 0x4f8   :  { %6605 = vmatprep.subr.bf16.mxu1 %v9405_v57  ;;  %v9475_v57 = vld [vmem:[%s13651_s5 + $0x5dc] ss:$16 sps:$4 sm:$0xff]  }
 0x4fa   :  { %6563 = vmatpush1.bf16.msra.mxu0 %v9400_v2  ;;  %v9470_v2 = vld [vmem:[%s13651_s5 + $0x5d0] ss:$16 sps:$4 sm:$0xff]  }
 0x4fb   :  { %6606 = vmatpush1.bf16.msra.mxu1 %v9403_v7  ;;  %6564 = vmatprep.subr.bf16.mxu0 %v9408_v45  ;;  %v9473_v7 = vld [vmem:[%s13651_s5 + $0x5d8] ss:$16 sps:$4 sm:$0xff]   ;;  %v9478_v45 = vld [vmem:[%s13651_s5 + $0x5f4] ss:$16 sps:$4 sm:$0xff]  }
 0x4fc   :  { %6607 = vmatprep.subr.bf16.mxu1 %v9411_v38  ;;  %v9481_v38 = vld [vmem:[%s13651_s5 + $0x5fc] ss:$16 sps:$4 sm:$0xff]  }
 0x4fe   :  { %6565 = vmatpush1.bf16.msra.mxu0 %v9406_v21  ;;  %v9487_v21 = vld [vmem:[%s13651_s5 + $0x61c] ss:$16 sps:$4 sm:$0xff]  }
 0x4ff   :  { %6608 = vmatpush1.bf16.msra.mxu1 %v9409_v46  ;;  %7909 = vmatprep.subr.msk.bf16.mxu0 %vm5827_vm4, %v7906_v27  ;;  %v617_v46 = vld [vmem:[%s13651_s5 + $0x630] sm:$0xff]  ;;  %v618_v27 = vld [vmem:[%s13651_s5 + $0x638] sm:$0xff] }
 0x500   :  { %7911 = vmatprep.subr.msk.bf16.mxu1 %vm5827_vm4, %v7908_v51  ;;  %v7962_v51 = vcombine.high %v617_v46, %v617_v46  ;;  %v7961_v37 = vcombine.low %v617_v46, %v617_v46  ;;  %v7964_v24 = vcombine.high %v618_v27, %v618_v27  ;;  %v630_v46 = vld [vmem:[%s13653_s7 + $0x50] sm:$0xff] }
 0x502   :  { %6567 = vmatpush1.bf16.msra.mxu0 %v6531_v35  ;;  %v7963_v35 = vcombine.low %v618_v27, %v618_v27  ;;  %v631_v27 = vld [vmem:[%s13653_s7 + $0x58] sm:$0xff] }
 0x503   :  { %6610 = vmatpush1.bf16.msra.mxu1 %v6537_v14  ;;  %6901 = vmatprep.subr.bf16.mxu0 %v9418_v62  ;;  %v636_v62 = vld [vmem:[%s13653_s7 + $0x80] sm:$0xff]  ;;  %v6890_v14 = vsel %vm5827_vm4, %v7961_v37, 0  ;;  %v8033_v37 = vpack.c.bf16 %v631_v27, %v630_v46 }
 0x504   :  { %6944 = vmatprep.subr.bf16.mxu1 %v9421_v61  ;;  %v652_v61 = vld [vmem:[%s13653_s7 + $0x100] sm:$0xff]  ;;  %v8011_v26 = vpack.c.bf16 %v637_v53, %v636_v62  ;;  %v665_v53 = vld [vmem:[%s13653_s7 + $0x168] sm:$0xff] }
 0x505   :  { %6575 = vmatmul.mubr.bf16.vlgmr.msra.gmra.mrb[128].mxu0 %v12964_v58  ;;  %v664_v62 = vld [vmem:[%s13653_s7 + $0x160] sm:$0xff] }
 0x506   :  { %6618 = vmatmul.mubr.bf16.vlgmr.msra.gmra.mrb[128].mxu1 %v12964_v58  ;;  %6902 = vmatpush1.bf16.msra.mxu0 %v9416_v39  ;;  %v9433_v58 = vld [vmem:[%s13651_s5 + $0x4fc] ss:$16 sps:$4 sm:$0xff]   ;;  %v620_v39 = vld [vmem:[%s13653_s7] sm:$0xff] }
 0x507   :  { %7966 = vmatprep.mubr.msk.bf16.mxu0 %vm5823_vm6, %v5572_v54  ;;  %6945 = vmatpush1.bf16.msra.mxu1 %v9419_v17  ;;  %v6896_v17 = vsel %vm5827_vm4, %v7963_v35, 0 }
 0x508   :  { %7968 = vmatprep.mubr.msk.bf16.mxu1 %vm5823_vm6, %v5572_v54  ;;  %6903 = vmatprep.subr.bf16.mxu0 %v9424_v5  ;;  %v653_v5 = vld [vmem:[%s13653_s7 + $0x108] sm:$0xff]  ;;  %v638_v54 = vld [vmem:[%s13653_s7 + $0x90] sm:$0xff] }
 0x509   :  { %6946 = vmatprep.subr.bf16.mxu1 %v9427_v3  ;;  %v639_v3 = vld [vmem:[%s13653_s7 + $0x98] sm:$0xff] }
 0x50a   :  { %6904 = vmatpush1.bf16.msra.mxu0 %v9422_v25  ;;  %v8013_v25 = vpack.c.bf16 %v621_v4, %v620_v39  ;;  %v668_v4 = vld [vmem:[%s13653_s7 + $0x180] sm:$0xff] }
 0x50b   :  { %6947 = vmatpush1.bf16.msra.mxu1 %v9425_v9  ;;  %6905 = vmatprep.subr.bf16.mxu0 %v9430_v52  ;;  %v8044_v9 = vpack.c.bf16 %v653_v5, %v652_v61  ;;  %v654_v52 = vld [vmem:[%s13653_s7 + $0x110] sm:$0xff] }
 0x50c   :  { %6948 = vmatprep.subr.bf16.mxu1 %v9433_v58  ;;  %v8015_v58 = vpack.c.bf16 %v639_v3, %v638_v54  ;;  %v666_v61 = vld [vmem:[%s13653_s7 + $0x170] sm:$0xff]  ;;  %v671_v3 = vld [vmem:[%s13653_s7 + $0x198] sm:$0xff] }
 0x50d   :  { %v670_v54 = vld [vmem:[%s13653_s7 + $0x190] sm:$0xff] }
 0x50e   :  { %6906 = vmatpush1.bf16.msra.mxu0 %v9428_v28  ;;  %v622_v28 = vld [vmem:[%s13653_s7 + $0x10] sm:$0xff] }
 0x50f   :  { %6949 = vmatpush1.bf16.msra.mxu1 %v9431_v59  ;;  %6907 = vmatprep.subr.bf16.mxu0 %v9436_v22  ;;  %v623_v59 = vld [vmem:[%s13653_s7 + $0x18] sm:$0xff]  ;;  %v9502_v22 = vmov 0.0|0.0  }
 0x510   :  { %6950 = vmatprep.subr.bf16.mxu1 %v9439_v56  ;;  %v655_v56 = vld [vmem:[%s13653_s7 + $0x118] sm:$0xff] }
 0x512   :  { %6908 = vmatpush1.bf16.msra.mxu0 %v9434_v40  ;;  %v640_v40 = vld [vmem:[%s13653_s7 + $0xa0] sm:$0xff] }
 0x513   :  { %6951 = vmatpush1.bf16.msra.mxu1 %v9437_v43  ;;  %6909 = vmatprep.subr.bf16.mxu0 %v9442_v11  ;;  %v641_v43 = vld [vmem:[%s13653_s7 + $0xa8] sm:$0xff]  ;;  %v8017_v11 = vpack.c.bf16 %v623_v59, %v622_v28  ;;  %v674_v28 = vld [vmem:[%s13653_s7 + $0x1b0] sm:$0xff]  ;;  %v675_v59 = vld [vmem:[%s13653_s7 + $0x1b8] sm:$0xff] }
 0x514   :  { %6952 = vmatprep.subr.bf16.mxu1 %v9445_v23  ;;  %v8047_v23 = vpack.c.bf16 %v655_v56, %v654_v52  ;;  %v673_v52 = vld [vmem:[%s13653_s7 + $0x1a8] sm:$0xff]  ;;  %v8077_v56 = vpack.c.bf16 %v675_v59, %v674_v28 }
 0x516   :  { %6910 = vmatpush1.bf16.msra.mxu0 %v9440_v63  ;;  %v656_v63 = vld [vmem:[%s13653_s7 + $0x120] sm:$0xff] }
 0x517   :  { %6953 = vmatpush1.bf16.msra.mxu1 %v9443_v16  ;;  %6911 = vmatprep.subr.bf16.mxu0 %v9448_v1  ;;  %v8019_v16 = vpack.c.bf16 %v641_v43, %v640_v40  ;;  %v624_v1 = vld [vmem:[%s13653_s7 + $0x20] sm:$0xff]  ;;  %v677_v43 = vld [vmem:[%s13653_s7 + $0x1c8] sm:$0xff] }
 0x518   :  { %6954 = vmatprep.subr.bf16.mxu1 %v9451_v10  ;;  %v625_v10 = vld [vmem:[%s13653_s7 + $0x28] sm:$0xff]  ;;  %v676_v40 = vld [vmem:[%s13653_s7 + $0x1c0] sm:$0xff] }
 0x51a   :  { %6912 = vmatpush1.bf16.msra.mxu0 %v9446_v32  ;;  %v642_v32 = vld [vmem:[%s13653_s7 + $0xb0] sm:$0xff] }
 0x51b   :  { %6955 = vmatpush1.bf16.msra.mxu1 %v9449_v31  ;;  %6913 = vmatprep.subr.bf16.mxu0 %v9454_v29  ;;  %v643_v31 = vld [vmem:[%s13653_s7 + $0xb8] sm:$0xff]  ;;  %v8021_v29 = vpack.c.bf16 %v625_v10, %v624_v1  ;;  %v632_v1 = vld [vmem:[%s13653_s7 + $0x60] sm:$0xff]  ;;  %v633_v10 = vld [vmem:[%s13653_s7 + $0x68] sm:$0xff] }
 0x51c   :  { %6956 = vmatprep.subr.bf16.mxu1 %v9457_v13 }
 0x51e   :  { %6914 = vmatpush1.bf16.msra.mxu0 %v9452_v6  ;;  %v658_v6 = vld [vmem:[%s13653_s7 + $0x130] sm:$0xff] }
 0x51f   :  { %6957 = vmatpush1.bf16.msra.mxu1 %v9455_v55  ;;  %6915 = vmatprep.subr.bf16.mxu0 %v9460_v50  ;;  %v8023_v55 = vpack.c.bf16 %v643_v31, %v642_v32  ;;  %v626_v50 = vld [vmem:[%s13653_s7 + $0x30] sm:$0xff]  ;;  %v680_v32 = vld [vmem:[%s13653_s7 + $0x1e0] sm:$0xff]  ;;  %v681_v31 = vld [vmem:[%s13653_s7 + $0x1e8] sm:$0xff] }
 0x520   :  { %6958 = vmatprep.subr.bf16.mxu1 %v9463_v19  ;;  %v627_v19 = vld [vmem:[%s13653_s7 + $0x38] sm:$0xff] }
 0x522   :  { %6916 = vmatpush1.bf16.msra.mxu0 %v9458_v34  ;;  %v659_v34 = vld [vmem:[%s13653_s7 + $0x138] sm:$0xff] }
 0x523   :  { %6959 = vmatpush1.bf16.msra.mxu1 %v9461_v44  ;;  %6917 = vmatprep.subr.bf16.mxu0 %v9466_v33  ;;  %v644_v44 = vld [vmem:[%s13653_s7 + $0xc0] sm:$0xff]  ;;  %v645_v33 = vld [vmem:[%s13653_s7 + $0xc8] sm:$0xff] }
 0x524   :  { %6960 = vmatprep.subr.bf16.mxu1 %v9469_v41  ;;  %v8025_v41 = vpack.c.bf16 %v627_v19, %v626_v50  ;;  %v635_v50 = vld [vmem:[%s13653_s7 + $0x78] sm:$0xff] }
 0x526   :  { %6918 = vmatpush1.bf16.msra.mxu0 %v9464_v15  ;;  %v8053_v15 = vpack.c.bf16 %v659_v34, %v658_v6  ;;  %v9503_v34 = vmov 0.0  }
 0x527   :  { %6961 = vmatpush1.bf16.msra.mxu1 %v9467_v49  ;;  %6919 = vmatprep.subr.bf16.mxu0 %v9472_v18  ;;  %v660_v49 = vld [vmem:[%s13653_s7 + $0x140] sm:$0xff]  ;;  %v8027_v18 = vpack.c.bf16 %v645_v33, %v644_v44  ;;  %v682_v44 = vld [vmem:[%s13653_s7 + $0x1f0] sm:$0xf] }
 0x528   :  { %6962 = vmatprep.subr.bf16.mxu1 %v9475_v57  ;;  %v628_v57 = vld [vmem:[%s13653_s7 + $0x40] sm:$0xff] }
 0x529   :  { %v619_v33 = vld [vmem:[%s13654_s6] sm:$0xf] }
 0x52a   :  { %6920 = vmatpush1.bf16.msra.mxu0 %v9470_v2  ;;  %v629_v2 = vld [vmem:[%s13653_s7 + $0x48] sm:$0xff] }
 0x52b   :  { %6963 = vmatpush1.bf16.msra.mxu1 %v9473_v7  ;;  %6921 = vmatprep.subr.bf16.mxu0 %v9478_v45  ;;  %v661_v7 = vld [vmem:[%s13653_s7 + $0x148] sm:$0xff]  ;;  %v646_v45 = vld [vmem:[%s13653_s7 + $0xd0] sm:$0xff] }
 0x52c   :  { %6964 = vmatprep.subr.bf16.mxu1 %v9481_v38  ;;  %v647_v38 = vld [vmem:[%s13653_s7 + $0xd8] sm:$0xff] }
 0x52e   :  { %6922 = vmatpush1.bf16.msra.mxu0 %v9476_v20  ;;  %v8029_v20 = vpack.c.bf16 %v629_v2, %v628_v57 }
 0x52f   :  { %6965 = vmatpush1.bf16.msra.mxu1 %v9479_v60  ;;  %6923 = vmatprep.subr.bf16.mxu0 %v9484_v12  ;;  %v8056_v60 = vpack.c.bf16 %v661_v7, %v660_v49  ;;  %v662_v12 = vld [vmem:[%s13653_s7 + $0x150] sm:$0xff]  ;;  %v7003_v49 = vrot.slane %v619_v33, %v13944_v36 }
 0x530   :  { %6966 = vmatprep.subr.bf16.mxu1 %v9487_v21  ;;  %v8031_v21 = vpack.c.bf16 %v647_v38, %v646_v45 }
 0x532   :  { %6924 = vmatpush1.bf16.msra.mxu0 %v9482_v0  ;;  %v663_v0 = vld [vmem:[%s13653_s7 + $0x158] sm:$0xff] }
 0x533   :  { %6967 = vmatpush1.bf16.msra.mxu1 %v9485_v8  ;;  %7965 = vmatprep.subr.msk.bf16.mxu0 %vm5827_vm4, %v7962_v51  ;;  %v648_v8 = vld [vmem:[%s13653_s7 + $0xe0] sm:$0xff]  ;;  %v649_v51 = vld [vmem:[%s13653_s7 + $0xe8] sm:$0xff] }
 0x534   :  { %7967 = vmatprep.subr.msk.bf16.mxu1 %vm5827_vm4, %v7964_v24  ;;  %v8059_v24 = vpack.c.bf16 %v663_v0, %v662_v12  ;;  %v8035_v35 = vpack.c.bf16 %v649_v51, %v648_v8 }
 0x536   :  { %6926 = vmatpush1.bf16.msra.mxu0 %v6890_v14  ;;  %v8062_v14 = vpack.c.bf16 %v665_v53, %v664_v62 }
 0x537   :  { %6969 = vmatpush1.bf16.msra.mxu1 %v6896_v17  ;;  %8012 = vmatprep.subr.bf16.mxu0 %v8011_v26  ;;  %v667_v26 = vld [vmem:[%s13653_s7 + $0x178] sm:$0xff]  ;;  %v669_v17 = vld [vmem:[%s13653_s7 + $0x188] sm:$0xff] }
 0x538   :  { %8043 = vmatprep.subr.bf16.mxu1 %v9502_v22  ;;  %v8065_v39 = vpack.c.bf16 %v667_v26, %v666_v61  ;;  %v8068_v5 = vpack.c.bf16 %v669_v17, %v668_v4 }
 0x539   :  { %6934 = vmatmul.mubr.bf16.vlgmr.msra.gmra.mrb[128].mxu0 %v12988_v48 }
 0x53a   :  { %6977 = vmatmul.mubr.bf16.vlgmr.msra.gmra.mrb[128].mxu1 %v12988_v48  ;;  %8014 = vmatpush3.bf16.msra.mxu0 %v8013_v25  ;;  %v657_v48 = vld [vmem:[%s13653_s7 + $0x128] sm:$0xff]  ;;  %v8071_v25 = vpack.c.bf16 %v671_v3, %v670_v54 }
 0x53b   :  { %8045 = vmatpush1.bf16.msra.mxu1 %v8044_v9  ;;  %8016 = vmatprep.subr.bf16.mxu0 %v8015_v58  ;;  %v8050_v13 = vpack.c.bf16 %v657_v48, %v656_v63  ;;  %v672_v9 = vld [vmem:[%s13653_s7 + $0x1a0] sm:$0xff]  ;;  %v679_v63 = vld [vmem:[%s13653_s7 + $0x1d8] sm:$0xff]  ;;  %v8037_v48 = vpack.c.bf16 %v633_v10, %v632_v1 }
 0x53c   :  { %8046 = vmatprep.subr.bf16.mxu1 %v9502_v22  ;;  %v8074_v58 = vpack.c.bf16 %v673_v52, %v672_v9 }
 0x53e   :  { %8018 = vmatpush3.bf16.msra.mxu0 %v8017_v11  ;;  %v8080_v11 = vpack.c.bf16 %v677_v43, %v676_v40 }
 0x53f   :  { %8048 = vmatpush1.bf16.msra.mxu1 %v8047_v23  ;;  %8020 = vmatprep.subr.bf16.mxu0 %v8019_v16  ;;  %v678_v23 = vld [vmem:[%s13653_s7 + $0x1d0] sm:$0xff] }
 0x540   :  { %8049 = vmatprep.subr.bf16.mxu1 %v9502_v22  ;;  %v8083_v16 = vpack.c.bf16 %v679_v63, %v678_v23 }
 0x542   :  { %8022 = vmatpush3.bf16.msra.mxu0 %v8021_v29  ;;  %v8086_v29 = vpack.c.bf16 %v681_v31, %v680_v32 }
 0x543   :  { %8051 = vmatpush1.bf16.msra.mxu1 %v8050_v13  ;;  %8024 = vmatprep.subr.bf16.mxu0 %v8023_v55  ;;  %v651_v13 = vld [vmem:[%s13653_s7 + $0xf8] sm:$0xff]  ;;  %v634_v55 = vld [vmem:[%s13653_s7 + $0x70] sm:$0xff] }
 0x544   :  { %8052 = vmatprep.subr.bf16.mxu1 %v9502_v22  ;;  %v8041_v19 = vpack.c.bf16 %v635_v50, %v634_v55 }
 0x546   :  { %8026 = vmatpush3.bf16.msra.mxu0 %v8025_v41  ;;  %v6999_v41 = vrot.slane %v619_v33, %v13941_v30 }
 0x547   :  { %8054 = vmatpush1.bf16.msra.mxu1 %v8053_v15  ;;  %8028 = vmatprep.subr.bf16.mxu0 %v8027_v18  ;;  %v7007_v15 = vrot.slane %v619_v33, %v13942_v47  ;;  %v7011_v18 = vrot.slane %v619_v33, %v13943_v42 }
 0x548   :  { %8055 = vmatprep.subr.bf16.mxu1 %v9502_v22 }
 0x54a   :  { %8030 = vmatpush3.bf16.msra.mxu0 %v8029_v20 }
 0x54b   :  { %8057 = vmatpush1.bf16.msra.mxu1 %v8056_v60  ;;  %8032 = vmatprep.subr.bf16.mxu0 %v8031_v21 }
 0x54c   :  { %8058 = vmatprep.subr.bf16.mxu1 %v9502_v22 }
 0x54e   :  { %8034 = vmatpush3.bf16.msra.mxu0 %v8033_v37 }
 0x54f   :  { %8060 = vmatpush1.bf16.msra.mxu1 %v8059_v24  ;;  %8036 = vmatprep.subr.bf16.mxu0 %v8035_v35 }
 0x550   :  { %8061 = vmatprep.subr.bf16.mxu1 %v9502_v22 }
 0x552   :  { %8038 = vmatpush3.bf16.msra.mxu0 %v8037_v48 }
 0x553   :  { %8063 = vmatpush1.bf16.msra.mxu1 %v8062_v14 }
 0x554   :  { %8064 = vmatprep.subr.bf16.mxu1 %v9502_v22 }
 0x557   :  { %8066 = vmatpush1.bf16.msra.mxu1 %v8065_v39  ;;  %v7969_v39 = vld [vmem:[%s13655_s8] ss:$0 sm:$0xff] }
 0x558   :  { %8067 = vmatprep.subr.bf16.mxu1 %v9502_v22 }
 0x55b   :  { %8069 = vmatpush1.bf16.msra.mxu1 %v8068_v5 }
 0x55c   :  { %8070 = vmatprep.subr.bf16.mxu1 %v9502_v22 }
 0x55f   :  { %8072 = vmatpush1.bf16.msra.mxu1 %v8071_v25 }
 0x560   :  { %8073 = vmatprep.subr.bf16.mxu1 %v9502_v22 }
 0x563   :  { %8075 = vmatpush1.bf16.msra.mxu1 %v8074_v58 }
 0x564   :  { %8076 = vmatprep.subr.bf16.mxu1 %v9502_v22 }
 0x567   :  { %8078 = vmatpush1.bf16.msra.mxu1 %v8077_v56 }
 0x568   :  { %8079 = vmatprep.subr.bf16.mxu1 %v9502_v22 }
 0x56b   :  { %8081 = vmatpush1.bf16.msra.mxu1 %v8080_v11 }
 0x56c   :  { %8082 = vmatprep.subr.bf16.mxu1 %v9502_v22 }
 0x56f   :  { %8084 = vmatpush1.bf16.msra.mxu1 %v8083_v16 }
 0x570   :  { %8085 = vmatprep.subr.bf16.mxu1 %v9502_v22  ;;  %v650_v22 = vld [vmem:[%s13653_s7 + $0xf0] sm:$0xff] }
 0x571   :  { %v8039_v6 = vpack.c.bf16 %v651_v13, %v650_v22 }
 0x573   :  { %8087 = vmatpush1.bf16.msra.mxu1 %v8086_v29  ;;  %8040 = vmatprep.subr.bf16.mxu0 %v8039_v6 }
 0x574   :  { %8042 = vmatpush3.bf16.msra.mxu0 %v8041_v19  ;;  %7183 = vmatprep.subr.mxu1 %v9503_v34 }
 0x577   :  { %7970 = vmatpush1.msk.msra.mxu1 %vm5827_vm4, %v682_v44 }
 0x60c   :  { %v6935_v57 = vpop.f32.mrb[128].mxu0 }
 0x60d   :  { %v7016_v2 = vadd.f32 %v6999_v41, %v6935_v57  ;;  %v6978_v7 = vpop.f32.mrb[128].mxu1  ;;  %v6937_v45 = vpop.f32.mrb[129].mxu0 }
 0x60e   :  { %v7018_v38 = vadd.f32 %v7007_v15, %v6978_v7  ;;  %v7017_v20 = vadd.f32 %v7003_v49, %v6937_v45  ;;  %v6980_v60 = vpop.f32.mrb[129].mxu1  ;;  %v6939_v12 = vpop.f32.mrb[130].mxu0 }
 0x60f   :  { %v7019_v21 = vadd.f32 %v7011_v18, %v6980_v60  ;;  %v6982_v46 = vpop.f32.mrb[130].mxu1  ;;  %v6941_v27 = vpop.f32.mrb[131].mxu0  ;;  %v7024_v47 = vmax.f32 %v7016_v2, 0.0  ;;  %v7020_v36 = vadd.f32 %v6999_v41, %v6939_v12 }
 0x610   :  { %v7025_v0 = vmax.f32 %v7017_v20, 0.0  ;;  %v7021_v8 = vadd.f32 %v7003_v49, %v6941_v27  ;;  %v6984_v30 = vpop.f32.mrb[131].mxu1  ;;  %v7026_v42 = vmax.f32 %v7018_v38, 0.0  ;;  %v7022_v24 = vadd.f32 %v7007_v15, %v6982_v46 }
 0x611   :  { %v7027_v51 = vmax.f32 %v7019_v21, 0.0  ;;  %v7023_v37 = vadd.f32 %v7011_v18, %v6984_v30  ;;  %v7028_v53 = vmax.f32 %v7020_v36, 0.0 }
 0x612   :  { %v7029_v35 = vmax.f32 %v7021_v8, 0.0  ;;  %7112 = vmatprep.mubr.f32.mxu0 %v7025_v0  ;;  %v7030_v14 = vmax.f32 %v7022_v24, 0.0 }
 0x613   :  { %v7031_v62 = vmax.f32 %v7023_v37, 0.0  ;;  %7971 = vmatprep.mubr.msk.f32.mxu1 %vm7038_vm7, %v7027_v51  ;;  %7113 = vmatmul.mubr.f32.vlgmr.msra.gmra.mrb[132].mxu0 %v7024_v47 }
 0x614   :  { %7188 = vmatmul.mubr.f32.vlgmr.msra.gmra.mrb[132].mxu1 %v7026_v42  ;;  %7117 = vmatprep.mubr.f32.mxu0 %v7029_v35 }
 0x615   :  { %7972 = vmatprep.mubr.msk.f32.mxu1 %vm7038_vm7, %v7031_v62 }
 0x617   :  { %7118 = vmatmul.mubr.f32.gmra.mrb[134].mxu0 %v7028_v53 }
 0x618   :  { %7193 = vmatmul.mubr.f32.gmra.mrb[134].mxu1 %v7030_v14 }
 0x6e6   :  { %v8005_v61 = vpop.f32.mrb[132].mxu0 }
 0x6e7   :  { %v7189_v26 = vpop.f32.mrb[132].mxu1  ;;  %v8006_v4 = vpop.f32.mrb[133].mxu0 }
 0x6e8   :  { %v8007_v17 = vadd.f32 %v8006_v4, %v8005_v61  ;;  %v7191_v5 = vpop.f32.mrb[133].mxu1 }
 0x6ea   :  { %v7115_v54 = vadd.f32 %v8007_v17, %v7969_v39  ;;  %v8008_v3 = vpop.f32.mrb[134].mxu0 }
 0x6eb   :  { %v7194_v25 = vpop.f32.mrb[134].mxu1  ;;  %v8009_v9 = vpop.f32.mrb[135].mxu0 }
 0x6ec   :  { %v8010_v52 = vadd.f32 %v8009_v9, %v8008_v3  ;;  %v7196_v58 = vpop.f32.mrb[135].mxu1  ;;  %v7190_v28 = vadd.f32 %v7189_v26, %v7115_v54 }
 0x6ee   :  { %v7120_v59 = vadd.f32 %v8010_v52, %v7969_v39  ;;  %v7199_v56 = vsel %vm7198_vm8, %v7190_v28, -inf }
 0x6ef   :  { %7200 = vmax.xlane.f32.xlu0 %v7199_v56 }
 0x6f0   :  { %v7195_v40 = vadd.f32 %v7194_v25, %v7120_v59 }
 0x6f2   :  { %v7202_v43 = vsel %vm7198_vm8, %v7195_v40, -inf }
 0x6f3   :  { %7203 = vmax.xlane.f32.xlu1 %v7202_v43 }
 0x77c   :  { %v7201_v11 = vpop.xlane.xlu0 %7200 }
 0x77d   :  { %v7205_v23 = vsub.f32 %v7190_v28, %v7201_v11 }
 0x77f   :  { %v7207_v63 = vmul.f32 1.442695, %v7205_v23 }
 0x780   :  { %v7204_v16 = vpop.xlane.xlu1 %7203 }
 0x781   :  { %9492 = vpow2.f32 %v7207_v63  ;;  %v7206_v1 = vsub.f32 %v7195_v40, %v7204_v16 }
 0x783   :  { %v7209_v10 = vmul.f32 1.442695, %v7206_v1 }
 0x785   :  { %9494 = vpow2.f32 %v7209_v10 }
 0x78b   :  { %v9493_v48 = vpop.eup %9492 }
 0x78c   :  { %v7211_v32 = vsel %vm7198_vm8, %v9493_v48, 0.0 }
 0x78d   :  { %7212 = vadd.xlane.f32.xlu0 %v7211_v32 }
 0x78f   :  { %v9495_v31 = vpop.eup %9494 }
 0x790   :  { %v7214_v29 = vsel %vm7198_vm8, %v9495_v31, 0.0 }
 0x791   :  { %7215 = vadd.xlane.f32.xlu0 %v7214_v29 }
 0x81a   :  { %v7213_v22 = vpop.xlane.xlu0 %7212 }
 0x81b   :  { %9496 = vlog2.f32 %v7213_v22 }
 0x81e   :  { %v7216_v13 = vpop.xlane.xlu0 %7215 }
 0x81f   :  { %9498 = vlog2.f32 %v7216_v13 }
 0x825   :  { %v9497_v6 = vpop.eup %9496 }
 0x826   :  { %v7218_v55 = vmul.f32 0.6931472, %v9497_v6 }
 0x828   :  { %v7221_v50 = vsub.f32 %v7205_v23, %v7218_v55 }
 0x829   :  { %v9499_v19 = vpop.eup %9498 }
 0x82a   :  { %7223 = vst.msk [vmem:[%s13656_s9] sm:$0xff] %vm7198_vm8, %v7221_v50  ;;  %v7220_v34 = vmul.f32 0.6931472, %v9499_v19 }
 0x82c   :  { %v7222_v44 = vsub.f32 %v7206_v1, %v7220_v34 }
 0x82e   :  { %7224 = vst.msk [vmem:[%s13656_s9 + $0x8] sm:$0xff] %vm7198_vm8, %v7222_v44 }

</bundles_post_ra>
